<compile_context>
chip_gen: v6e
topology: v6e:2x2x1
jax: 0.10.0
libtpu: 0.0.40
codegen_flags: <defaults>
</compile_context>

<pallas_src>
import jax
import jax.numpy as jnp
from jax.experimental import pallas as pl
from jax.experimental.pallas import tpu as pltpu
from functools import reduce
from operator import mul


def _round_up(x, m):
    return ((x + m - 1) // m) * m


# ----------------------------------------------------------------------------
# Kernel
# ----------------------------------------------------------------------------
def autoencoder_kernel(x_ref,
                       ew1, eb1, ew2, eb2, ew3p, eb3p,   # encoder (ew3/eb3 lane-padded)
                       dw1p, db1, dw2, db2, dw3, db3,    # decoder (dw1 sublane-padded)
                       xrec_ref, z_ref):
    """One batch tile: fused encoder+decoder MLP, bf16 matmuls, f32 accumulate."""
    bf16 = jnp.bfloat16
    f32 = jnp.float32

    x = x_ref[...].astype(bf16)

    # ----- Encoder: Linear -> ReLU -> Linear -> ReLU -----
    h = jnp.dot(x, ew1[...], preferred_element_type=f32) + eb1[...]
    h = jnp.maximum(h, 0.0).astype(bf16)
    h = jnp.dot(h, ew2[...], preferred_element_type=f32) + eb2[...]
    h = jnp.maximum(h, 0.0).astype(bf16)

    # ----- Latent head (lane-dense, padded to 128 cols; real z in [:, :latent]) -----
    z = jnp.dot(h, ew3p[...], preferred_element_type=f32) + eb3p[...]

    # ----- Decoder: reuse padded z directly (dw1 rows beyond latent are zero,
    #       z cols beyond latent are zero -> exact same math as z_real @ dw1) -----
    g = jnp.dot(z.astype(bf16), dw1p[...], preferred_element_type=f32) + db1[...]
    g = jnp.maximum(g, 0.0).astype(bf16)
    g = jnp.dot(g, dw2[...], preferred_element_type=f32) + db2[...]
    g = jnp.maximum(g, 0.0).astype(bf16)
    xr = jnp.dot(g, dw3[...], preferred_element_type=f32) + db3[...]

    xrec_ref[...] = xr.astype(xrec_ref.dtype)
    z_ref[...] = z.astype(z_ref.dtype)


# ----------------------------------------------------------------------------
# Parameter construction / preparation
# ----------------------------------------------------------------------------
def init_linear_params(key, in_features, out_features, dtype=jnp.float32):
    """Deterministic init mimicking torch.nn.Linear default (uniform +-1/sqrt(in)).
    Weight is returned already transposed to (in, out)."""
    kw, kb = jax.random.split(key)
    bound = 1.0 / jnp.sqrt(jnp.asarray(in_features, dtype))
    w = jax.random.uniform(kw, (in_features, out_features), dtype, -bound, bound)
    b = jax.random.uniform(kb, (1, out_features), dtype, -bound, bound)
    return w, b


def make_autoencoder_params(image_shape, hid_size=512, latent_size=2, seed=0):
    flat = reduce(mul, image_shape, 1)
    keys = jax.random.split(jax.random.PRNGKey(seed), 6)
    # Encoder: flat -> hid -> hid -> latent
    ew1, eb1 = init_linear_params(keys[0], flat, hid_size)
    ew2, eb2 = init_linear_params(keys[1], hid_size, hid_size)
    ew3, eb3 = init_linear_params(keys[2], hid_size, latent_size)
    # Decoder: latent -> hid -> hid -> flat
    dw1, db1 = init_linear_params(keys[3], latent_size, hid_size)
    dw2, db2 = init_linear_params(keys[4], hid_size, hid_size)
    dw3, db3 = init_linear_params(keys[5], hid_size, flat)
    return (ew1, eb1, ew2, eb2, ew3, eb3, dw1, db1, dw2, db2, dw3, db3)


def prepare_kernel_params(params, latent_size):
    """bf16 weights, f32 biases, lane-padded z head, sublane-padded dw1."""
    (ew1, eb1, ew2, eb2, ew3, eb3, dw1, db1, dw2, db2, dw3, db3) = params
    f32, bf16 = jnp.float32, jnp.bfloat16
    hid = ew3.shape[0]
    lat_pad = _round_up(latent_size, 128)

    # Lane-dense z head (latent in first columns, zeros elsewhere).
    ew3p = jnp.zeros((hid, lat_pad), f32).at[:, :latent_size].set(ew3)
    eb3p = jnp.zeros((1, lat_pad), f32).at[:, :latent_size].set(eb3)
    # dw1 padded to (lat_pad, hid) with zero rows so padded-z @ dw1p == z @ dw1.
    dw1p = jnp.zeros((lat_pad, hid), f32).at[:latent_size, :].set(dw1)

    return (ew1.astype(bf16), eb1.astype(f32),
            ew2.astype(bf16), eb2.astype(f32),
            ew3p.astype(bf16), eb3p,
            dw1p.astype(bf16), db1.astype(f32),
            dw2.astype(bf16), db2.astype(f32),
            dw3.astype(bf16), db3.astype(f32))


# ----------------------------------------------------------------------------
# Forward wrapper
# ----------------------------------------------------------------------------
def autoencoder_forward(x, params, image_shape, latent_size=2, tm=None, out_dtype=None):
    """x: (B, C, H, W) float32. Returns (x_reconstructed (B,C,H,W), z (B,latent))."""
    B = x.shape[0]
    flat = reduce(mul, image_shape, 1)
    lat_pad = _round_up(latent_size, 128)
    out_dtype = x.dtype if out_dtype is None else out_dtype

    # Batch tile: at least 2 grid steps when B allows it (so "parallel" shards
    # across v7x's two TensorCores), rounded to 8 sublanes, capped at 512 rows
    # so the VMEM working set stays well under v7x's 64 MiB per-TC VMEM.
    if tm is None:
        half = -(-B // 2)  # cdiv(B, 2)
        tm = min(512, max(8, _round_up(half, 8)))
    b_pad = _round_up(B, tm)

    x_flat = x.reshape(B, flat)
    if b_pad != B:
        x_flat = jnp.pad(x_flat, ((0, b_pad - B), (0, 0)))

    kparams = prepare_kernel_params(params, latent_size)

    in_specs = [pl.BlockSpec((tm, flat), lambda i: (i, 0))]          # x: tiled over batch
    in_specs += [pl.BlockSpec(p.shape, lambda i: (0, 0))             # params: resident
                 for p in kparams]
    out_specs = (pl.BlockSpec((tm, flat), lambda i: (i, 0)),
                 pl.BlockSpec((tm, lat_pad), lambda i: (i, 0)))

    x_rec_flat, z_pad = pl.pallas_call(
        autoencoder_kernel,
        out_shape=(
            jax.ShapeDtypeStruct((b_pad, flat), out_dtype),
            jax.ShapeDtypeStruct((b_pad, lat_pad), out_dtype),
        ),
        grid_spec=pltpu.PrefetchScalarGridSpec(
            num_scalar_prefetch=0,
            grid=(b_pad // tm,),
            in_specs=in_specs,
            out_specs=out_specs,
        ),
        compiler_params=pltpu.CompilerParams(
            dimension_semantics=("parallel",),
            vmem_limit_bytes=48 << 20,
        ),
    )(x_flat, *kparams)

    x_rec = x_rec_flat[:B].reshape(B, *image_shape)
    z = z_pad[:B, :latent_size]
    return x_rec, z


# ----------------------------------------------------------------------------
# References
# ----------------------------------------------------------------------------
def autoencoder_reference_f32(x, params, image_shape):
    """Original (unfused, f32) forward semantics."""
    (ew1, eb1, ew2, eb2, ew3, eb3, dw1, db1, dw2, db2, dw3, db3) = params
    B = x.shape[0]
    h = jnp.maximum(x.reshape(B, -1) @ ew1 + eb1, 0.0)
    h = jnp.maximum(h @ ew2 + eb2, 0.0)
    z = h @ ew3 + eb3
    g = jnp.maximum(z @ dw1 + db1, 0.0)
    g = jnp.maximum(g @ dw2 + db2, 0.0)
    xr = g @ dw3 + db3
    return xr.reshape(B, *image_shape), z


def autoencoder_reference_kernel_math(x, kparams, image_shape, latent_size):
    """Pure-JAX replica of the exact kernel math (bf16 weights, padded z reuse)."""
    (ew1, eb1, ew2, eb2, ew3p, eb3p, dw1p, db1, dw2, db2, dw3, db3) = kparams
    bf16, f32 = jnp.bfloat16, jnp.float32
    B = x.shape[0]

    def dot(a, w):
        return jnp.dot(a.astype(bf16), w, preferred_element_type=f32)

    xf = x.reshape(B, -1)
    h = jnp.maximum(dot(xf, ew1) + eb1, 0.0)
    h = jnp.maximum(dot(h, ew2) + eb2, 0.0)
    z = dot(h, ew3p) + eb3p
    g = jnp.maximum(dot(z, dw1p) + db1, 0.0)
    g = jnp.maximum(dot(g, dw2) + db2, 0.0)
    xr = dot(g, dw3) + db3
    return xr.reshape(B, *image_shape), z[:, :latent_size]


# ----------------------------------------------------------------------------
if __name__ == "__main__":
    image_shape = (4, 16, 16)          # (C, H, W)
    hid_size = 512
    latent_size = 2
    batch = 2

    params = make_autoencoder_params(image_shape, hid_size, latent_size, seed=0)

    key = jax.random.PRNGKey(0)
    x = jax.random.normal(key, (batch, *image_shape), dtype=jnp.float32)

    x_rec, z = autoencoder_forward(x, params, image_shape, latent_size)
    x_rec = jax.block_until_ready(x_rec)
    z = jax.block_until_ready(z)

    assert x_rec.shape == (batch, *image_shape)
    assert z.shape == (batch, latent_size)

    # Tight check: same math (bf16 weights, padded-z decoder) in pure JAX.
    kparams = prepare_kernel_params(params, latent_size)
    x_rec_k, z_k = autoencoder_reference_kernel_math(x, kparams, image_shape, latent_size)
    assert jnp.allclose(x_rec, x_rec_k, atol=2e-3, rtol=2e-3)
    assert jnp.allclose(z, z_k, atol=2e-3, rtol=2e-3)

    # Loose check: original f32 forward (bf16 weights introduce ~1% error).
    x_rec_f, z_f = autoencoder_reference_f32(x, params, image_shape)
    assert jnp.allclose(x_rec, x_rec_f, atol=5e-2, rtol=5e-2)
    assert jnp.allclose(z, z_f, atol=5e-2, rtol=5e-2)

    print("KERNEL_OK")
</pallas_src>

<mosaic_0001>
module attributes {stable_mosaic.version = 11 : i64} {
  func.func @autoencoder_kernel(%arg0: i32, %arg1: memref<8x1024xf32, #tpu.memory_space<vmem>>, %arg2: memref<1024x512xbf16, #tpu.memory_space<vmem>>, %arg3: memref<1x512xf32, #tpu.memory_space<vmem>>, %arg4: memref<512x512xbf16, #tpu.memory_space<vmem>>, %arg5: memref<1x512xf32, #tpu.memory_space<vmem>>, %arg6: memref<512x128xbf16, #tpu.memory_space<vmem>>, %arg7: memref<1x128xf32, #tpu.memory_space<vmem>>, %arg8: memref<128x512xbf16, #tpu.memory_space<vmem>>, %arg9: memref<1x512xf32, #tpu.memory_space<vmem>>, %arg10: memref<512x512xbf16, #tpu.memory_space<vmem>>, %arg11: memref<1x512xf32, #tpu.memory_space<vmem>>, %arg12: memref<512x1024xbf16, #tpu.memory_space<vmem>>, %arg13: memref<1x1024xf32, #tpu.memory_space<vmem>>, %arg14: memref<8x1024xf32, #tpu.memory_space<vmem>>, %arg15: memref<8x128xf32, #tpu.memory_space<vmem>>) attributes {dimension_semantics = [#tpu.dimension_semantics<parallel>], iteration_bounds = array<i64: 1>, scalar_prefetch = 0 : i64, scratch_operands = 0 : i64, tpu.core_type = #tpu.core_type<tc>, window_params = [{transform_indices = @transform_0, window_bounds = array<i64: 8, 1024>}, {pipeline_mode = #tpu.pipeline_mode<synchronous>, transform_indices = @transform_1, window_bounds = array<i64: 1024, 512>}, {pipeline_mode = #tpu.pipeline_mode<synchronous>, transform_indices = @transform_2, window_bounds = array<i64: 1, 512>}, {pipeline_mode = #tpu.pipeline_mode<synchronous>, transform_indices = @transform_3, window_bounds = array<i64: 512, 512>}, {pipeline_mode = #tpu.pipeline_mode<synchronous>, transform_indices = @transform_4, window_bounds = array<i64: 1, 512>}, {pipeline_mode = #tpu.pipeline_mode<synchronous>, transform_indices = @transform_5, window_bounds = array<i64: 512, 128>}, {pipeline_mode = #tpu.pipeline_mode<synchronous>, transform_indices = @transform_6, window_bounds = array<i64: 1, 128>}, {pipeline_mode = #tpu.pipeline_mode<synchronous>, transform_indices = @transform_7, window_bounds = array<i64: 128, 512>}, {pipeline_mode = #tpu.pipeline_mode<synchronous>, transform_indices = @transform_8, window_bounds = array<i64: 1, 512>}, {pipeline_mode = #tpu.pipeline_mode<synchronous>, transform_indices = @transform_9, window_bounds = array<i64: 512, 512>}, {pipeline_mode = #tpu.pipeline_mode<synchronous>, transform_indices = @transform_10, window_bounds = array<i64: 1, 512>}, {pipeline_mode = #tpu.pipeline_mode<synchronous>, transform_indices = @transform_11, window_bounds = array<i64: 512, 1024>}, {pipeline_mode = #tpu.pipeline_mode<synchronous>, transform_indices = @transform_12, window_bounds = array<i64: 1, 1024>}, {transform_indices = @transform_13, window_bounds = array<i64: 8, 1024>}, {transform_indices = @transform_14, window_bounds = array<i64: 8, 128>}]} {
    %c0 = arith.constant 0 : index
    %c0_0 = arith.constant 0 : index
    %0 = vector.load %arg1[%c0, %c0_0] : memref<8x1024xf32, #tpu.memory_space<vmem>>, vector<8x1024xf32>
    %1 = arith.truncf %0 : vector<8x1024xf32> to vector<8x1024xbf16>
    %c0_1 = arith.constant 0 : index
    %c0_2 = arith.constant 0 : index
    %2 = vector.load %arg2[%c0_1, %c0_2] : memref<1024x512xbf16, #tpu.memory_space<vmem>>, vector<1024x512xbf16>
    %cst = arith.constant dense<0.000000e+00> : vector<8x512xf32>
    %3 = tpu.matmul %1, %2, %cst {dimension_numbers = #tpu.dot_dimension_numbers<[1], [0], [0], [1], [0, 0, 1, 1], [], []>} : vector<8x1024xbf16>, vector<1024x512xbf16>, vector<8x512xf32> -> vector<8x512xf32>
    %c0_3 = arith.constant 0 : index
    %c0_4 = arith.constant 0 : index
    %4 = vector.load %arg3[%c0_3, %c0_4] : memref<1x512xf32, #tpu.memory_space<vmem>>, vector<1x512xf32>
    %5 = vector.broadcast %4 : vector<1x512xf32> to vector<8x512xf32>
    %6 = arith.addf %3, %5 : vector<8x512xf32>
    %cst_5 = arith.constant 0.000000e+00 : f32
    %7 = vector.broadcast %cst_5 : f32 to vector<8x512xf32>
    %8 = arith.maximumf %6, %7 : vector<8x512xf32>
    %9 = arith.truncf %8 : vector<8x512xf32> to vector<8x512xbf16>
    %c0_6 = arith.constant 0 : index
    %c0_7 = arith.constant 0 : index
    %10 = vector.load %arg4[%c0_6, %c0_7] : memref<512x512xbf16, #tpu.memory_space<vmem>>, vector<512x512xbf16>
    %cst_8 = arith.constant dense<0.000000e+00> : vector<8x512xf32>
    %11 = tpu.matmul %9, %10, %cst_8 {dimension_numbers = #tpu.dot_dimension_numbers<[1], [0], [0], [1], [0, 0, 1, 1], [], []>} : vector<8x512xbf16>, vector<512x512xbf16>, vector<8x512xf32> -> vector<8x512xf32>
    %c0_9 = arith.constant 0 : index
    %c0_10 = arith.constant 0 : index
    %12 = vector.load %arg5[%c0_9, %c0_10] : memref<1x512xf32, #tpu.memory_space<vmem>>, vector<1x512xf32>
    %13 = vector.broadcast %12 : vector<1x512xf32> to vector<8x512xf32>
    %14 = arith.addf %11, %13 : vector<8x512xf32>
    %cst_11 = arith.constant 0.000000e+00 : f32
    %15 = vector.broadcast %cst_11 : f32 to vector<8x512xf32>
    %16 = arith.maximumf %14, %15 : vector<8x512xf32>
    %17 = arith.truncf %16 : vector<8x512xf32> to vector<8x512xbf16>
    %c0_12 = arith.constant 0 : index
    %c0_13 = arith.constant 0 : index
    %18 = vector.load %arg6[%c0_12, %c0_13] : memref<512x128xbf16, #tpu.memory_space<vmem>>, vector<512x128xbf16>
    %cst_14 = arith.constant dense<0.000000e+00> : vector<8x128xf32>
    %19 = tpu.matmul %17, %18, %cst_14 {dimension_numbers = #tpu.dot_dimension_numbers<[1], [0], [0], [1], [0, 0, 1, 1], [], []>} : vector<8x512xbf16>, vector<512x128xbf16>, vector<8x128xf32> -> vector<8x128xf32>
    %c0_15 = arith.constant 0 : index
    %c0_16 = arith.constant 0 : index
    %20 = vector.load %arg7[%c0_15, %c0_16] : memref<1x128xf32, #tpu.memory_space<vmem>>, vector<1x128xf32>
    %21 = vector.broadcast %20 : vector<1x128xf32> to vector<8x128xf32>
    %22 = arith.addf %19, %21 : vector<8x128xf32>
    %23 = arith.truncf %22 : vector<8x128xf32> to vector<8x128xbf16>
    %c0_17 = arith.constant 0 : index
    %c0_18 = arith.constant 0 : index
    %24 = vector.load %arg8[%c0_17, %c0_18] : memref<128x512xbf16, #tpu.memory_space<vmem>>, vector<128x512xbf16>
    %cst_19 = arith.constant dense<0.000000e+00> : vector<8x512xf32>
    %25 = tpu.matmul %23, %24, %cst_19 {dimension_numbers = #tpu.dot_dimension_numbers<[1], [0], [0], [1], [0, 0, 1, 1], [], []>} : vector<8x128xbf16>, vector<128x512xbf16>, vector<8x512xf32> -> vector<8x512xf32>
    %c0_20 = arith.constant 0 : index
    %c0_21 = arith.constant 0 : index
    %26 = vector.load %arg9[%c0_20, %c0_21] : memref<1x512xf32, #tpu.memory_space<vmem>>, vector<1x512xf32>
    %27 = vector.broadcast %26 : vector<1x512xf32> to vector<8x512xf32>
    %28 = arith.addf %25, %27 : vector<8x512xf32>
    %cst_22 = arith.constant 0.000000e+00 : f32
    %29 = vector.broadcast %cst_22 : f32 to vector<8x512xf32>
    %30 = arith.maximumf %28, %29 : vector<8x512xf32>
    %31 = arith.truncf %30 : vector<8x512xf32> to vector<8x512xbf16>
    %c0_23 = arith.constant 0 : index
    %c0_24 = arith.constant 0 : index
    %32 = vector.load %arg10[%c0_23, %c0_24] : memref<512x512xbf16, #tpu.memory_space<vmem>>, vector<512x512xbf16>
    %cst_25 = arith.constant dense<0.000000e+00> : vector<8x512xf32>
    %33 = tpu.matmul %31, %32, %cst_25 {dimension_numbers = #tpu.dot_dimension_numbers<[1], [0], [0], [1], [0, 0, 1, 1], [], []>} : vector<8x512xbf16>, vector<512x512xbf16>, vector<8x512xf32> -> vector<8x512xf32>
    %c0_26 = arith.constant 0 : index
    %c0_27 = arith.constant 0 : index
    %34 = vector.load %arg11[%c0_26, %c0_27] : memref<1x512xf32, #tpu.memory_space<vmem>>, vector<1x512xf32>
    %35 = vector.broadcast %34 : vector<1x512xf32> to vector<8x512xf32>
    %36 = arith.addf %33, %35 : vector<8x512xf32>
    %cst_28 = arith.constant 0.000000e+00 : f32
    %37 = vector.broadcast %cst_28 : f32 to vector<8x512xf32>
    %38 = arith.maximumf %36, %37 : vector<8x512xf32>
    %39 = arith.truncf %38 : vector<8x512xf32> to vector<8x512xbf16>
    %c0_29 = arith.constant 0 : index
    %c0_30 = arith.constant 0 : index
    %40 = vector.load %arg12[%c0_29, %c0_30] : memref<512x1024xbf16, #tpu.memory_space<vmem>>, vector<512x1024xbf16>
    %cst_31 = arith.constant dense<0.000000e+00> : vector<8x1024xf32>
    %41 = tpu.matmul %39, %40, %cst_31 {dimension_numbers = #tpu.dot_dimension_numbers<[1], [0], [0], [1], [0, 0, 1, 1], [], []>} : vector<8x512xbf16>, vector<512x1024xbf16>, vector<8x1024xf32> -> vector<8x1024xf32>
    %c0_32 = arith.constant 0 : index
    %c0_33 = arith.constant 0 : index
    %42 = vector.load %arg13[%c0_32, %c0_33] : memref<1x1024xf32, #tpu.memory_space<vmem>>, vector<1x1024xf32>
    %43 = vector.broadcast %42 : vector<1x1024xf32> to vector<8x1024xf32>
    %44 = arith.addf %41, %43 : vector<8x1024xf32>
    %c0_34 = arith.constant 0 : index
    %c0_35 = arith.constant 0 : index
    %45 = vector.load %arg14[%c0_34, %c0_35] : memref<8x1024xf32, #tpu.memory_space<vmem>>, vector<8x1024xf32>
    tpu.vector_store %arg14[%c0_34, %c0_35], %44 {strides = array<i32>} : memref<8x1024xf32, #tpu.memory_space<vmem>>, vector<8x1024xf32>,
    %c0_36 = arith.constant 0 : index
    %c0_37 = arith.constant 0 : index
    %46 = vector.load %arg15[%c0_36, %c0_37] : memref<8x128xf32, #tpu.memory_space<vmem>>, vector<8x128xf32>
    tpu.vector_store %arg15[%c0_36, %c0_37], %22 {strides = array<i32>} : memref<8x128xf32, #tpu.memory_space<vmem>>, vector<8x128xf32>,
    return
  }
  func.func @transform_0(%arg0: i32) -> (i32, i32) {
    %c0_i32 = arith.constant 0 : i32
    %c0_i32_0 = arith.constant 0 : i32
    return %arg0, %c0_i32 : i32, i32
  }
  func.func @transform_1(%arg0: i32) -> (i32, i32) {
    %c0_i32 = arith.constant 0 : i32
    %c0_i32_0 = arith.constant 0 : i32
    %c0_i32_1 = arith.constant 0 : i32
    return %c0_i32, %c0_i32_0 : i32, i32
  }
  func.func @transform_2(%arg0: i32) -> (i32, i32) {
    %c0_i32 = arith.constant 0 : i32
    %c0_i32_0 = arith.constant 0 : i32
    %c0_i32_1 = arith.constant 0 : i32
    return %c0_i32, %c0_i32_0 : i32, i32
  }
  func.func @transform_3(%arg0: i32) -> (i32, i32) {
    %c0_i32 = arith.constant 0 : i32
    %c0_i32_0 = arith.constant 0 : i32
    %c0_i32_1 = arith.constant 0 : i32
    return %c0_i32, %c0_i32_0 : i32, i32
  }
  func.func @transform_4(%arg0: i32) -> (i32, i32) {
    %c0_i32 = arith.constant 0 : i32
    %c0_i32_0 = arith.constant 0 : i32
    %c0_i32_1 = arith.constant 0 : i32
    return %c0_i32, %c0_i32_0 : i32, i32
  }
  func.func @transform_5(%arg0: i32) -> (i32, i32) {
    %c0_i32 = arith.constant 0 : i32
    %c0_i32_0 = arith.constant 0 : i32
    %c0_i32_1 = arith.constant 0 : i32
    return %c0_i32, %c0_i32_0 : i32, i32
  }
  func.func @transform_6(%arg0: i32) -> (i32, i32) {
    %c0_i32 = arith.constant 0 : i32
    %c0_i32_0 = arith.constant 0 : i32
    %c0_i32_1 = arith.constant 0 : i32
    return %c0_i32, %c0_i32_0 : i32, i32
  }
  func.func @transform_7(%arg0: i32) -> (i32, i32) {
    %c0_i32 = arith.constant 0 : i32
    %c0_i32_0 = arith.constant 0 : i32
    %c0_i32_1 = arith.constant 0 : i32
    return %c0_i32, %c0_i32_0 : i32, i32
  }
  func.func @transform_8(%arg0: i32) -> (i32, i32) {
    %c0_i32 = arith.constant 0 : i32
    %c0_i32_0 = arith.constant 0 : i32
    %c0_i32_1 = arith.constant 0 : i32
    return %c0_i32, %c0_i32_0 : i32, i32
  }
  func.func @transform_9(%arg0: i32) -> (i32, i32) {
    %c0_i32 = arith.constant 0 : i32
    %c0_i32_0 = arith.constant 0 : i32
    %c0_i32_1 = arith.constant 0 : i32
    return %c0_i32, %c0_i32_0 : i32, i32
  }
  func.func @transform_10(%arg0: i32) -> (i32, i32) {
    %c0_i32 = arith.constant 0 : i32
    %c0_i32_0 = arith.constant 0 : i32
    %c0_i32_1 = arith.constant 0 : i32
    return %c0_i32, %c0_i32_0 : i32, i32
  }
  func.func @transform_11(%arg0: i32) -> (i32, i32) {
    %c0_i32 = arith.constant 0 : i32
    %c0_i32_0 = arith.constant 0 : i32
    %c0_i32_1 = arith.constant 0 : i32
    return %c0_i32, %c0_i32_0 : i32, i32
  }
  func.func @transform_12(%arg0: i32) -> (i32, i32) {
    %c0_i32 = arith.constant 0 : i32
    %c0_i32_0 = arith.constant 0 : i32
    %c0_i32_1 = arith.constant 0 : i32
    return %c0_i32, %c0_i32_0 : i32, i32
  }
  func.func @transform_13(%arg0: i32) -> (i32, i32) {
    %c0_i32 = arith.constant 0 : i32
    %c0_i32_0 = arith.constant 0 : i32
    return %arg0, %c0_i32 : i32, i32
  }
  func.func @transform_14(%arg0: i32) -> (i32, i32) {
    %c0_i32 = arith.constant 0 : i32
    %c0_i32_0 = arith.constant 0 : i32
    return %arg0, %c0_i32 : i32, i32
  }
}

</mosaic_0001>

<bundles_post_ra>
// kernel: tpu_custom_call.1
= control target key start
LH: loop header
LB: loop body
LE: loop exit
PB: predicated region body
PF: predicated region fallthrough
CT: control target
= control target key end

     0   :  { %20 = vsyncpa [#allocation3], 0  ;;  %s8931_s0 = inlined_call_operand.hbm [shape: f32[8,1024], index: 0, kind: input, shape index: {}]   ;;  %s8932_s1 = inlined_call_operand.hbm [shape: bf16[1024,512], index: 1, kind: input, shape index: {}]   ;;  %s8933_s2 = inlined_call_operand.hbm [shape: f32[1,512], index: 2, kind: input, shape index: {}]   ;;  %s8934_s3 = inlined_call_operand.hbm [shape: bf16[512,512], index: 3, kind: input, shape index: {}]   ;;  %s8935_s4 = inlined_call_operand.vmem [shape: f32[1,512], index: 4, kind: input, shape index: {}]   ;;  %s8936_s5 = inlined_call_operand.hbm [shape: bf16[512,128], index: 5, kind: input, shape index: {}]   ;;  %s8937_s6 = inlined_call_operand.hbm [shape: f32[1,128], index: 6, kind: input, shape index: {}]   ;;  %s8938_s7 = inlined_call_operand.hbm [shape: bf16[128,512], index: 7, kind: input, shape index: {}]   ;;  %s8939_s8 = inlined_call_operand.vmem [shape: f32[1,512], index: 8, kind: input, shape index: {}]   ;;  %s8940_s9 = inlined_call_operand.hbm [shape: bf16[512,512], index: 9, kind: input, shape index: {}]   ;;  %s8941_s10 = inlined_call_operand.hbm [shape: f32[1,512], index: 10, kind: input, shape index: {}]   ;;  %s8942_s11 = inlined_call_operand.hbm [shape: bf16[512,1024], index: 11, kind: input, shape index: {}]   ;;  %s8943_s12 = inlined_call_operand.vmem [shape: f32[1,1024], index: 12, kind: input, shape index: {}]   ;;  %s8944_s13 = inlined_call_operand.hbm [shape: f32[8,1024], index: 13, kind: output, shape index: {0}]   ;;  %s8945_s14 = inlined_call_operand.hbm [shape: f32[8,128], index: 14, kind: output, shape index: {1}]  }
   0x1   :  { %21 = vsyncpa [#allocation6], 0 }
   0x2   :  { %22 = vsyncpa [#allocation9], 0 }
   0x3   :  { %23 = vsyncpa [#allocation12], 0 }
   0x4   :  { %24 = vsyncpa [#allocation15], 0 }
   0x5   :  { %25 = vsyncpa [#allocation18], 0 }
   0x6   :  { %26 = vsyncpa [#allocation4], 0 }
   0x7   :  { %27 = vsyncpa [#allocation21], 0  ;;  %s8608_s29 = smov [#allocation5]  }
   0x8   :  { %s43_s30 = sshll.u32 %s8608_s29, 4  ;;  %s44_s30 = int_to_ptr.vmem [resolvable:$true] %s43_s30 }
   0x9   :  { %s8360_s15 = scalar_lea.vmem %s44_s30, 32768  ;;  %p8365_p1 = scmp.lt.s32.totalorder %s44_s30, %s44_s30 }
   0xa   :  { %p8361_p0 = scmp.ne.s32.totalorder %s44_s30, %s8360_s15  ;;  %p8366_p2 = scmp.lt.s32.totalorder %s8360_s15, %s8360_s15 }
   0xc   :  { %p8367_p3 = por %p8366_p2, %p8365_p1 }
   0xe   :  { %p8368_p4 = pnand %p8367_p3, %p8361_p0 }
  0x10   :  { %8371 = shalt.err (!%p8368_p4)
}
  0x11   :  { %s8609_s16 = smov 256   ;;  %s8610_s17 = smov 16  }
  0x12   :  { %49 = dma.hbm_to_vmem [thread:$0]  %s8932_s1, 32768, %s44_s30, [#allocation6], %s8609_s16, %s8609_s16, %s8610_s17  }
  0x13   :  { %s8611_s20 = smov [#allocation8]   ;;  %s8612_s22 = smov [#allocation11]  }
  0x14   :  { %s65_s21 = sshll.u32 %s8611_s20, 4  ;;  %s92_s23 = sshll.u32 %s8612_s22, 4  ;;  %s66_s21 = int_to_ptr.vmem [resolvable:$true] %s65_s21  ;;  %s93_s23 = int_to_ptr.vmem [resolvable:$true] %s92_s23 }
  0x15   :  { %s8380_s24 = scalar_lea.vmem %s66_s21, 16384  ;;  %p8385_p6 = scmp.lt.s32.totalorder %s66_s21, %s66_s21 }
  0x16   :  { %p8381_p5 = scmp.ne.s32.totalorder %s66_s21, %s8380_s24  ;;  %p8386_p7 = scmp.lt.s32.totalorder %s8380_s24, %s8380_s24 }
  0x18   :  { %p8387_p8 = por %p8386_p7, %p8385_p6 }
  0x1a   :  { %p8388_p9 = pnand %p8387_p8, %p8381_p5 }
  0x1c   :  { %8391 = shalt.err (!%p8388_p9)
}
  0x1d   :  { %71 = dma.hbm_to_vmem [thread:$0]  %s8934_s3, 16384, %s66_s21, [#allocation9], %s8609_s16, %s8609_s16, %s8610_s17  }
  0x1e   :  { %s8400_s1 = scalar_lea.vmem %s93_s23, 16  ;;  %s8404_s27 = scalar_lea.vmem %s93_s23, 32 }
  0x1f   :  { %p8401_p10 = scmp.ne.s32.totalorder %s93_s23, %s8400_s1  ;;  %p8405_p11 = scmp.lt.s32.totalorder %s93_s23, %s93_s23 }
  0x20   :  { %p8406_p12 = scmp.lt.s32.totalorder %s8404_s27, %s8400_s1 }
  0x22   :  { %p8407_p13 = por %p8406_p12, %p8405_p11 }
  0x24   :  { %p8408_p0 = pnand %p8407_p13, %p8401_p10 }
  0x26   :  { %8411 = shalt.err (!%p8408_p0)
}
  0x27   :  { %95 = dma.hbm_to_vmem [thread:$0]  %s8937_s6, 16, %s93_s23, [#allocation12]  }
  0x28   :  { %s8613_s30 = smov [#allocation14]   ;;  %s8614_s18 = smov [#allocation2]  }
  0x29   :  { %s115_s15 = sshll.u32 %s8613_s30, 4  ;;  %s34_s19 = sshll.u32 %s8614_s18, 4  ;;  %s116_s15 = int_to_ptr.vmem [resolvable:$true] %s115_s15  ;;  %s35_s19 = int_to_ptr.vmem [resolvable:$true] %s34_s19 }
  0x2a   :  { %s8420_s20 = scalar_lea.vmem %s116_s15, 16384  ;;  %p8425_p2 = scmp.lt.s32.totalorder %s116_s15, %s116_s15 }
  0x2b   :  { %p8421_p1 = scmp.ne.s32.totalorder %s116_s15, %s8420_s20  ;;  %p8426_p3 = scmp.lt.s32.totalorder %s8420_s20, %s8420_s20 }
  0x2d   :  { %p8427_p4 = por %p8426_p3, %p8425_p2 }
  0x2f   :  { %p8428_p5 = pnand %p8427_p4, %p8421_p1 }
  0x31   :  { %8431 = shalt.err (!%p8428_p5)
}
  0x32   :  { %121 = dma.hbm_to_vmem [thread:$0]  %s8940_s9, 16384, %s116_s15, [#allocation15], %s8609_s16, %s8609_s16, %s8610_s17  }
  0x33   :  { %s8440_s6 = scalar_lea.vmem %s35_s19, 1024  ;;  %p8445_p7 = scmp.lt.s32.totalorder %s35_s19, %s35_s19 }
  0x34   :  { %p8441_p6 = scmp.ne.s32.totalorder %s35_s19, %s8440_s6  ;;  %p8446_p8 = scmp.lt.s32.totalorder %s8440_s6, %s8440_s6 }
  0x36   :  { %p8447_p9 = por %p8446_p8, %p8445_p7 }
  0x38   :  { %p8448_p10 = pnand %p8447_p9, %p8441_p6 }
  0x3a   :  { %8451 = shalt.err (!%p8448_p10)
}
  0x3b   :  { %37 = dma.hbm_to_vmem [thread:$0]  %s8931_s0, 1024, %s35_s19, [#allocation3]  }
  0x3c   :  { %s8615_s24 = smov [#allocation7]   ;;  %s8616_s26 = smov [#allocation10]  }
  0x3d   :  { %s56_s25 = sshll.u32 %s8615_s24, 4  ;;  %s79_s1 = sshll.u32 %s8616_s26, 4  ;;  %s57_s25 = int_to_ptr.vmem [resolvable:$true] %s56_s25  ;;  %s80_s1 = int_to_ptr.vmem [resolvable:$true] %s79_s1 }
  0x3e   :  { %s8460_s27 = scalar_lea.vmem %s57_s25, 64  ;;  %p8465_p12 = scmp.lt.s32.totalorder %s57_s25, %s57_s25 }
  0x3f   :  { %p8461_p11 = scmp.ne.s32.totalorder %s57_s25, %s8460_s27  ;;  %p8466_p13 = scmp.lt.s32.totalorder %s8460_s27, %s8460_s27 }
  0x41   :  { %p8467_p0 = por %p8466_p13, %p8465_p12 }
  0x43   :  { %p8468_p1 = pnand %p8467_p0, %p8461_p11 }
  0x45   :  { %8471 = shalt.err (!%p8468_p1)
}
  0x46   :  { %59 = dma.hbm_to_vmem [thread:$0]  %s8933_s2, 64, %s57_s25, [#allocation6]  }
  0x47   :  { %s8480_s29 = scalar_lea.vmem %s80_s1, 4096  ;;  %p8485_p3 = scmp.lt.s32.totalorder %s80_s1, %s80_s1 }
  0x48   :  { %p8481_p2 = scmp.ne.s32.totalorder %s80_s1, %s8480_s29  ;;  %p8486_p4 = scmp.lt.s32.totalorder %s8480_s29, %s8480_s29 }
  0x4a   :  { %p8487_p5 = por %p8486_p4, %p8485_p3 }
  0x4c   :  { %p8488_p6 = pnand %p8487_p5, %p8481_p2 }
  0x4e   :  { %8491 = shalt.err (!%p8488_p6)
}
  0x4f   :  { %s8617_s0 = smov 64   ;;  %s8618_s30 = smov 4  }
  0x50   :  { %85 = dma.hbm_to_vmem [thread:$0]  %s8936_s5, 4096, %s80_s1, [#allocation9], %s8617_s0, %s8617_s0, %s8618_s30  }
  0x51   :  { %s8619_s19 = smov [#allocation13]   ;;  %s8620_s3 = smov [#allocation16]  }
  0x52   :  { %s101_s20 = sshll.u32 %s8619_s19, 4  ;;  %s128_s21 = sshll.u32 %s8620_s3, 4  ;;  %s102_s20 = int_to_ptr.vmem [resolvable:$true] %s101_s20  ;;  %s129_s21 = int_to_ptr.vmem [resolvable:$true] %s128_s21 }
  0x53   :  { %s8500_s2 = scalar_lea.vmem %s102_s20, 4096  ;;  %p8505_p8 = scmp.lt.s32.totalorder %s102_s20, %s102_s20 }
  0x54   :  { %p8501_p7 = scmp.ne.s32.totalorder %s102_s20, %s8500_s2  ;;  %p8506_p9 = scmp.lt.s32.totalorder %s8500_s2, %s8500_s2 }
  0x56   :  { %p8507_p10 = por %p8506_p9, %p8505_p8 }
  0x58   :  { %p8508_p11 = pnand %p8507_p10, %p8501_p7 }
  0x5a   :  { %8511 = shalt.err (!%p8508_p11)
}
  0x5b   :  { %107 = dma.hbm_to_vmem [thread:$0]  %s8938_s7, 4096, %s102_s20, [#allocation12], %s8609_s16, %s8609_s16, %s8610_s17  }
  0x5c   :  { %s8520_s5 = scalar_lea.vmem %s129_s21, 64  ;;  %p8525_p13 = scmp.lt.s32.totalorder %s129_s21, %s129_s21 }
  0x5d   :  { %p8521_p12 = scmp.ne.s32.totalorder %s129_s21, %s8520_s5  ;;  %p8526_p0 = scmp.lt.s32.totalorder %s8520_s5, %s8520_s5 }
  0x5f   :  { %p8527_p1 = por %p8526_p0, %p8525_p13 }
  0x61   :  { %p8528_p2 = pnand %p8527_p1, %p8521_p12 }
  0x63   :  { %8531 = shalt.err (!%p8528_p2)
}
  0x64   :  { %131 = dma.hbm_to_vmem [thread:$0]  %s8941_s10, 64, %s129_s21, [#allocation15]  }
  0x65   :  { %s8621_s25 = smov [#allocation17]  }
  0x66   :  { %s137_s26 = sshll.u32 %s8621_s25, 4  ;;  %s138_s26 = int_to_ptr.vmem [resolvable:$true] %s137_s26 }
  0x67   :  { %s8540_s1 = scalar_lea.vmem %s138_s26, 32768  ;;  %p8545_p4 = scmp.lt.s32.totalorder %s138_s26, %s138_s26 }
  0x68   :  { %p8541_p3 = scmp.ne.s32.totalorder %s138_s26, %s8540_s1  ;;  %p8546_p5 = scmp.lt.s32.totalorder %s8540_s1, %s8540_s1 }
  0x6a   :  { %p8547_p6 = por %p8546_p5, %p8545_p4 }
  0x6c   :  { %p8548_p7 = pnand %p8547_p6, %p8541_p3 }
  0x6e   :  { %8551 = shalt.err (!%p8548_p7)
}
  0x6f   :  { %s8622_s7 = smov 512   ;;  %s8623_s16 = smov 32  }
  0x70   :  { %143 = dma.hbm_to_vmem [thread:$0]  %s8942_s11, 32768, %s138_s26, [#allocation18], %s8622_s7, %s8622_s7, %s8623_s16  }
  0x71   :  { %8592 = dma.done.wait [#allocation3], 1024  }
  0x72   :  { %8593 = vsyncadd [#allocation3], 4294966272 }
  0x73   :  { %8594 = dma.done.wait [#allocation6], 32832  }
  0x74   :  { %8595 = vsyncadd [#allocation6], 4294934464 }
  0x75   :  { %8596 = dma.done.wait [#allocation9], 20480  }
  0x76   :  { %8597 = vsyncadd [#allocation9], 4294946816 }
  0x77   :  { %8598 = dma.done.wait [#allocation12], 4112  }
  0x78   :  { %8599 = vsyncadd [#allocation12], 4294963184 }
  0x79   :  { %8600 = dma.done.wait [#allocation15], 16448  }
  0x7a   :  { %8601 = vsyncadd [#allocation15], 4294950848 }
  0x7b   :  { %8602 = dma.done.wait [#allocation18], 32768  }
  0x7c   :  { %8603 = vsyncadd [#allocation18], 4294934528  ;;  %v7504_v0 = vld [vmem:[#allocation5 + $0xe4] ss:$16 sps:$4 sm:$0xff]   ;;  %v7508_v2 = vld [vmem:[#allocation5 + $0xe0] ss:$16 sps:$4 sm:$0xff]  }
  0x7d   :  { %v7506_v1 = vld [vmem:[#allocation5 + $0x2e4] ss:$16 sps:$4 sm:$0xff]   ;;  %1751 = vmatprep.subr.bf16.mxu0 %v7504_v0  ;;  %v7509_v3 = vld [vmem:[#allocation5 + $0x2e0] ss:$16 sps:$4 sm:$0xff]   ;;  %v178_v46 = vld [vmem:[#allocation2 + $0x8] sm:$0xff] }
  0x7e   :  { %1792 = vmatprep.subr.bf16.mxu1 %v7506_v1  ;;  %v7510_v4 = vld [vmem:[#allocation5 + $0xc4] ss:$16 sps:$4 sm:$0xff]   ;;  %1752 = vmatpush1.bf16.msra.mxu0 %v7508_v2  ;;  %v7514_v6 = vld [vmem:[#allocation5 + $0xc0] ss:$16 sps:$4 sm:$0xff]   ;;  %v8744_v49 = vpack.c.bf16 %v178_v46, %v178_v46  ;;  %v180_v50 = vld [vmem:[#allocation2 + $0x18] sm:$0xff] }
  0x7f   :  { %1793 = vmatpush1.bf16.msra.mxu1 %v7509_v3  ;;  %v7512_v5 = vld [vmem:[#allocation5 + $0x2c4] ss:$16 sps:$4 sm:$0xff]   ;;  %1753 = vmatprep.subr.bf16.mxu0 %v7510_v4  ;;  %v7515_v7 = vld [vmem:[#allocation5 + $0x2c0] ss:$16 sps:$4 sm:$0xff]   ;;  %v8746_v52 = vpack.c.bf16 %v180_v50, %v180_v50 }
  0x80   :  { %1794 = vmatprep.subr.bf16.mxu1 %v7512_v5  ;;  %v7516_v8 = vld [vmem:[#allocation5 + $0xa4] ss:$16 sps:$4 sm:$0xff]   ;;  %v7520_v10 = vld [vmem:[#allocation5 + $0xa0] ss:$16 sps:$4 sm:$0xff]   ;;  %1783 = vmatprep.mubr.bf16.mxu0 %v8744_v49 }
  0x81   :  { %v7518_v9 = vld [vmem:[#allocation5 + $0x2a4] ss:$16 sps:$4 sm:$0xff]   ;;  %v7521_v11 = vld [vmem:[#allocation5 + $0x2a0] ss:$16 sps:$4 sm:$0xff]   ;;  %1824 = vmatprep.mubr.bf16.mxu1 %v8746_v52 }
  0x82   :  { %1754 = vmatpush1.bf16.msra.mxu0 %v7514_v6  ;;  %v7522_v12 = vld [vmem:[#allocation5 + $0x84] ss:$16 sps:$4 sm:$0xff]   ;;  %v7526_v14 = vld [vmem:[#allocation5 + $0x80] ss:$16 sps:$4 sm:$0xff]  }
  0x83   :  { %1795 = vmatpush1.bf16.msra.mxu1 %v7515_v7  ;;  %1755 = vmatprep.subr.bf16.mxu0 %v7516_v8  ;;  %v7524_v13 = vld [vmem:[#allocation5 + $0x284] ss:$16 sps:$4 sm:$0xff]   ;;  %v7527_v15 = vld [vmem:[#allocation5 + $0x280] ss:$16 sps:$4 sm:$0xff]  }
  0x84   :  { %1796 = vmatprep.subr.bf16.mxu1 %v7518_v9  ;;  %v7528_v16 = vld [vmem:[#allocation5 + $0x64] ss:$16 sps:$4 sm:$0xff]   ;;  %v7532_v18 = vld [vmem:[#allocation5 + $0x60] ss:$16 sps:$4 sm:$0xff]  }
  0x85   :  { %v7530_v17 = vld [vmem:[#allocation5 + $0x264] ss:$16 sps:$4 sm:$0xff]   ;;  %v7533_v19 = vld [vmem:[#allocation5 + $0x260] ss:$16 sps:$4 sm:$0xff]  }
  0x86   :  { %1756 = vmatpush1.bf16.msra.mxu0 %v7520_v10  ;;  %v7534_v20 = vld [vmem:[#allocation5 + $0x44] ss:$16 sps:$4 sm:$0xff]   ;;  %v7538_v22 = vld [vmem:[#allocation5 + $0x40] ss:$16 sps:$4 sm:$0xff]  }
  0x87   :  { %1797 = vmatpush1.bf16.msra.mxu1 %v7521_v11  ;;  %1757 = vmatprep.subr.bf16.mxu0 %v7522_v12  ;;  %v7536_v21 = vld [vmem:[#allocation5 + $0x244] ss:$16 sps:$4 sm:$0xff]   ;;  %v7539_v23 = vld [vmem:[#allocation5 + $0x240] ss:$16 sps:$4 sm:$0xff]  }
  0x88   :  { %1798 = vmatprep.subr.bf16.mxu1 %v7524_v13  ;;  %v7540_v24 = vld [vmem:[#allocation5 + $0x24] ss:$16 sps:$4 sm:$0xff]   ;;  %v7544_v26 = vld [vmem:[#allocation5 + $0x20] ss:$16 sps:$4 sm:$0xff]  }
  0x89   :  { %v7542_v25 = vld [vmem:[#allocation5 + $0x224] ss:$16 sps:$4 sm:$0xff]   ;;  %v7545_v27 = vld [vmem:[#allocation5 + $0x220] ss:$16 sps:$4 sm:$0xff]  }
  0x8a   :  { %1758 = vmatpush1.bf16.msra.mxu0 %v7526_v14  ;;  %v7546_v28 = vld [vmem:[#allocation5 + $0x4] ss:$16 sps:$4 sm:$0xff]   ;;  %v7550_v30 = vld [vmem:[#allocation5] ss:$16 sps:$4 sm:$0xff]  }
  0x8b   :  { %1799 = vmatpush1.bf16.msra.mxu1 %v7527_v15  ;;  %1759 = vmatprep.subr.bf16.mxu0 %v7528_v16  ;;  %v7548_v29 = vld [vmem:[#allocation5 + $0x204] ss:$16 sps:$4 sm:$0xff]   ;;  %v7551_v31 = vld [vmem:[#allocation5 + $0x200] ss:$16 sps:$4 sm:$0xff]  }
  0x8c   :  { %1800 = vmatprep.subr.bf16.mxu1 %v7530_v17  ;;  %v7552_v32 = vld [vmem:[#allocation5 + $0x1e4] ss:$16 sps:$4 sm:$0xff]   ;;  %v7556_v34 = vld [vmem:[#allocation5 + $0x1e0] ss:$16 sps:$4 sm:$0xff]  }
  0x8d   :  { %v7554_v33 = vld [vmem:[#allocation5 + $0x3e4] ss:$16 sps:$4 sm:$0xff]   ;;  %v7557_v35 = vld [vmem:[#allocation5 + $0x3e0] ss:$16 sps:$4 sm:$0xff]  }
  0x8e   :  { %1760 = vmatpush1.bf16.msra.mxu0 %v7532_v18  ;;  %v7558_v36 = vld [vmem:[#allocation5 + $0x1c4] ss:$16 sps:$4 sm:$0xff]   ;;  %v7562_v38 = vld [vmem:[#allocation5 + $0x1c0] ss:$16 sps:$4 sm:$0xff]  }
  0x8f   :  { %1801 = vmatpush1.bf16.msra.mxu1 %v7533_v19  ;;  %1761 = vmatprep.subr.bf16.mxu0 %v7534_v20  ;;  %v7560_v37 = vld [vmem:[#allocation5 + $0x3c4] ss:$16 sps:$4 sm:$0xff]   ;;  %v7563_v39 = vld [vmem:[#allocation5 + $0x3c0] ss:$16 sps:$4 sm:$0xff]  }
  0x90   :  { %1802 = vmatprep.subr.bf16.mxu1 %v7536_v21  ;;  %v7564_v40 = vld [vmem:[#allocation5 + $0x1a4] ss:$16 sps:$4 sm:$0xff]   ;;  %v7568_v42 = vld [vmem:[#allocation5 + $0x1a0] ss:$16 sps:$4 sm:$0xff]  }
  0x91   :  { %v7566_v41 = vld [vmem:[#allocation5 + $0x3a4] ss:$16 sps:$4 sm:$0xff]   ;;  %v7569_v43 = vld [vmem:[#allocation5 + $0x3a0] ss:$16 sps:$4 sm:$0xff]  }
  0x92   :  { %1762 = vmatpush1.bf16.msra.mxu0 %v7538_v22  ;;  %v7570_v44 = vld [vmem:[#allocation5 + $0x184] ss:$16 sps:$4 sm:$0xff]   ;;  %v7574_v47 = vld [vmem:[#allocation5 + $0x180] ss:$16 sps:$4 sm:$0xff]  }
  0x93   :  { %1803 = vmatpush1.bf16.msra.mxu1 %v7539_v23  ;;  %1763 = vmatprep.subr.bf16.mxu0 %v7540_v24  ;;  %v7572_v45 = vld [vmem:[#allocation5 + $0x384] ss:$16 sps:$4 sm:$0xff]   ;;  %v7575_v48 = vld [vmem:[#allocation5 + $0x380] ss:$16 sps:$4 sm:$0xff]  }
  0x94   :  { %1804 = vmatprep.subr.bf16.mxu1 %v7542_v25  ;;  %v7576_v51 = vld [vmem:[#allocation5 + $0x164] ss:$16 sps:$4 sm:$0xff]   ;;  %v7580_v54 = vld [vmem:[#allocation5 + $0x160] ss:$16 sps:$4 sm:$0xff]  }
  0x95   :  { %v7578_v53 = vld [vmem:[#allocation5 + $0x364] ss:$16 sps:$4 sm:$0xff]   ;;  %v7581_v55 = vld [vmem:[#allocation5 + $0x360] ss:$16 sps:$4 sm:$0xff]  }
  0x96   :  { %1764 = vmatpush1.bf16.msra.mxu0 %v7544_v26  ;;  %v7582_v56 = vld [vmem:[#allocation5 + $0x144] ss:$16 sps:$4 sm:$0xff]   ;;  %v7586_v58 = vld [vmem:[#allocation5 + $0x140] ss:$16 sps:$4 sm:$0xff]  }
  0x97   :  { %1805 = vmatpush1.bf16.msra.mxu1 %v7545_v27  ;;  %1765 = vmatprep.subr.bf16.mxu0 %v7546_v28  ;;  %v7584_v57 = vld [vmem:[#allocation5 + $0x344] ss:$16 sps:$4 sm:$0xff]   ;;  %v7587_v59 = vld [vmem:[#allocation5 + $0x340] ss:$16 sps:$4 sm:$0xff]  }
  0x98   :  { %1806 = vmatprep.subr.bf16.mxu1 %v7548_v29  ;;  %v7588_v60 = vld [vmem:[#allocation5 + $0x124] ss:$16 sps:$4 sm:$0xff]   ;;  %v7592_v62 = vld [vmem:[#allocation5 + $0x120] ss:$16 sps:$4 sm:$0xff]  }
  0x99   :  { %v7590_v61 = vld [vmem:[#allocation5 + $0x324] ss:$16 sps:$4 sm:$0xff]   ;;  %v7593_v63 = vld [vmem:[#allocation5 + $0x320] ss:$16 sps:$4 sm:$0xff]  }
  0x9a   :  { %1766 = vmatpush1.bf16.msra.mxu0 %v7550_v30  ;;  %v7594_v0 = vld [vmem:[#allocation5 + $0x104] ss:$16 sps:$4 sm:$0xff]   ;;  %v7598_v2 = vld [vmem:[#allocation5 + $0x100] ss:$16 sps:$4 sm:$0xff]  }
  0x9b   :  { %1807 = vmatpush1.bf16.msra.mxu1 %v7551_v31  ;;  %1767 = vmatprep.subr.bf16.mxu0 %v7552_v32  ;;  %v7596_v1 = vld [vmem:[#allocation5 + $0x304] ss:$16 sps:$4 sm:$0xff]   ;;  %v7599_v3 = vld [vmem:[#allocation5 + $0x300] ss:$16 sps:$4 sm:$0xff]  }
  0x9c   :  { %1808 = vmatprep.subr.bf16.mxu1 %v7554_v33  ;;  %v177_v4 = vld [vmem:[#allocation2] sm:$0xff]  ;;  %v179_v5 = vld [vmem:[#allocation2 + $0x10] sm:$0xff] }
  0x9d   :  { %v7602_v6 = vld [vmem:[#allocation5 + $0x4e4] ss:$16 sps:$4 sm:$0xff]   ;;  %v8750_v8 = vpack.c.bf16 %v177_v4, %v177_v4  ;;  %v8752_v9 = vpack.c.bf16 %v179_v5, %v179_v5  ;;  %v7600_v10 = vld [vmem:[#allocation5 + $0x4e0] ss:$16 sps:$4 sm:$0xff]  }
  0x9e   :  { %1768 = vmatpush2.bf16.msra.mxu0 %v7556_v34  ;;  %v7605_v7 = vld [vmem:[#allocation5 + $0x6e4] ss:$16 sps:$4 sm:$0xff]   ;;  %v7603_v11 = vld [vmem:[#allocation5 + $0x6e0] ss:$16 sps:$4 sm:$0xff]   ;;  %v182_v34 = vld [vmem:[#allocation2 + $0x28] sm:$0xff] }
  0x9f   :  { %1809 = vmatpush2.bf16.msra.mxu1 %v7557_v35  ;;  %1769 = vmatprep.subr.bf16.mxu0 %v7558_v36  ;;  %v7608_v12 = vld [vmem:[#allocation5 + $0x4c4] ss:$16 sps:$4 sm:$0xff]   ;;  %v7606_v14 = vld [vmem:[#allocation5 + $0x4c0] ss:$16 sps:$4 sm:$0xff]  }
  0xa0   :  { %1810 = vmatprep.subr.bf16.mxu1 %v7560_v37  ;;  %v7611_v13 = vld [vmem:[#allocation5 + $0x6c4] ss:$16 sps:$4 sm:$0xff]   ;;  %v7609_v15 = vld [vmem:[#allocation5 + $0x6c0] ss:$16 sps:$4 sm:$0xff]   ;;  %v8756_v37 = vpack.c.bf16 %v182_v34, %v182_v34  ;;  %v7714_v34 = vld [vmem:[#allocation5 + $0x88] ss:$16 sps:$4 sm:$0xff]  }
  0xa1   :  { %v7614_v16 = vld [vmem:[#allocation5 + $0x4a4] ss:$16 sps:$4 sm:$0xff]   ;;  %v7612_v18 = vld [vmem:[#allocation5 + $0x4a0] ss:$16 sps:$4 sm:$0xff]  }
  0xa2   :  { %1770 = vmatpush2.bf16.msra.mxu0 %v7562_v38  ;;  %v7617_v17 = vld [vmem:[#allocation5 + $0x6a4] ss:$16 sps:$4 sm:$0xff]   ;;  %v7615_v19 = vld [vmem:[#allocation5 + $0x6a0] ss:$16 sps:$4 sm:$0xff]   ;;  %v184_v38 = vld [vmem:[#allocation2 + $0x38] sm:$0xff] }
  0xa3   :  { %1811 = vmatpush2.bf16.msra.mxu1 %v7563_v39  ;;  %1771 = vmatprep.subr.bf16.mxu0 %v7564_v40  ;;  %v7620_v20 = vld [vmem:[#allocation5 + $0x484] ss:$16 sps:$4 sm:$0xff]   ;;  %v7618_v22 = vld [vmem:[#allocation5 + $0x480] ss:$16 sps:$4 sm:$0xff]   ;;  %v8758_v40 = vpack.c.bf16 %v184_v38, %v184_v38  ;;  %v7725_v38 = vld [vmem:[#allocation5 + $0x26c] ss:$16 sps:$4 sm:$0xff]  }
  0xa4   :  { %1812 = vmatprep.subr.bf16.mxu1 %v7566_v41  ;;  %v7623_v21 = vld [vmem:[#allocation5 + $0x684] ss:$16 sps:$4 sm:$0xff]   ;;  %v7621_v23 = vld [vmem:[#allocation5 + $0x680] ss:$16 sps:$4 sm:$0xff]  }
  0xa5   :  { %v7626_v24 = vld [vmem:[#allocation5 + $0x464] ss:$16 sps:$4 sm:$0xff]   ;;  %v7624_v26 = vld [vmem:[#allocation5 + $0x460] ss:$16 sps:$4 sm:$0xff]  }
  0xa6   :  { %1772 = vmatpush2.bf16.msra.mxu0 %v7568_v42  ;;  %v7629_v25 = vld [vmem:[#allocation5 + $0x664] ss:$16 sps:$4 sm:$0xff]   ;;  %v7627_v27 = vld [vmem:[#allocation5 + $0x660] ss:$16 sps:$4 sm:$0xff]  }
  0xa7   :  { %1813 = vmatpush2.bf16.msra.mxu1 %v7569_v43  ;;  %1773 = vmatprep.subr.bf16.mxu0 %v7570_v44  ;;  %v7632_v28 = vld [vmem:[#allocation5 + $0x444] ss:$16 sps:$4 sm:$0xff]   ;;  %v7630_v30 = vld [vmem:[#allocation5 + $0x440] ss:$16 sps:$4 sm:$0xff]  }
  0xa8   :  { %1814 = vmatprep.subr.bf16.mxu1 %v7572_v45  ;;  %v7635_v29 = vld [vmem:[#allocation5 + $0x644] ss:$16 sps:$4 sm:$0xff]   ;;  %v7633_v31 = vld [vmem:[#allocation5 + $0x640] ss:$16 sps:$4 sm:$0xff]  }
  0xa9   :  { %v7638_v32 = vld [vmem:[#allocation5 + $0x424] ss:$16 sps:$4 sm:$0xff]   ;;  %v7636_v35 = vld [vmem:[#allocation5 + $0x420] ss:$16 sps:$4 sm:$0xff]  }
  0xaa   :  { %1774 = vmatpush2.bf16.msra.mxu0 %v7574_v47  ;;  %v7641_v33 = vld [vmem:[#allocation5 + $0x624] ss:$16 sps:$4 sm:$0xff]   ;;  %v7639_v36 = vld [vmem:[#allocation5 + $0x620] ss:$16 sps:$4 sm:$0xff]  }
  0xab   :  { %1815 = vmatpush2.bf16.msra.mxu1 %v7575_v48  ;;  %1775 = vmatprep.subr.bf16.mxu0 %v7576_v51  ;;  %v7644_v39 = vld [vmem:[#allocation5 + $0x404] ss:$16 sps:$4 sm:$0xff]   ;;  %v7642_v42 = vld [vmem:[#allocation5 + $0x400] ss:$16 sps:$4 sm:$0xff]  }
  0xac   :  { %1816 = vmatprep.subr.bf16.mxu1 %v7578_v53  ;;  %v7647_v41 = vld [vmem:[#allocation5 + $0x604] ss:$16 sps:$4 sm:$0xff]   ;;  %v7645_v43 = vld [vmem:[#allocation5 + $0x600] ss:$16 sps:$4 sm:$0xff]  }
  0xad   :  { %v7650_v44 = vld [vmem:[#allocation5 + $0x5e4] ss:$16 sps:$4 sm:$0xff]   ;;  %v7648_v46 = vld [vmem:[#allocation5 + $0x5e0] ss:$16 sps:$4 sm:$0xff]  }
  0xae   :  { %1776 = vmatpush2.bf16.msra.mxu0 %v7580_v54  ;;  %v7653_v45 = vld [vmem:[#allocation5 + $0x7e4] ss:$16 sps:$4 sm:$0xff]   ;;  %v7651_v47 = vld [vmem:[#allocation5 + $0x7e0] ss:$16 sps:$4 sm:$0xff]  }
  0xaf   :  { %1817 = vmatpush2.bf16.msra.mxu1 %v7581_v55  ;;  %1777 = vmatprep.subr.bf16.mxu0 %v7582_v56  ;;  %v7656_v48 = vld [vmem:[#allocation5 + $0x5c4] ss:$16 sps:$4 sm:$0xff]   ;;  %v7654_v51 = vld [vmem:[#allocation5 + $0x5c0] ss:$16 sps:$4 sm:$0xff]  }
  0xb0   :  { %1818 = vmatprep.subr.bf16.mxu1 %v7584_v57  ;;  %v7659_v50 = vld [vmem:[#allocation5 + $0x7c4] ss:$16 sps:$4 sm:$0xff]   ;;  %v7657_v53 = vld [vmem:[#allocation5 + $0x7c0] ss:$16 sps:$4 sm:$0xff]  }
  0xb1   :  { %v7662_v54 = vld [vmem:[#allocation5 + $0x5a4] ss:$16 sps:$4 sm:$0xff]   ;;  %v7660_v56 = vld [vmem:[#allocation5 + $0x5a0] ss:$16 sps:$4 sm:$0xff]  }
  0xb2   :  { %1778 = vmatpush2.bf16.msra.mxu0 %v7586_v58  ;;  %v7665_v55 = vld [vmem:[#allocation5 + $0x7a4] ss:$16 sps:$4 sm:$0xff]   ;;  %v7663_v57 = vld [vmem:[#allocation5 + $0x7a0] ss:$16 sps:$4 sm:$0xff]  }
  0xb3   :  { %1819 = vmatpush2.bf16.msra.mxu1 %v7587_v59  ;;  %1779 = vmatprep.subr.bf16.mxu0 %v7588_v60  ;;  %v7668_v58 = vld [vmem:[#allocation5 + $0x584] ss:$16 sps:$4 sm:$0xff]   ;;  %v7666_v60 = vld [vmem:[#allocation5 + $0x580] ss:$16 sps:$4 sm:$0xff]  }
  0xb4   :  { %1820 = vmatprep.subr.bf16.mxu1 %v7590_v61  ;;  %v7671_v59 = vld [vmem:[#allocation5 + $0x784] ss:$16 sps:$4 sm:$0xff]   ;;  %v7669_v61 = vld [vmem:[#allocation5 + $0x780] ss:$16 sps:$4 sm:$0xff]  }
  0xb5   :  { %v7678_v4 = vld [vmem:[#allocation5 + $0x540] ss:$16 sps:$4 sm:$0xff]  }
  0xb6   :  { %1780 = vmatpush2.bf16.msra.mxu0 %v7592_v62  ;;  %v7674_v62 = vld [vmem:[#allocation5 + $0x564] ss:$16 sps:$4 sm:$0xff]   ;;  %v7681_v5 = vld [vmem:[#allocation5 + $0x740] ss:$16 sps:$4 sm:$0xff]  }
  0xb7   :  { %1821 = vmatpush2.bf16.msra.mxu1 %v7593_v63  ;;  %1781 = vmatprep.subr.bf16.mxu0 %v7594_v0  ;;  %v7677_v63 = vld [vmem:[#allocation5 + $0x764] ss:$16 sps:$4 sm:$0xff]   ;;  %v7672_v0 = vld [vmem:[#allocation5 + $0x560] ss:$16 sps:$4 sm:$0xff]  }
  0xb8   :  { %1822 = vmatprep.subr.bf16.mxu1 %v7596_v1  ;;  %v7675_v1 = vld [vmem:[#allocation5 + $0x760] ss:$16 sps:$4 sm:$0xff]  }
  0xba   :  { %1782 = vmatpush2.bf16.msra.mxu0 %v7598_v2  ;;  %v7680_v2 = vld [vmem:[#allocation5 + $0x544] ss:$16 sps:$4 sm:$0xff]  }
  0xbb   :  { %1823 = vmatpush2.bf16.msra.mxu1 %v7599_v3  ;;  %1833 = vmatprep.subr.bf16.mxu0 %v7602_v6  ;;  %v7683_v3 = vld [vmem:[#allocation5 + $0x744] ss:$16 sps:$4 sm:$0xff]  }
  0xbc   :  { %1874 = vmatprep.subr.bf16.mxu1 %v7605_v7  ;;  %v7686_v6 = vld [vmem:[#allocation5 + $0x524] ss:$16 sps:$4 sm:$0xff]  }
  0xbd   :  { %1784 = vmatmul.mubr.bf16.vlgmr.msra.gmra.mxu0 %v8750_v8  ;;  %v7689_v7 = vld [vmem:[#allocation5 + $0x724] ss:$16 sps:$4 sm:$0xff]  }
  0xbe   :  { %1825 = vmatmul.mubr.bf16.vlgmr.msra.gmra.mxu1 %v8752_v9  ;;  %1834 = vmatpush1.bf16.msra.mxu0 %v7600_v10  ;;  %v7684_v10 = vld [vmem:[#allocation5 + $0x520] ss:$16 sps:$4 sm:$0xff]  }
  0xbf   :  { %1875 = vmatpush1.bf16.msra.mxu1 %v7603_v11  ;;  %1835 = vmatprep.subr.bf16.mxu0 %v7608_v12  ;;  %v7687_v11 = vld [vmem:[#allocation5 + $0x720] ss:$16 sps:$4 sm:$0xff]   ;;  %v7692_v12 = vld [vmem:[#allocation5 + $0x504] ss:$16 sps:$4 sm:$0xff]  }
  0xc0   :  { %1876 = vmatprep.subr.bf16.mxu1 %v7611_v13  ;;  %1865 = vmatprep.mubr.bf16.mxu0 %v8756_v37  ;;  %v7695_v13 = vld [vmem:[#allocation5 + $0x704] ss:$16 sps:$4 sm:$0xff]  }
  0xc1   :  { %1906 = vmatprep.mubr.bf16.mxu1 %v8758_v40 }
  0xc2   :  { %1836 = vmatpush1.bf16.msra.mxu0 %v7606_v14  ;;  %v7690_v14 = vld [vmem:[#allocation5 + $0x500] ss:$16 sps:$4 sm:$0xff]  }
  0xc3   :  { %1877 = vmatpush1.bf16.msra.mxu1 %v7609_v15  ;;  %1837 = vmatprep.subr.bf16.mxu0 %v7614_v16  ;;  %v7693_v15 = vld [vmem:[#allocation5 + $0x700] ss:$16 sps:$4 sm:$0xff]  }
  0xc4   :  { %1878 = vmatprep.subr.bf16.mxu1 %v7617_v17  ;;  %v181_v16 = vld [vmem:[#allocation2 + $0x20] sm:$0xff]  ;;  %v183_v17 = vld [vmem:[#allocation2 + $0x30] sm:$0xff] }
  0xc6   :  { %1838 = vmatpush1.bf16.msra.mxu0 %v7612_v18  ;;  %v7698_v18 = vld [vmem:[#allocation5 + $0xec] ss:$16 sps:$4 sm:$0xff]  }
  0xc7   :  { %1879 = vmatpush1.bf16.msra.mxu1 %v7615_v19  ;;  %1839 = vmatprep.subr.bf16.mxu0 %v7620_v20  ;;  %v7701_v19 = vld [vmem:[#allocation5 + $0x2ec] ss:$16 sps:$4 sm:$0xff]   ;;  %v8762_v20 = vpack.c.bf16 %v181_v16, %v181_v16 }
  0xc8   :  { %1880 = vmatprep.subr.bf16.mxu1 %v7623_v21  ;;  %v8764_v21 = vpack.c.bf16 %v183_v17, %v183_v17  ;;  %v7782_v16 = vld [vmem:[#allocation5 + $0x12c] ss:$16 sps:$4 sm:$0xff]  }
  0xc9   :  { %v7785_v17 = vld [vmem:[#allocation5 + $0x32c] ss:$16 sps:$4 sm:$0xff]  }
  0xca   :  { %1840 = vmatpush1.bf16.msra.mxu0 %v7618_v22  ;;  %v7696_v22 = vld [vmem:[#allocation5 + $0xe8] ss:$16 sps:$4 sm:$0xff]  }
  0xcb   :  { %1881 = vmatpush1.bf16.msra.mxu1 %v7621_v23  ;;  %1841 = vmatprep.subr.bf16.mxu0 %v7626_v24  ;;  %v7699_v23 = vld [vmem:[#allocation5 + $0x2e8] ss:$16 sps:$4 sm:$0xff]   ;;  %v7704_v24 = vld [vmem:[#allocation5 + $0xcc] ss:$16 sps:$4 sm:$0xff]  }
  0xcc   :  { %1882 = vmatprep.subr.bf16.mxu1 %v7629_v25  ;;  %v7707_v25 = vld [vmem:[#allocation5 + $0x2cc] ss:$16 sps:$4 sm:$0xff]  }
  0xce   :  { %1842 = vmatpush1.bf16.msra.mxu0 %v7624_v26  ;;  %v7702_v26 = vld [vmem:[#allocation5 + $0xc8] ss:$16 sps:$4 sm:$0xff]  }
  0xcf   :  { %1883 = vmatpush1.bf16.msra.mxu1 %v7627_v27  ;;  %1843 = vmatprep.subr.bf16.mxu0 %v7632_v28  ;;  %v7705_v27 = vld [vmem:[#allocation5 + $0x2c8] ss:$16 sps:$4 sm:$0xff]   ;;  %v7710_v28 = vld [vmem:[#allocation5 + $0xac] ss:$16 sps:$4 sm:$0xff]  }
  0xd0   :  { %1884 = vmatprep.subr.bf16.mxu1 %v7635_v29  ;;  %v7713_v29 = vld [vmem:[#allocation5 + $0x2ac] ss:$16 sps:$4 sm:$0xff]  }
  0xd2   :  { %1844 = vmatpush1.bf16.msra.mxu0 %v7630_v30  ;;  %v7708_v30 = vld [vmem:[#allocation5 + $0xa8] ss:$16 sps:$4 sm:$0xff]  }
  0xd3   :  { %1885 = vmatpush1.bf16.msra.mxu1 %v7633_v31  ;;  %1845 = vmatprep.subr.bf16.mxu0 %v7638_v32  ;;  %v7711_v31 = vld [vmem:[#allocation5 + $0x2a8] ss:$16 sps:$4 sm:$0xff]   ;;  %v7716_v32 = vld [vmem:[#allocation5 + $0x8c] ss:$16 sps:$4 sm:$0xff]  }
  0xd4   :  { %1886 = vmatprep.subr.bf16.mxu1 %v7641_v33  ;;  %v7719_v33 = vld [vmem:[#allocation5 + $0x28c] ss:$16 sps:$4 sm:$0xff]  }
  0xd6   :  { %1846 = vmatpush1.bf16.msra.mxu0 %v7636_v35  ;;  %v7717_v35 = vld [vmem:[#allocation5 + $0x288] ss:$16 sps:$4 sm:$0xff]  }
  0xd7   :  { %1887 = vmatpush1.bf16.msra.mxu1 %v7639_v36  ;;  %1847 = vmatprep.subr.bf16.mxu0 %v7644_v39  ;;  %v7722_v36 = vld [vmem:[#allocation5 + $0x6c] ss:$16 sps:$4 sm:$0xff]   ;;  %v7720_v39 = vld [vmem:[#allocation5 + $0x68] ss:$16 sps:$4 sm:$0xff]  }
  0xd8   :  { %1888 = vmatprep.subr.bf16.mxu1 %v7647_v41  ;;  %v7731_v41 = vld [vmem:[#allocation5 + $0x24c] ss:$16 sps:$4 sm:$0xff]  }
  0xda   :  { %1848 = vmatpush1.bf16.msra.mxu0 %v7642_v42  ;;  %v7726_v42 = vld [vmem:[#allocation5 + $0x48] ss:$16 sps:$4 sm:$0xff]  }
  0xdb   :  { %1889 = vmatpush1.bf16.msra.mxu1 %v7645_v43  ;;  %1849 = vmatprep.subr.bf16.mxu0 %v7650_v44  ;;  %v7729_v43 = vld [vmem:[#allocation5 + $0x248] ss:$16 sps:$4 sm:$0xff]   ;;  %v7734_v44 = vld [vmem:[#allocation5 + $0x2c] ss:$16 sps:$4 sm:$0xff]  }
  0xdc   :  { %1890 = vmatprep.subr.bf16.mxu1 %v7653_v45  ;;  %v7737_v45 = vld [vmem:[#allocation5 + $0x22c] ss:$16 sps:$4 sm:$0xff]  }
  0xde   :  { %1850 = vmatpush2.bf16.msra.mxu0 %v7648_v46  ;;  %v7732_v46 = vld [vmem:[#allocation5 + $0x28] ss:$16 sps:$4 sm:$0xff]  }
  0xdf   :  { %1891 = vmatpush2.bf16.msra.mxu1 %v7651_v47  ;;  %1851 = vmatprep.subr.bf16.mxu0 %v7656_v48  ;;  %v7735_v47 = vld [vmem:[#allocation5 + $0x228] ss:$16 sps:$4 sm:$0xff]   ;;  %v7740_v48 = vld [vmem:[#allocation5 + $0xc] ss:$16 sps:$4 sm:$0xff]  }
  0xe0   :  { %1892 = vmatprep.subr.bf16.mxu1 %v7659_v50  ;;  %v7743_v50 = vld [vmem:[#allocation5 + $0x20c] ss:$16 sps:$4 sm:$0xff]  }
  0xe2   :  { %1852 = vmatpush2.bf16.msra.mxu0 %v7654_v51  ;;  %v7738_v51 = vld [vmem:[#allocation5 + $0x8] ss:$16 sps:$4 sm:$0xff]  }
  0xe3   :  { %1893 = vmatpush2.bf16.msra.mxu1 %v7657_v53  ;;  %1853 = vmatprep.subr.bf16.mxu0 %v7662_v54  ;;  %v7741_v53 = vld [vmem:[#allocation5 + $0x208] ss:$16 sps:$4 sm:$0xff]   ;;  %v7746_v54 = vld [vmem:[#allocation5 + $0x1ec] ss:$16 sps:$4 sm:$0xff]  }
  0xe4   :  { %1894 = vmatprep.subr.bf16.mxu1 %v7665_v55  ;;  %v7749_v55 = vld [vmem:[#allocation5 + $0x3ec] ss:$16 sps:$4 sm:$0xff]  }
  0xe6   :  { %1854 = vmatpush2.bf16.msra.mxu0 %v7660_v56  ;;  %v7744_v56 = vld [vmem:[#allocation5 + $0x1e8] ss:$16 sps:$4 sm:$0xff]  }
  0xe7   :  { %1895 = vmatpush2.bf16.msra.mxu1 %v7663_v57  ;;  %1855 = vmatprep.subr.bf16.mxu0 %v7668_v58  ;;  %v7747_v57 = vld [vmem:[#allocation5 + $0x3e8] ss:$16 sps:$4 sm:$0xff]   ;;  %v7752_v58 = vld [vmem:[#allocation5 + $0x1cc] ss:$16 sps:$4 sm:$0xff]  }
  0xe8   :  { %1896 = vmatprep.subr.bf16.mxu1 %v7671_v59  ;;  %v7755_v59 = vld [vmem:[#allocation5 + $0x3cc] ss:$16 sps:$4 sm:$0xff]  }
  0xea   :  { %1856 = vmatpush2.bf16.msra.mxu0 %v7666_v60  ;;  %v7750_v60 = vld [vmem:[#allocation5 + $0x1c8] ss:$16 sps:$4 sm:$0xff]  }
  0xeb   :  { %1897 = vmatpush2.bf16.msra.mxu1 %v7669_v61  ;;  %1857 = vmatprep.subr.bf16.mxu0 %v7674_v62  ;;  %v7753_v61 = vld [vmem:[#allocation5 + $0x3c8] ss:$16 sps:$4 sm:$0xff]   ;;  %v7758_v62 = vld [vmem:[#allocation5 + $0x1ac] ss:$16 sps:$4 sm:$0xff]  }
  0xec   :  { %1898 = vmatprep.subr.bf16.mxu1 %v7677_v63  ;;  %v7761_v63 = vld [vmem:[#allocation5 + $0x3ac] ss:$16 sps:$4 sm:$0xff]  }
  0xee   :  { %1858 = vmatpush2.bf16.msra.mxu0 %v7672_v0  ;;  %v7756_v0 = vld [vmem:[#allocation5 + $0x1a8] ss:$16 sps:$4 sm:$0xff]  }
  0xef   :  { %1899 = vmatpush2.bf16.msra.mxu1 %v7675_v1  ;;  %1859 = vmatprep.subr.bf16.mxu0 %v7680_v2  ;;  %v7759_v1 = vld [vmem:[#allocation5 + $0x3a8] ss:$16 sps:$4 sm:$0xff]   ;;  %v7764_v2 = vld [vmem:[#allocation5 + $0x18c] ss:$16 sps:$4 sm:$0xff]  }
  0xf0   :  { %1900 = vmatprep.subr.bf16.mxu1 %v7683_v3  ;;  %v7767_v3 = vld [vmem:[#allocation5 + $0x38c] ss:$16 sps:$4 sm:$0xff]  }
  0xf2   :  { %1860 = vmatpush2.bf16.msra.mxu0 %v7678_v4  ;;  %v7762_v4 = vld [vmem:[#allocation5 + $0x188] ss:$16 sps:$4 sm:$0xff]  }
  0xf3   :  { %1901 = vmatpush2.bf16.msra.mxu1 %v7681_v5  ;;  %1861 = vmatprep.subr.bf16.mxu0 %v7686_v6  ;;  %v7765_v5 = vld [vmem:[#allocation5 + $0x388] ss:$16 sps:$4 sm:$0xff]   ;;  %v7770_v6 = vld [vmem:[#allocation5 + $0x16c] ss:$16 sps:$4 sm:$0xff]  }
  0xf4   :  { %1902 = vmatprep.subr.bf16.mxu1 %v7689_v7  ;;  %v7773_v7 = vld [vmem:[#allocation5 + $0x36c] ss:$16 sps:$4 sm:$0xff]  }
  0xf6   :  { %1862 = vmatpush2.bf16.msra.mxu0 %v7684_v10  ;;  %v7768_v10 = vld [vmem:[#allocation5 + $0x168] ss:$16 sps:$4 sm:$0xff]  }
  0xf7   :  { %1903 = vmatpush2.bf16.msra.mxu1 %v7687_v11  ;;  %1863 = vmatprep.subr.bf16.mxu0 %v7692_v12  ;;  %v7771_v11 = vld [vmem:[#allocation5 + $0x368] ss:$16 sps:$4 sm:$0xff]   ;;  %v7776_v12 = vld [vmem:[#allocation5 + $0x14c] ss:$16 sps:$4 sm:$0xff]  }
  0xf8   :  { %1904 = vmatprep.subr.bf16.mxu1 %v7695_v13  ;;  %v7779_v13 = vld [vmem:[#allocation5 + $0x34c] ss:$16 sps:$4 sm:$0xff]  }
  0xfa   :  { %1864 = vmatpush2.bf16.msra.mxu0 %v7690_v14  ;;  %v7774_v14 = vld [vmem:[#allocation5 + $0x148] ss:$16 sps:$4 sm:$0xff]  }
  0xfb   :  { %1905 = vmatpush2.bf16.msra.mxu1 %v7693_v15  ;;  %1915 = vmatprep.subr.bf16.mxu0 %v7698_v18  ;;  %v7777_v15 = vld [vmem:[#allocation5 + $0x348] ss:$16 sps:$4 sm:$0xff]  }
  0xfc   :  { %1956 = vmatprep.subr.bf16.mxu1 %v7701_v19  ;;  %v7780_v18 = vld [vmem:[#allocation5 + $0x128] ss:$16 sps:$4 sm:$0xff]  }
  0xfd   :  { %1866 = vmatmul.mubr.bf16.vlgmr.msra.gmra.mxu0 %v8762_v20  ;;  %v7783_v19 = vld [vmem:[#allocation5 + $0x328] ss:$16 sps:$4 sm:$0xff]  }
  0xfe   :  { %1907 = vmatmul.mubr.bf16.vlgmr.msra.gmra.mxu1 %v8764_v21  ;;  %1916 = vmatpush1.bf16.msra.mxu0 %v7696_v22  ;;  %v7788_v22 = vld [vmem:[#allocation5 + $0x10c] ss:$16 sps:$4 sm:$0xff]  }
  0xff   :  { %1957 = vmatpush1.bf16.msra.mxu1 %v7699_v23  ;;  %1917 = vmatprep.subr.bf16.mxu0 %v7704_v24  ;;  %v7791_v23 = vld [vmem:[#allocation5 + $0x30c] ss:$16 sps:$4 sm:$0xff]   ;;  %v7786_v24 = vld [vmem:[#allocation5 + $0x108] ss:$16 sps:$4 sm:$0xff]  }
 0x100   :  { %1958 = vmatprep.subr.bf16.mxu1 %v7707_v25  ;;  %1947 = vmatprep.mubr.bf16.mxu0 %v8744_v49  ;;  %v7723_v49 = vld [vmem:[#allocation5 + $0x268] ss:$16 sps:$4 sm:$0xff]  }
 0x101   :  { %1988 = vmatprep.mubr.bf16.mxu1 %v8746_v52  ;;  %v7728_v52 = vld [vmem:[#allocation5 + $0x4c] ss:$16 sps:$4 sm:$0xff]   ;;  %v7789_v25 = vld [vmem:[#allocation5 + $0x308] ss:$16 sps:$4 sm:$0xff]  }
 0x102   :  { %1918 = vmatpush1.bf16.msra.mxu0 %v7702_v26  ;;  %v7794_v26 = vld [vmem:[#allocation5 + $0x4ec] ss:$16 sps:$4 sm:$0xff]  }
 0x103   :  { %1959 = vmatpush1.bf16.msra.mxu1 %v7705_v27  ;;  %1919 = vmatprep.subr.bf16.mxu0 %v7710_v28  ;;  %v7797_v27 = vld [vmem:[#allocation5 + $0x6ec] ss:$16 sps:$4 sm:$0xff]   ;;  %v7792_v28 = vld [vmem:[#allocation5 + $0x4e8] ss:$16 sps:$4 sm:$0xff]  }
 0x104   :  { %1960 = vmatprep.subr.bf16.mxu1 %v7713_v29  ;;  %v7795_v29 = vld [vmem:[#allocation5 + $0x6e8] ss:$16 sps:$4 sm:$0xff]  }
 0x106   :  { %1920 = vmatpush1.bf16.msra.mxu0 %v7708_v30  ;;  %v7800_v30 = vld [vmem:[#allocation5 + $0x4cc] ss:$16 sps:$4 sm:$0xff]  }
 0x107   :  { %1961 = vmatpush1.bf16.msra.mxu1 %v7711_v31  ;;  %1921 = vmatprep.subr.bf16.mxu0 %v7716_v32  ;;  %v7803_v31 = vld [vmem:[#allocation5 + $0x6cc] ss:$16 sps:$4 sm:$0xff]   ;;  %v7798_v32 = vld [vmem:[#allocation5 + $0x4c8] ss:$16 sps:$4 sm:$0xff]  }
 0x108   :  { %1962 = vmatprep.subr.bf16.mxu1 %v7719_v33  ;;  %v7801_v33 = vld [vmem:[#allocation5 + $0x6c8] ss:$16 sps:$4 sm:$0xff]  }
 0x10a   :  { %1922 = vmatpush1.bf16.msra.mxu0 %v7714_v34  ;;  %v7806_v34 = vld [vmem:[#allocation5 + $0x4ac] ss:$16 sps:$4 sm:$0xff]  }
 0x10b   :  { %1963 = vmatpush1.bf16.msra.mxu1 %v7717_v35  ;;  %1923 = vmatprep.subr.bf16.mxu0 %v7722_v36  ;;  %v7809_v35 = vld [vmem:[#allocation5 + $0x6ac] ss:$16 sps:$4 sm:$0xff]   ;;  %v7804_v36 = vld [vmem:[#allocation5 + $0x4a8] ss:$16 sps:$4 sm:$0xff]  }
 0x10c   :  { %1964 = vmatprep.subr.bf16.mxu1 %v7725_v38  ;;  %v7807_v38 = vld [vmem:[#allocation5 + $0x6a8] ss:$16 sps:$4 sm:$0xff]  }
 0x10e   :  { %1924 = vmatpush1.bf16.msra.mxu0 %v7720_v39  ;;  %v7812_v39 = vld [vmem:[#allocation5 + $0x48c] ss:$16 sps:$4 sm:$0xff]  }
 0x10f   :  { %1965 = vmatpush1.bf16.msra.mxu1 %v7723_v49  ;;  %1925 = vmatprep.subr.bf16.mxu0 %v7728_v52  ;;  %v7810_v49 = vld [vmem:[#allocation5 + $0x488] ss:$16 sps:$4 sm:$0xff]   ;;  %v7818_v52 = vld [vmem:[#allocation5 + $0x46c] ss:$16 sps:$4 sm:$0xff]  }
 0x110   :  { %1966 = vmatprep.subr.bf16.mxu1 %v7731_v41  ;;  %v7821_v41 = vld [vmem:[#allocation5 + $0x66c] ss:$16 sps:$4 sm:$0xff]  }
 0x112   :  { %1926 = vmatpush1.bf16.msra.mxu0 %v7726_v42  ;;  %v7816_v42 = vld [vmem:[#allocation5 + $0x468] ss:$16 sps:$4 sm:$0xff]  }
 0x113   :  { %1967 = vmatpush1.bf16.msra.mxu1 %v7729_v43  ;;  %1927 = vmatprep.subr.bf16.mxu0 %v7734_v44  ;;  %v7819_v43 = vld [vmem:[#allocation5 + $0x668] ss:$16 sps:$4 sm:$0xff]  }
 0x114   :  { %1968 = vmatprep.subr.bf16.mxu1 %v7737_v45  ;;  %v7822_v44 = vld [vmem:[#allocation5 + $0x448] ss:$16 sps:$4 sm:$0xff]  }
 0x115   :  { %v7825_v45 = vld [vmem:[#allocation5 + $0x648] ss:$16 sps:$4 sm:$0xff]  }
 0x116   :  { %1928 = vmatpush1.bf16.msra.mxu0 %v7732_v46  ;;  %v7830_v46 = vld [vmem:[#allocation5 + $0x42c] ss:$16 sps:$4 sm:$0xff]  }
 0x117   :  { %1969 = vmatpush1.bf16.msra.mxu1 %v7735_v47  ;;  %1929 = vmatprep.subr.bf16.mxu0 %v7740_v48  ;;  %v7833_v47 = vld [vmem:[#allocation5 + $0x62c] ss:$16 sps:$4 sm:$0xff]   ;;  %v7828_v48 = vld [vmem:[#allocation5 + $0x428] ss:$16 sps:$4 sm:$0xff]  }
 0x118   :  { %1970 = vmatprep.subr.bf16.mxu1 %v7743_v50  ;;  %v7831_v50 = vld [vmem:[#allocation5 + $0x628] ss:$16 sps:$4 sm:$0xff]  }
 0x11a   :  { %1930 = vmatpush1.bf16.msra.mxu0 %v7738_v51  ;;  %v7836_v51 = vld [vmem:[#allocation5 + $0x40c] ss:$16 sps:$4 sm:$0xff]  }
 0x11b   :  { %1971 = vmatpush1.bf16.msra.mxu1 %v7741_v53  ;;  %1931 = vmatprep.subr.bf16.mxu0 %v7746_v54  ;;  %v7839_v53 = vld [vmem:[#allocation5 + $0x60c] ss:$16 sps:$4 sm:$0xff]   ;;  %v7834_v54 = vld [vmem:[#allocation5 + $0x408] ss:$16 sps:$4 sm:$0xff]  }
 0x11c   :  { %1972 = vmatprep.subr.bf16.mxu1 %v7749_v55  ;;  %v7837_v55 = vld [vmem:[#allocation5 + $0x608] ss:$16 sps:$4 sm:$0xff]  }
 0x11e   :  { %1932 = vmatpush2.bf16.msra.mxu0 %v7744_v56  ;;  %v7842_v56 = vld [vmem:[#allocation5 + $0x5ec] ss:$16 sps:$4 sm:$0xff]  }
 0x11f   :  { %1973 = vmatpush2.bf16.msra.mxu1 %v7747_v57  ;;  %1933 = vmatprep.subr.bf16.mxu0 %v7752_v58  ;;  %v7845_v57 = vld [vmem:[#allocation5 + $0x7ec] ss:$16 sps:$4 sm:$0xff]   ;;  %v7840_v58 = vld [vmem:[#allocation5 + $0x5e8] ss:$16 sps:$4 sm:$0xff]  }
 0x120   :  { %1974 = vmatprep.subr.bf16.mxu1 %v7755_v59  ;;  %v7843_v59 = vld [vmem:[#allocation5 + $0x7e8] ss:$16 sps:$4 sm:$0xff]  }
 0x122   :  { %1934 = vmatpush2.bf16.msra.mxu0 %v7750_v60  ;;  %v7848_v60 = vld [vmem:[#allocation5 + $0x5cc] ss:$16 sps:$4 sm:$0xff]  }
 0x123   :  { %1975 = vmatpush2.bf16.msra.mxu1 %v7753_v61  ;;  %1935 = vmatprep.subr.bf16.mxu0 %v7758_v62  ;;  %v7851_v61 = vld [vmem:[#allocation5 + $0x7cc] ss:$16 sps:$4 sm:$0xff]   ;;  %v7846_v62 = vld [vmem:[#allocation5 + $0x5c8] ss:$16 sps:$4 sm:$0xff]  }
 0x124   :  { %1976 = vmatprep.subr.bf16.mxu1 %v7761_v63  ;;  %v7849_v63 = vld [vmem:[#allocation5 + $0x7c8] ss:$16 sps:$4 sm:$0xff]  }
 0x126   :  { %1936 = vmatpush2.bf16.msra.mxu0 %v7756_v0  ;;  %v7854_v0 = vld [vmem:[#allocation5 + $0x5ac] ss:$16 sps:$4 sm:$0xff]  }
 0x127   :  { %1977 = vmatpush2.bf16.msra.mxu1 %v7759_v1  ;;  %1937 = vmatprep.subr.bf16.mxu0 %v7764_v2  ;;  %v7857_v1 = vld [vmem:[#allocation5 + $0x7ac] ss:$16 sps:$4 sm:$0xff]   ;;  %v7852_v2 = vld [vmem:[#allocation5 + $0x5a8] ss:$16 sps:$4 sm:$0xff]  }
 0x128   :  { %1978 = vmatprep.subr.bf16.mxu1 %v7767_v3  ;;  %v7855_v3 = vld [vmem:[#allocation5 + $0x7a8] ss:$16 sps:$4 sm:$0xff]  }
 0x12a   :  { %1938 = vmatpush2.bf16.msra.mxu0 %v7762_v4  ;;  %v7860_v4 = vld [vmem:[#allocation5 + $0x58c] ss:$16 sps:$4 sm:$0xff]  }
 0x12b   :  { %1979 = vmatpush2.bf16.msra.mxu1 %v7765_v5  ;;  %1939 = vmatprep.subr.bf16.mxu0 %v7770_v6  ;;  %v7863_v5 = vld [vmem:[#allocation5 + $0x78c] ss:$16 sps:$4 sm:$0xff]   ;;  %v7858_v6 = vld [vmem:[#allocation5 + $0x588] ss:$16 sps:$4 sm:$0xff]  }
 0x12c   :  { %1980 = vmatprep.subr.bf16.mxu1 %v7773_v7  ;;  %v7861_v7 = vld [vmem:[#allocation5 + $0x788] ss:$16 sps:$4 sm:$0xff]  }
 0x12e   :  { %1940 = vmatpush2.bf16.msra.mxu0 %v7768_v10  ;;  %v7866_v10 = vld [vmem:[#allocation5 + $0x56c] ss:$16 sps:$4 sm:$0xff]  }
 0x12f   :  { %1981 = vmatpush2.bf16.msra.mxu1 %v7771_v11  ;;  %1941 = vmatprep.subr.bf16.mxu0 %v7776_v12  ;;  %v7869_v11 = vld [vmem:[#allocation5 + $0x76c] ss:$16 sps:$4 sm:$0xff]   ;;  %v7864_v12 = vld [vmem:[#allocation5 + $0x568] ss:$16 sps:$4 sm:$0xff]  }
 0x130   :  { %1982 = vmatprep.subr.bf16.mxu1 %v7779_v13  ;;  %v7867_v13 = vld [vmem:[#allocation5 + $0x768] ss:$16 sps:$4 sm:$0xff]  }
 0x132   :  { %1942 = vmatpush2.bf16.msra.mxu0 %v7774_v14  ;;  %v7872_v14 = vld [vmem:[#allocation5 + $0x54c] ss:$16 sps:$4 sm:$0xff]  }
 0x133   :  { %1983 = vmatpush2.bf16.msra.mxu1 %v7777_v15  ;;  %1943 = vmatprep.subr.bf16.mxu0 %v7782_v16  ;;  %v7875_v15 = vld [vmem:[#allocation5 + $0x74c] ss:$16 sps:$4 sm:$0xff]   ;;  %v7870_v16 = vld [vmem:[#allocation5 + $0x548] ss:$16 sps:$4 sm:$0xff]  }
 0x134   :  { %1984 = vmatprep.subr.bf16.mxu1 %v7785_v17  ;;  %v7873_v17 = vld [vmem:[#allocation5 + $0x748] ss:$16 sps:$4 sm:$0xff]  }
 0x136   :  { %1944 = vmatpush2.bf16.msra.mxu0 %v7780_v18  ;;  %v7878_v18 = vld [vmem:[#allocation5 + $0x52c] ss:$16 sps:$4 sm:$0xff]  }
 0x137   :  { %1985 = vmatpush2.bf16.msra.mxu1 %v7783_v19  ;;  %1945 = vmatprep.subr.bf16.mxu0 %v7788_v22  ;;  %v7881_v19 = vld [vmem:[#allocation5 + $0x72c] ss:$16 sps:$4 sm:$0xff]   ;;  %v7876_v22 = vld [vmem:[#allocation5 + $0x528] ss:$16 sps:$4 sm:$0xff]  }
 0x138   :  { %1986 = vmatprep.subr.bf16.mxu1 %v7791_v23  ;;  %v7879_v23 = vld [vmem:[#allocation5 + $0x728] ss:$16 sps:$4 sm:$0xff]  }
 0x13a   :  { %1946 = vmatpush2.bf16.msra.mxu0 %v7786_v24  ;;  %v7884_v24 = vld [vmem:[#allocation5 + $0x50c] ss:$16 sps:$4 sm:$0xff]  }
 0x13b   :  { %1987 = vmatpush2.bf16.msra.mxu1 %v7789_v25  ;;  %1997 = vmatprep.subr.bf16.mxu0 %v7794_v26  ;;  %v7887_v25 = vld [vmem:[#allocation5 + $0x70c] ss:$16 sps:$4 sm:$0xff]   ;;  %v7882_v26 = vld [vmem:[#allocation5 + $0x508] ss:$16 sps:$4 sm:$0xff]  }
 0x13c   :  { %2038 = vmatprep.subr.bf16.mxu1 %v7797_v27  ;;  %v7885_v27 = vld [vmem:[#allocation5 + $0x708] ss:$16 sps:$4 sm:$0xff]  }
 0x13d   :  { %1948 = vmatmul.mubr.bf16.vlgmr.msra.gmra.mxu0 %v8750_v8  ;;  %v7815_v8 = vld [vmem:[#allocation5 + $0x68c] ss:$16 sps:$4 sm:$0xff]  }
 0x13e   :  { %1989 = vmatmul.mubr.bf16.vlgmr.msra.gmra.mxu1 %v8752_v9  ;;  %1998 = vmatpush1.bf16.msra.mxu0 %v7792_v28  ;;  %v7813_v9 = vld [vmem:[#allocation5 + $0x688] ss:$16 sps:$4 sm:$0xff]  }
 0x13f   :  { %2039 = vmatpush1.bf16.msra.mxu1 %v7795_v29  ;;  %1999 = vmatprep.subr.bf16.mxu0 %v7800_v30  ;;  %v7890_v28 = vld [vmem:[#allocation8 + $0xe4] ss:$16 sps:$4 sm:$0xff]   ;;  %v7888_v29 = vld [vmem:[#allocation8 + $0xe0] ss:$16 sps:$4 sm:$0xff]  }
 0x140   :  { %2040 = vmatprep.subr.bf16.mxu1 %v7803_v31  ;;  %2029 = vmatprep.mubr.bf16.mxu0 %v8756_v37  ;;  %v7824_v37 = vld [vmem:[#allocation5 + $0x44c] ss:$16 sps:$4 sm:$0xff]   ;;  %v7893_v30 = vld [vmem:[#allocation8 + $0xc4] ss:$16 sps:$4 sm:$0xff]   ;;  %v7891_v31 = vld [vmem:[#allocation8 + $0xc0] ss:$16 sps:$4 sm:$0xff]  }
 0x141   :  { %2070 = vmatprep.mubr.bf16.mxu1 %v8758_v40  ;;  %v7827_v40 = vld [vmem:[#allocation5 + $0x64c] ss:$16 sps:$4 sm:$0xff]  }
 0x142   :  { %2000 = vmatpush1.bf16.msra.mxu0 %v7798_v32 }
 0x143   :  { %2041 = vmatpush1.bf16.msra.mxu1 %v7801_v33  ;;  %2001 = vmatprep.subr.bf16.mxu0 %v7806_v34 }
 0x144   :  { %2042 = vmatprep.subr.bf16.mxu1 %v7809_v35 }
 0x146   :  { %2002 = vmatpush1.bf16.msra.mxu0 %v7804_v36  ;;  %v7896_v36 = vld [vmem:[#allocation8 + $0xa4] ss:$16 sps:$4 sm:$0xff]  }
 0x147   :  { %2043 = vmatpush1.bf16.msra.mxu1 %v7807_v38  ;;  %2003 = vmatprep.subr.bf16.mxu0 %v7812_v39  ;;  %v7894_v38 = vld [vmem:[#allocation8 + $0xa0] ss:$16 sps:$4 sm:$0xff]  }
 0x148   :  { %2044 = vmatprep.subr.bf16.mxu1 %v7815_v8 }
 0x14a   :  { %2004 = vmatpush1.bf16.msra.mxu0 %v7810_v49 }
 0x14b   :  { %2045 = vmatpush1.bf16.msra.mxu1 %v7813_v9  ;;  %2005 = vmatprep.subr.bf16.mxu0 %v7818_v52  ;;  %v7899_v52 = vld [vmem:[#allocation8 + $0x84] ss:$16 sps:$4 sm:$0xff]  }
 0x14c   :  { %2046 = vmatprep.subr.bf16.mxu1 %v7821_v41  ;;  %v7897_v41 = vld [vmem:[#allocation8 + $0x80] ss:$16 sps:$4 sm:$0xff]  }
 0x14e   :  { %2006 = vmatpush1.bf16.msra.mxu0 %v7816_v42  ;;  %v7902_v42 = vld [vmem:[#allocation8 + $0x64] ss:$16 sps:$4 sm:$0xff]  }
 0x14f   :  { %2047 = vmatpush1.bf16.msra.mxu1 %v7819_v43  ;;  %2007 = vmatprep.subr.bf16.mxu0 %v7824_v37  ;;  %v7987_v43 = vld [vmem:[#allocation8 + $0x2c0] ss:$16 sps:$4 sm:$0xff]   ;;  %v7989_v37 = vld [vmem:[#allocation8 + $0x2c4] ss:$16 sps:$4 sm:$0xff]  }
 0x150   :  { %2048 = vmatprep.subr.bf16.mxu1 %v7827_v40  ;;  %v7900_v40 = vld [vmem:[#allocation8 + $0x60] ss:$16 sps:$4 sm:$0xff]  }
 0x152   :  { %2008 = vmatpush1.bf16.msra.mxu0 %v7822_v44  ;;  %v7992_v44 = vld [vmem:[#allocation8 + $0x2a4] ss:$16 sps:$4 sm:$0xff]  }
 0x153   :  { %2049 = vmatpush1.bf16.msra.mxu1 %v7825_v45  ;;  %2009 = vmatprep.subr.bf16.mxu0 %v7830_v46  ;;  %v7905_v45 = vld [vmem:[#allocation8 + $0x44] ss:$16 sps:$4 sm:$0xff]   ;;  %v7990_v46 = vld [vmem:[#allocation8 + $0x2a0] ss:$16 sps:$4 sm:$0xff]  }
 0x154   :  { %2050 = vmatprep.subr.bf16.mxu1 %v7833_v47  ;;  %v7903_v47 = vld [vmem:[#allocation8 + $0x40] ss:$16 sps:$4 sm:$0xff]  }
 0x156   :  { %2010 = vmatpush1.bf16.msra.mxu0 %v7828_v48  ;;  %v7995_v48 = vld [vmem:[#allocation8 + $0x284] ss:$16 sps:$4 sm:$0xff]  }
 0x157   :  { %2051 = vmatpush1.bf16.msra.mxu1 %v7831_v50  ;;  %2011 = vmatprep.subr.bf16.mxu0 %v7836_v51  ;;  %v7908_v50 = vld [vmem:[#allocation8 + $0x24] ss:$16 sps:$4 sm:$0xff]   ;;  %v7906_v51 = vld [vmem:[#allocation8 + $0x20] ss:$16 sps:$4 sm:$0xff]  }
 0x158   :  { %2052 = vmatprep.subr.bf16.mxu1 %v7839_v53  ;;  %v7911_v53 = vld [vmem:[#allocation8 + $0x4] ss:$16 sps:$4 sm:$0xff]  }
 0x15a   :  { %2012 = vmatpush1.bf16.msra.mxu0 %v7834_v54  ;;  %v7993_v54 = vld [vmem:[#allocation8 + $0x280] ss:$16 sps:$4 sm:$0xff]  }
 0x15b   :  { %2053 = vmatpush1.bf16.msra.mxu1 %v7837_v55  ;;  %2013 = vmatprep.subr.bf16.mxu0 %v7842_v56  ;;  %v7998_v55 = vld [vmem:[#allocation8 + $0x264] ss:$16 sps:$4 sm:$0xff]   ;;  %v7996_v56 = vld [vmem:[#allocation8 + $0x260] ss:$16 sps:$4 sm:$0xff]  }
 0x15c   :  { %2054 = vmatprep.subr.bf16.mxu1 %v7845_v57  ;;  %v7909_v57 = vld [vmem:[#allocation8] ss:$16 sps:$4 sm:$0xff]  }
 0x15e   :  { %2014 = vmatpush2.bf16.msra.mxu0 %v7840_v58  ;;  %v8001_v58 = vld [vmem:[#allocation8 + $0x244] ss:$16 sps:$4 sm:$0xff]  }
 0x15f   :  { %2055 = vmatpush2.bf16.msra.mxu1 %v7843_v59  ;;  %2015 = vmatprep.subr.bf16.mxu0 %v7848_v60  ;;  %v7914_v59 = vld [vmem:[#allocation8 + $0x1e4] ss:$16 sps:$4 sm:$0xff]   ;;  %v7999_v60 = vld [vmem:[#allocation8 + $0x240] ss:$16 sps:$4 sm:$0xff]  }
 0x160   :  { %2056 = vmatprep.subr.bf16.mxu1 %v7851_v61  ;;  %v7912_v61 = vld [vmem:[#allocation8 + $0x1e0] ss:$16 sps:$4 sm:$0xff]  }
 0x162   :  { %2016 = vmatpush2.bf16.msra.mxu0 %v7846_v62  ;;  %v8004_v62 = vld [vmem:[#allocation8 + $0x224] ss:$16 sps:$4 sm:$0xff]  }
 0x163   :  { %2057 = vmatpush2.bf16.msra.mxu1 %v7849_v63  ;;  %2017 = vmatprep.subr.bf16.mxu0 %v7854_v0  ;;  %v7917_v63 = vld [vmem:[#allocation8 + $0x1c4] ss:$16 sps:$4 sm:$0xff]   ;;  %v8002_v0 = vld [vmem:[#allocation8 + $0x220] ss:$16 sps:$4 sm:$0xff]  }
 0x164   :  { %2058 = vmatprep.subr.bf16.mxu1 %v7857_v1  ;;  %v7915_v1 = vld [vmem:[#allocation8 + $0x1c0] ss:$16 sps:$4 sm:$0xff]  }
 0x166   :  { %2018 = vmatpush2.bf16.msra.mxu0 %v7852_v2  ;;  %v8007_v2 = vld [vmem:[#allocation8 + $0x204] ss:$16 sps:$4 sm:$0xff]  }
 0x167   :  { %2059 = vmatpush2.bf16.msra.mxu1 %v7855_v3  ;;  %2019 = vmatprep.subr.bf16.mxu0 %v7860_v4  ;;  %v7920_v3 = vld [vmem:[#allocation8 + $0x1a4] ss:$16 sps:$4 sm:$0xff]   ;;  %v8005_v4 = vld [vmem:[#allocation8 + $0x200] ss:$16 sps:$4 sm:$0xff]  }
 0x168   :  { %2060 = vmatprep.subr.bf16.mxu1 %v7863_v5  ;;  %v7918_v5 = vld [vmem:[#allocation8 + $0x1a0] ss:$16 sps:$4 sm:$0xff]  }
 0x16a   :  { %2020 = vmatpush2.bf16.msra.mxu0 %v7858_v6  ;;  %v8010_v6 = vld [vmem:[#allocation8 + $0x3e4] ss:$16 sps:$4 sm:$0xff]  }
 0x16b   :  { %2061 = vmatpush2.bf16.msra.mxu1 %v7861_v7  ;;  %2021 = vmatprep.subr.bf16.mxu0 %v7866_v10  ;;  %v7923_v7 = vld [vmem:[#allocation8 + $0x184] ss:$16 sps:$4 sm:$0xff]   ;;  %v8008_v10 = vld [vmem:[#allocation8 + $0x3e0] ss:$16 sps:$4 sm:$0xff]  }
 0x16c   :  { %2062 = vmatprep.subr.bf16.mxu1 %v7869_v11  ;;  %v7921_v11 = vld [vmem:[#allocation8 + $0x180] ss:$16 sps:$4 sm:$0xff]  }
 0x16e   :  { %2022 = vmatpush2.bf16.msra.mxu0 %v7864_v12  ;;  %v8013_v12 = vld [vmem:[#allocation8 + $0x3c4] ss:$16 sps:$4 sm:$0xff]  }
 0x16f   :  { %2063 = vmatpush2.bf16.msra.mxu1 %v7867_v13  ;;  %2023 = vmatprep.subr.bf16.mxu0 %v7872_v14  ;;  %v7926_v13 = vld [vmem:[#allocation8 + $0x164] ss:$16 sps:$4 sm:$0xff]   ;;  %v8011_v14 = vld [vmem:[#allocation8 + $0x3c0] ss:$16 sps:$4 sm:$0xff]  }
 0x170   :  { %2064 = vmatprep.subr.bf16.mxu1 %v7875_v15  ;;  %v451_v15 = vlaneseq }
 0x172   :  { %2024 = vmatpush2.bf16.msra.mxu0 %v7870_v16  ;;  %v7924_v16 = vld [vmem:[#allocation8 + $0x160] ss:$16 sps:$4 sm:$0xff]  }
 0x173   :  { %2065 = vmatpush2.bf16.msra.mxu1 %v7873_v17  ;;  %2025 = vmatprep.subr.bf16.mxu0 %v7878_v18  ;;  %v8016_v17 = vld [vmem:[#allocation8 + $0x3a4] ss:$16 sps:$4 sm:$0xff]  }
 0x174   :  { %2066 = vmatprep.subr.bf16.mxu1 %v7881_v19  ;;  %v7929_v18 = vld [vmem:[#allocation8 + $0x144] ss:$16 sps:$4 sm:$0xff]   ;;  %v8014_v19 = vld [vmem:[#allocation8 + $0x3a0] ss:$16 sps:$4 sm:$0xff]  }
 0x176   :  { %2026 = vmatpush2.bf16.msra.mxu0 %v7876_v22  ;;  %v8784_v22 = vshrl.u32 %v451_v15, 7  ;;  %v7960_v15 = vld [vmem:[#allocation8 + $0x1e8] ss:$16 sps:$4 sm:$0xff]  }
 0x177   :  { %2067 = vmatpush2.bf16.msra.mxu1 %v7879_v23  ;;  %2027 = vmatprep.subr.bf16.mxu0 %v7884_v24  ;;  %v7927_v23 = vld [vmem:[#allocation8 + $0x140] ss:$16 sps:$4 sm:$0xff]   ;;  %v8019_v24 = vld [vmem:[#allocation8 + $0x384] ss:$16 sps:$4 sm:$0xff]  }
 0x178   :  { %2068 = vmatprep.subr.bf16.mxu1 %v7887_v25  ;;  %v7932_v25 = vld [vmem:[#allocation8 + $0x124] ss:$16 sps:$4 sm:$0xff]  }
 0x17a   :  { %2028 = vmatpush2.bf16.msra.mxu0 %v7882_v26  ;;  %v8786_v26 = vld [vmem:[#allocation7] sm:$0xf] }
 0x17b   :  { %2069 = vmatpush2.bf16.msra.mxu1 %v7885_v27  ;;  %2877 = vmatprep.subr.bf16.mxu0 %v7890_v28  ;;  %v8017_v27 = vld [vmem:[#allocation8 + $0x380] ss:$16 sps:$4 sm:$0xff]   ;;  %v8789_v28 = vsub.s32 0, %v8784_v22 }
 0x17d   :  { %v8774_v32 = vpop.f32.mrf.mxu0  ;;  %2030 = vmatmul.mubr.bf16.vlgmr.msra.gmra.mxu0 %v8762_v20  ;;  %v7984_v20 = vld [vmem:[#allocation8 + $0x2e0] ss:$16 sps:$4 sm:$0xff]  }
 0x17e   :  { %v8776_v33 = vpop.f32.mrf.mxu1  ;;  %2071 = vmatmul.mubr.bf16.vlgmr.msra.gmra.mxu1 %v8764_v21  ;;  %2878 = vmatpush1.bf16.msra.mxu0 %v7888_v29  ;;  %v7986_v21 = vld [vmem:[#allocation8 + $0x2e4] ss:$16 sps:$4 sm:$0xff]   ;;  %v7930_v29 = vld [vmem:[#allocation8 + $0x120] ss:$16 sps:$4 sm:$0xff]  }
 0x17f   :  { %v8780_v34 = vpop.f32.mrf.mxu0  ;;  %2879 = vmatprep.subr.bf16.mxu0 %v7893_v30  ;;  %2918 = vmatprep.subr.bf16.mxu1 %v7986_v21  ;;  %v8022_v30 = vld [vmem:[#allocation8 + $0x364] ss:$16 sps:$4 sm:$0xff]  }
 0x180   :  { %v8782_v35 = vpop.f32.mrf.mxu1  ;;  %2919 = vmatpush1.bf16.msra.mxu1 %v7984_v20 }
 0x181   :  { %v1789_v39 = vpop.f32.mrf.mxu0  ;;  %2920 = vmatprep.subr.bf16.mxu1 %v7989_v37 }
 0x182   :  { %v1830_v8 = vpop.f32.mrf.mxu1  ;;  %2880 = vmatpush1.bf16.msra.mxu0 %v7891_v31  ;;  %v7935_v31 = vld [vmem:[#allocation8 + $0x104] ss:$16 sps:$4 sm:$0xff]   ;;  %v454_v39 = vrot.slane %v8786_v26, %v8789_v28 }
 0x183   :  { %v1790_v49 = vpop.f32.mrf.mxu0  ;;  %2881 = vmatprep.subr.bf16.mxu0 %v7896_v36  ;;  %v8792_v36 = vsub.s32 1, %v8784_v22  ;;  %v7933_v8 = vld [vmem:[#allocation8 + $0x100] ss:$16 sps:$4 sm:$0xff]  }
 0x184   :  { %v1831_v9 = vpop.f32.mrf.mxu1  ;;  %2921 = vmatpush1.bf16.msra.mxu1 %v7987_v43  ;;  %v8025_v49 = vld [vmem:[#allocation8 + $0x344] ss:$16 sps:$4 sm:$0xff]  }
 0x185   :  { %2922 = vmatprep.subr.bf16.mxu1 %v7992_v44  ;;  %v7938_v9 = vld [vmem:[#allocation8 + $0xec] ss:$16 sps:$4 sm:$0xff]  }
 0x186   :  { %2882 = vmatpush1.bf16.msra.mxu0 %v7894_v38  ;;  %v8020_v38 = vld [vmem:[#allocation8 + $0x360] ss:$16 sps:$4 sm:$0xff]  }
 0x187   :  { %2883 = vmatprep.subr.bf16.mxu0 %v7899_v52  ;;  %v458_v52 = vrot.slane %v8786_v26, %v8792_v36 }
 0x188   :  { %2923 = vmatpush1.bf16.msra.mxu1 %v7990_v46 }
 0x189   :  { %2924 = vmatprep.subr.bf16.mxu1 %v7995_v48  ;;  %v1788_v20 = vadd.f32 %v8780_v34, %v458_v52  ;;  %v7983_v52 = vld [vmem:[#allocation8 + $0x10c] ss:$16 sps:$4 sm:$0xff]  }
 0x18a   :  { %2884 = vmatpush1.bf16.msra.mxu0 %v7897_v41  ;;  %v8023_v41 = vld [vmem:[#allocation8 + $0x340] ss:$16 sps:$4 sm:$0xff]  }
 0x18b   :  { %2885 = vmatprep.subr.bf16.mxu0 %v7902_v42  ;;  %v1786_v42 = vadd.f32 %v8774_v32, %v454_v39  ;;  %v8026_v32 = vld [vmem:[#allocation8 + $0x320] ss:$16 sps:$4 sm:$0xff]  }
 0x18c   :  { %2925 = vmatpush1.bf16.msra.mxu1 %v7993_v54 }
 0x18d   :  { %2926 = vmatprep.subr.bf16.mxu1 %v7998_v55  ;;  %v1827_v21 = vadd.f32 %v8776_v33, %v1786_v42 }
 0x18e   :  { %2886 = vmatpush1.bf16.msra.mxu0 %v7900_v40  ;;  %v1829_v40 = vadd.f32 %v8782_v35, %v1788_v20  ;;  %v7981_v20 = vld [vmem:[#allocation8 + $0x108] ss:$16 sps:$4 sm:$0xff]  }
 0x18f   :  { %2887 = vmatprep.subr.bf16.mxu0 %v7905_v45 }
 0x190   :  { %2927 = vmatpush1.bf16.msra.mxu1 %v7996_v56  ;;  %v8031_v56 = vld [vmem:[#allocation8 + $0x304] ss:$16 sps:$4 sm:$0xff]  }
 0x191   :  { %2928 = vmatprep.subr.bf16.mxu1 %v8001_v58  ;;  %v8029_v58 = vld [vmem:[#allocation8 + $0x300] ss:$16 sps:$4 sm:$0xff]  }
 0x192   :  { %2888 = vmatpush1.bf16.msra.mxu0 %v7903_v47  ;;  %v8028_v47 = vld [vmem:[#allocation8 + $0x324] ss:$16 sps:$4 sm:$0xff]  }
 0x193   :  { %2889 = vmatprep.subr.bf16.mxu0 %v7908_v50 }
 0x194   :  { %2929 = vmatpush1.bf16.msra.mxu1 %v7999_v60 }
 0x195   :  { %2930 = vmatprep.subr.bf16.mxu1 %v8004_v62  ;;  %v8034_v62 = vld [vmem:[#allocation8 + $0x2ec] ss:$16 sps:$4 sm:$0xff]  }
 0x196   :  { %2890 = vmatpush1.bf16.msra.mxu0 %v7906_v51 }
 0x197   :  { %2891 = vmatprep.subr.bf16.mxu0 %v7911_v53 }
 0x198   :  { %2931 = vmatpush1.bf16.msra.mxu1 %v8002_v0  ;;  %v7944_v0 = vld [vmem:[#allocation8 + $0xac] ss:$16 sps:$4 sm:$0xff]  }
 0x199   :  { %2932 = vmatprep.subr.bf16.mxu1 %v8007_v2  ;;  %v7947_v2 = vld [vmem:[#allocation8 + $0x8c] ss:$16 sps:$4 sm:$0xff]  }
 0x19a   :  { %2892 = vmatpush1.bf16.msra.mxu0 %v7909_v57 }
 0x19b   :  { %2893 = vmatprep.subr.bf16.mxu0 %v7914_v59  ;;  %v7936_v59 = vld [vmem:[#allocation8 + $0xe8] ss:$16 sps:$4 sm:$0xff]  }
 0x19c   :  { %2933 = vmatpush1.bf16.msra.mxu1 %v8005_v4  ;;  %v7950_v4 = vld [vmem:[#allocation8 + $0x6c] ss:$16 sps:$4 sm:$0xff]  }
 0x19d   :  { %2934 = vmatprep.subr.bf16.mxu1 %v8010_v6  ;;  %v7953_v6 = vld [vmem:[#allocation8 + $0x4c] ss:$16 sps:$4 sm:$0xff]  }
 0x19e   :  { %2894 = vmatpush2.bf16.msra.mxu0 %v7912_v61  ;;  %v7941_v61 = vld [vmem:[#allocation8 + $0xcc] ss:$16 sps:$4 sm:$0xff]  }
 0x19f   :  { %2895 = vmatprep.subr.bf16.mxu0 %v7917_v63  ;;  %v7939_v63 = vld [vmem:[#allocation8 + $0xc8] ss:$16 sps:$4 sm:$0xff]  }
 0x1a0   :  { %2935 = vmatpush2.bf16.msra.mxu1 %v8008_v10  ;;  %v7956_v10 = vld [vmem:[#allocation8 + $0x2c] ss:$16 sps:$4 sm:$0xff]  }
 0x1a1   :  { %2936 = vmatprep.subr.bf16.mxu1 %v8013_v12  ;;  %v7959_v12 = vld [vmem:[#allocation8 + $0xc] ss:$16 sps:$4 sm:$0xff]  }
 0x1a2   :  { %2896 = vmatpush2.bf16.msra.mxu0 %v7915_v1  ;;  %v7942_v1 = vld [vmem:[#allocation8 + $0xa8] ss:$16 sps:$4 sm:$0xff]  }
 0x1a3   :  { %2897 = vmatprep.subr.bf16.mxu0 %v7920_v3  ;;  %v7945_v3 = vld [vmem:[#allocation8 + $0x88] ss:$16 sps:$4 sm:$0xff]  }
 0x1a4   :  { %2937 = vmatpush2.bf16.msra.mxu1 %v8011_v14  ;;  %v7962_v14 = vld [vmem:[#allocation8 + $0x1ec] ss:$16 sps:$4 sm:$0xff]  }
 0x1a5   :  { %2938 = vmatprep.subr.bf16.mxu1 %v8016_v17  ;;  %v7963_v17 = vld [vmem:[#allocation8 + $0x1c8] ss:$16 sps:$4 sm:$0xff]  }
 0x1a6   :  { %2898 = vmatpush2.bf16.msra.mxu0 %v7918_v5  ;;  %v7948_v5 = vld [vmem:[#allocation8 + $0x68] ss:$16 sps:$4 sm:$0xff]  }
 0x1a7   :  { %2899 = vmatprep.subr.bf16.mxu0 %v7923_v7  ;;  %v7951_v7 = vld [vmem:[#allocation8 + $0x48] ss:$16 sps:$4 sm:$0xff]  }
 0x1a8   :  { %2939 = vmatpush2.bf16.msra.mxu1 %v8014_v19  ;;  %v7966_v19 = vld [vmem:[#allocation8 + $0x1a8] ss:$16 sps:$4 sm:$0xff]  }
 0x1a9   :  { %2940 = vmatprep.subr.bf16.mxu1 %v8019_v24  ;;  %v7969_v24 = vld [vmem:[#allocation8 + $0x188] ss:$16 sps:$4 sm:$0xff]  }
 0x1aa   :  { %2900 = vmatpush2.bf16.msra.mxu0 %v7921_v11  ;;  %v7954_v11 = vld [vmem:[#allocation8 + $0x28] ss:$16 sps:$4 sm:$0xff]  }
 0x1ab   :  { %2901 = vmatprep.subr.bf16.mxu0 %v7926_v13  ;;  %v7957_v13 = vld [vmem:[#allocation8 + $0x8] ss:$16 sps:$4 sm:$0xff]  }
 0x1ac   :  { %2941 = vmatpush2.bf16.msra.mxu1 %v8017_v27  ;;  %v7972_v27 = vld [vmem:[#allocation8 + $0x168] ss:$16 sps:$4 sm:$0xff]  }
 0x1ad   :  { %2942 = vmatprep.subr.bf16.mxu1 %v8022_v30  ;;  %v7975_v30 = vld [vmem:[#allocation8 + $0x148] ss:$16 sps:$4 sm:$0xff]  }
 0x1ae   :  { %2902 = vmatpush2.bf16.msra.mxu0 %v7924_v16  ;;  %v7965_v16 = vld [vmem:[#allocation8 + $0x1cc] ss:$16 sps:$4 sm:$0xff]  }
 0x1af   :  { %2903 = vmatprep.subr.bf16.mxu0 %v7929_v18  ;;  %v7968_v18 = vld [vmem:[#allocation8 + $0x1ac] ss:$16 sps:$4 sm:$0xff]  }
 0x1b0   :  { %2943 = vmatpush2.bf16.msra.mxu1 %v8020_v38 }
 0x1b1   :  { %2944 = vmatprep.subr.bf16.mxu1 %v8025_v49 }
 0x1b2   :  { %2904 = vmatpush2.bf16.msra.mxu0 %v7927_v23  ;;  %v7971_v23 = vld [vmem:[#allocation8 + $0x18c] ss:$16 sps:$4 sm:$0xff]  }
 0x1b3   :  { %2905 = vmatprep.subr.bf16.mxu0 %v7932_v25  ;;  %v7974_v25 = vld [vmem:[#allocation8 + $0x16c] ss:$16 sps:$4 sm:$0xff]  }
 0x1b4   :  { %2945 = vmatpush2.bf16.msra.mxu1 %v8023_v41 }
 0x1b5   :  { %2946 = vmatprep.subr.bf16.mxu1 %v8028_v47 }
 0x1b6   :  { %2906 = vmatpush2.bf16.msra.mxu0 %v7930_v29  ;;  %v7977_v29 = vld [vmem:[#allocation8 + $0x14c] ss:$16 sps:$4 sm:$0xff]  }
 0x1b7   :  { %2907 = vmatprep.subr.bf16.mxu0 %v7935_v31  ;;  %v7980_v31 = vld [vmem:[#allocation8 + $0x12c] ss:$16 sps:$4 sm:$0xff]  }
 0x1b8   :  { %2947 = vmatpush2.bf16.msra.mxu1 %v8026_v32 }
 0x1b9   :  { %2948 = vmatprep.subr.bf16.mxu1 %v8031_v56 }
 0x1ba   :  { %2908 = vmatpush2.bf16.msra.mxu0 %v7933_v8  ;;  %v7978_v8 = vld [vmem:[#allocation8 + $0x128] ss:$16 sps:$4 sm:$0xff]  }
 0x1bb   :  { %2959 = vmatprep.subr.bf16.mxu0 %v7938_v9 }
 0x1bc   :  { %2949 = vmatpush2.bf16.msra.mxu1 %v8029_v58 }
 0x1bd   :  { %v1867_v43 = vpop.f32.mrf.mxu0  ;;  %3000 = vmatprep.subr.bf16.mxu1 %v8034_v62 }
 0x1be   :  { %v1908_v37 = vpop.f32.mrf.mxu1  ;;  %v1868_v44 = vadd.f32 %v1867_v43, %v1827_v21 }
 0x1bf   :  { %v1869_v45 = vpop.f32.mrf.mxu0 }
 0x1c0   :  { %v1910_v46 = vpop.f32.mrf.mxu1  ;;  %v1909_v48 = vadd.f32 %v1908_v37, %v1868_v44  ;;  %v1870_v50 = vadd.f32 %v1869_v45, %v1829_v40  ;;  %v8807_v37 = vsub.s32 2, %v8784_v22  ;;  %v8810_v40 = vsub.s32 3, %v8784_v22 }
 0x1c1   :  { %v1871_v51 = vpop.f32.mrf.mxu0 }
 0x1c2   :  { %v1912_v53 = vpop.f32.mrf.mxu1  ;;  %v1911_v34 = vadd.f32 %v1910_v46, %v1870_v50  ;;  %v2079_v54 = vmax.f32 %v1909_v48, 0.0  ;;  %v462_v44 = vrot.slane %v8786_v26, %v8807_v37  ;;  %v466_v45 = vrot.slane %v8786_v26, %v8810_v40  ;;  %v8032_v26 = vld [vmem:[#allocation8 + $0x2e8] ss:$16 sps:$4 sm:$0xff]  }
 0x1c3   :  { %v1872_v55 = vpop.f32.mrf.mxu0 }
 0x1c4   :  { %v1913_v33 = vpop.f32.mrf.mxu1  ;;  %v2080_v57 = vmax.f32 %v1911_v34, 0.0  ;;  %v8802_v60 = vpack.c.bf16 %v2079_v54, %v2079_v54 }
 0x1c6   :  { %v2084_v35 = vpack.c.bf16 %v2080_v57, %v2080_v57 }
 0x1c8   :  { %2909 = vmatprep.mubr.bf16.mxu0 %v2084_v35 }
 0x1c9   :  { %2910 = vmatmul.mubr.bf16.vlgmr.msra.gmra.mxu0 %v8802_v60 }
 0x1ca   :  { %2960 = vmatpush1.bf16.msra.mxu0 %v7936_v59  ;;  %2991 = vmatprep.mubr.bf16.mxu0 %v2084_v35 }
 0x1cb   :  { %2961 = vmatprep.subr.bf16.mxu0 %v7941_v61 }
 0x1ce   :  { %2962 = vmatpush1.bf16.msra.mxu0 %v7939_v63 }
 0x1cf   :  { %2963 = vmatprep.subr.bf16.mxu0 %v7944_v0  ;;  %v8037_v0 = vld [vmem:[#allocation8 + $0x2cc] ss:$16 sps:$4 sm:$0xff]  }
 0x1d2   :  { %2964 = vmatpush1.bf16.msra.mxu0 %v7942_v1  ;;  %v8035_v1 = vld [vmem:[#allocation8 + $0x2c8] ss:$16 sps:$4 sm:$0xff]  }
 0x1d3   :  { %2965 = vmatprep.subr.bf16.mxu0 %v7947_v2  ;;  %v8040_v2 = vld [vmem:[#allocation8 + $0x2ac] ss:$16 sps:$4 sm:$0xff]  }
 0x1d6   :  { %2966 = vmatpush1.bf16.msra.mxu0 %v7945_v3  ;;  %v8038_v3 = vld [vmem:[#allocation8 + $0x2a8] ss:$16 sps:$4 sm:$0xff]  }
 0x1d7   :  { %2967 = vmatprep.subr.bf16.mxu0 %v7950_v4  ;;  %v8043_v4 = vld [vmem:[#allocation8 + $0x28c] ss:$16 sps:$4 sm:$0xff]  }
 0x1da   :  { %2968 = vmatpush1.bf16.msra.mxu0 %v7948_v5  ;;  %v8080_v5 = vld [vmem:[#allocation10 + $0x78] sm:$0xff]  }
 0x1db   :  { %2969 = vmatprep.subr.bf16.mxu0 %v7953_v6  ;;  %v8081_v6 = vld [vmem:[#allocation10 + $0x38] sm:$0xff]  }
 0x1de   :  { %2970 = vmatpush1.bf16.msra.mxu0 %v7951_v7  ;;  %v8082_v7 = vld [vmem:[#allocation10 + $0x70] sm:$0xff]  }
 0x1df   :  { %2971 = vmatprep.subr.bf16.mxu0 %v7956_v10  ;;  %v8041_v10 = vld [vmem:[#allocation8 + $0x288] ss:$16 sps:$4 sm:$0xff]  }
 0x1e2   :  { %2972 = vmatpush1.bf16.msra.mxu0 %v7954_v11  ;;  %v8083_v11 = vld [vmem:[#allocation10 + $0x30] sm:$0xff]  }
 0x1e3   :  { %2973 = vmatprep.subr.bf16.mxu0 %v7959_v12  ;;  %v8046_v12 = vld [vmem:[#allocation8 + $0x26c] ss:$16 sps:$4 sm:$0xff]  }
 0x1e6   :  { %2974 = vmatpush1.bf16.msra.mxu0 %v7957_v13  ;;  %v8084_v13 = vld [vmem:[#allocation10 + $0x68] sm:$0xff]  }
 0x1e7   :  { %2975 = vmatprep.subr.bf16.mxu0 %v7962_v14  ;;  %v8044_v14 = vld [vmem:[#allocation8 + $0x268] ss:$16 sps:$4 sm:$0xff]  }
 0x1ea   :  { %2976 = vmatpush2.bf16.msra.mxu0 %v7960_v15  ;;  %v8085_v15 = vld [vmem:[#allocation10 + $0x28] sm:$0xff]  }
 0x1eb   :  { %2977 = vmatprep.subr.bf16.mxu0 %v7965_v16  ;;  %v8049_v16 = vld [vmem:[#allocation8 + $0x24c] ss:$16 sps:$4 sm:$0xff]  }
 0x1ee   :  { %2978 = vmatpush2.bf16.msra.mxu0 %v7963_v17  ;;  %v8086_v17 = vld [vmem:[#allocation10 + $0x60] sm:$0xff]  }
 0x1ef   :  { %2979 = vmatprep.subr.bf16.mxu0 %v7968_v18  ;;  %v8047_v18 = vld [vmem:[#allocation8 + $0x248] ss:$16 sps:$4 sm:$0xff]  }
 0x1f2   :  { %2980 = vmatpush2.bf16.msra.mxu0 %v7966_v19  ;;  %v8087_v19 = vld [vmem:[#allocation10 + $0x20] sm:$0xff]  }
 0x1f3   :  { %2981 = vmatprep.subr.bf16.mxu0 %v7971_v23  ;;  %v8052_v23 = vld [vmem:[#allocation8 + $0x22c] ss:$16 sps:$4 sm:$0xff]  }
 0x1f6   :  { %2982 = vmatpush2.bf16.msra.mxu0 %v7969_v24  ;;  %v8088_v24 = vld [vmem:[#allocation10 + $0x58] sm:$0xff]  }
 0x1f7   :  { %2983 = vmatprep.subr.bf16.mxu0 %v7974_v25  ;;  %v8050_v25 = vld [vmem:[#allocation8 + $0x228] ss:$16 sps:$4 sm:$0xff]  }
 0x1fa   :  { %2984 = vmatpush2.bf16.msra.mxu0 %v7972_v27  ;;  %v8089_v27 = vld [vmem:[#allocation10 + $0x18] sm:$0xff]  }
 0x1fb   :  { %2985 = vmatprep.subr.bf16.mxu0 %v7977_v29  ;;  %v8055_v29 = vld [vmem:[#allocation8 + $0x20c] ss:$16 sps:$4 sm:$0xff]  }
 0x1fd   :  { %v1949_v38 = vpop.f32.mrf.mxu0 }
 0x1fe   :  { %v1990_v39 = vpop.f32.mrf.mxu1  ;;  %2986 = vmatpush2.bf16.msra.mxu0 %v7975_v30  ;;  %v1950_v46 = vadd.f32 %v1949_v38, %v462_v44  ;;  %v8090_v30 = vld [vmem:[#allocation10 + $0x50] sm:$0xff]   ;;  %v8073_v44 = vld [vmem:[#allocation8 + $0x34c] ss:$16 sps:$4 sm:$0xff]  }
 0x1ff   :  { %v1951_v49 = vpop.f32.mrf.mxu0  ;;  %2987 = vmatprep.subr.bf16.mxu0 %v7980_v31  ;;  %v8053_v31 = vld [vmem:[#allocation8 + $0x208] ss:$16 sps:$4 sm:$0xff]   ;;  %v8091_v38 = vld [vmem:[#allocation10 + $0x10] sm:$0xff]  }
 0x200   :  { %v1992_v9 = vpop.f32.mrf.mxu1  ;;  %v1952_v47 = vadd.f32 %v1951_v49, %v466_v45  ;;  %v1991_v48 = vadd.f32 %v1990_v39, %v1950_v46  ;;  %v8058_v39 = vld [vmem:[#allocation8 + $0x3ec] ss:$16 sps:$4 sm:$0xff]   ;;  %v8071_v45 = vld [vmem:[#allocation8 + $0x348] ss:$16 sps:$4 sm:$0xff]  }
 0x201   :  { %v1953_v41 = vpop.f32.mrf.mxu0  ;;  %v8061_v49 = vld [vmem:[#allocation8 + $0x3cc] ss:$16 sps:$4 sm:$0xff]  }
 0x202   :  { %v1994_v42 = vpop.f32.mrf.mxu1  ;;  %2988 = vmatpush2.bf16.msra.mxu0 %v7978_v8  ;;  %v1993_v51 = vadd.f32 %v1992_v9, %v1952_v47  ;;  %v8056_v8 = vld [vmem:[#allocation8 + $0x3e8] ss:$16 sps:$4 sm:$0xff]   ;;  %v8076_v46 = vld [vmem:[#allocation8 + $0x32c] ss:$16 sps:$4 sm:$0xff]  }
 0x203   :  { %v1954_v21 = vpop.f32.mrf.mxu0  ;;  %2989 = vmatprep.subr.bf16.mxu0 %v7983_v52  ;;  %v8059_v9 = vld [vmem:[#allocation8 + $0x3c8] ss:$16 sps:$4 sm:$0xff]   ;;  %v8064_v52 = vld [vmem:[#allocation8 + $0x3ac] ss:$16 sps:$4 sm:$0xff]  }
 0x204   :  { %v1995_v43 = vpop.f32.mrf.mxu1  ;;  %v8062_v41 = vld [vmem:[#allocation8 + $0x3a8] ss:$16 sps:$4 sm:$0xff]   ;;  %v8067_v42 = vld [vmem:[#allocation8 + $0x38c] ss:$16 sps:$4 sm:$0xff]  }
 0x205   :  { %v8070_v21 = vld [vmem:[#allocation8 + $0x36c] ss:$16 sps:$4 sm:$0xff]   ;;  %v8068_v43 = vld [vmem:[#allocation8 + $0x368] ss:$16 sps:$4 sm:$0xff]  }
 0x206   :  { %2990 = vmatpush2.bf16.msra.mxu0 %v7981_v20  ;;  %v8065_v20 = vld [vmem:[#allocation8 + $0x388] ss:$16 sps:$4 sm:$0xff]  }
 0x207   :  { %7441 = vmatprep.subr.bf16.mxu0 %v8080_v5  ;;  %v8074_v47 = vld [vmem:[#allocation8 + $0x328] ss:$16 sps:$4 sm:$0xff]  }
 0x208   :  { %v8109_v5 = vld [vmem:[#allocation10 + $0x88] sm:$0xff]  }
 0x209   :  { %2992 = vmatmul.mubr.bf16.vlgmr.msra.gmra.mxu0 %v8802_v60 }
 0x20a   :  { %7442 = vmatpush3.bf16.msra.mxu0 %v8081_v6 }
 0x20b   :  { %7443 = vmatprep.subr.bf16.mxu0 %v8082_v7 }
 0x20e   :  { %7444 = vmatpush3.bf16.msra.mxu0 %v8083_v11  ;;  %v8111_v11 = vld [vmem:[#allocation10 + $0x80] sm:$0xff]  }
 0x20f   :  { %7445 = vmatprep.subr.bf16.mxu0 %v8084_v13  ;;  %v2215_v13 = vld [vmem:[%s8935_s4] sm:$0xf] }
 0x212   :  { %7446 = vmatpush3.bf16.msra.mxu0 %v8085_v15  ;;  %v2224_v15 = vrot.slane %v2215_v13, %v8792_v36 }
 0x213   :  { %7447 = vmatprep.subr.bf16.mxu0 %v8086_v17 }
 0x216   :  { %7448 = vmatpush3.bf16.msra.mxu0 %v8087_v19 }
 0x217   :  { %7449 = vmatprep.subr.bf16.mxu0 %v8088_v24 }
 0x21a   :  { %7450 = vmatpush3.bf16.msra.mxu0 %v8089_v27 }
 0x21b   :  { %7451 = vmatprep.subr.bf16.mxu0 %v8090_v30 }
 0x21e   :  { %7452 = vmatpush3.bf16.msra.mxu0 %v8091_v38 }
 0x23d   :  { %v2031_v50 = vpop.f32.mrf.mxu0 }
 0x23e   :  { %v2072_v32 = vpop.f32.mrf.mxu1  ;;  %v2032_v53 = vadd.f32 %v2031_v50, %v1991_v48  ;;  %v8079_v48 = vld [vmem:[#allocation8 + $0x30c] ss:$16 sps:$4 sm:$0xff]   ;;  %v8077_v50 = vld [vmem:[#allocation8 + $0x308] ss:$16 sps:$4 sm:$0xff]  }
 0x23f   :  { %v2033_v34 = vpop.f32.mrf.mxu0 }
 0x240   :  { %v2074_v54 = vpop.f32.mrf.mxu1  ;;  %v2073_v55 = vadd.f32 %v2072_v32, %v2032_v53  ;;  %v2034_v33 = vadd.f32 %v2033_v34, %v1993_v51  ;;  %v8092_v51 = vld [vmem:[#allocation10 + $0x48] sm:$0xff]  }
 0x241   :  { %v2035_v56 = vpop.f32.mrf.mxu0  ;;  %v8093_v34 = vld [vmem:[#allocation10 + $0x8] sm:$0xff]   ;;  %7453 = vmatprep.subr.bf16.mxu0 %v8092_v51 }
 0x242   :  { %v2076_v57 = vpop.f32.mrf.mxu1  ;;  %v2075_v58 = vadd.f32 %v2074_v54, %v2034_v33  ;;  %v2081_v35 = vmax.f32 %v2073_v55, 0.0  ;;  %7454 = vmatpush3.bf16.msra.mxu0 %v8093_v34  ;;  %v8094_v55 = vld [vmem:[#allocation10 + $0x40] sm:$0xff]  }
 0x243   :  { %v2036_v59 = vpop.f32.mrf.mxu0  ;;  %v8095_v56 = vld [vmem:[#allocation10] sm:$0xff]   ;;  %7455 = vmatprep.subr.bf16.mxu0 %v8094_v55  ;;  %v8096_v57 = vld [vmem:[#allocation10 + $0xf8] sm:$0xff]  }
 0x244   :  { %v2077_v60 = vpop.f32.mrf.mxu1  ;;  %v2082_v61 = vmax.f32 %v2075_v58, 0.0  ;;  %v8816_v63 = vpack.c.bf16 %v2081_v35, %v2081_v35  ;;  %v8097_v58 = vld [vmem:[#allocation10 + $0xb8] sm:$0xff]   ;;  %v8098_v35 = vld [vmem:[#allocation10 + $0xf0] sm:$0xff]  }
 0x245   :  { %v8099_v59 = vld [vmem:[#allocation10 + $0xb0] sm:$0xff]   ;;  %v8100_v60 = vld [vmem:[#allocation10 + $0xe8] sm:$0xff]  }
 0x246   :  { %v2086_v62 = vpack.c.bf16 %v2082_v61, %v2082_v61  ;;  %7456 = vmatpush3.bf16.msra.mxu0 %v8095_v56  ;;  %v8101_v61 = vld [vmem:[#allocation10 + $0xa8] sm:$0xff]  }
 0x247   :  { %v8117_v51 = vld [vmem:[#allocation13 + $0xec] ss:$16 sps:$4 sm:$0xff]   ;;  %v8121_v55 = vld [vmem:[#allocation13 + $0xc8] ss:$16 sps:$4 sm:$0xff]  }
 0x248   :  { %2950 = vmatprep.mubr.bf16.mxu1 %v2086_v62  ;;  %v8123_v34 = vld [vmem:[#allocation13 + $0xcc] ss:$16 sps:$4 sm:$0xff]  }
 0x249   :  { %2951 = vmatmul.mubr.bf16.vlgmr.msra.gmra.mxu1 %v8816_v63  ;;  %v8129_v56 = vld [vmem:[#allocation13 + $0xac] ss:$16 sps:$4 sm:$0xff]  }
 0x24a   :  { %3001 = vmatpush1.bf16.msra.mxu1 %v8032_v26  ;;  %3032 = vmatprep.mubr.bf16.mxu1 %v2086_v62  ;;  %v8102_v62 = vld [vmem:[#allocation10 + $0xe0] sm:$0xff]  }
 0x24b   :  { %3002 = vmatprep.subr.bf16.mxu1 %v8037_v0  ;;  %v8103_v26 = vld [vmem:[#allocation10 + $0xa0] sm:$0xff]   ;;  %v8105_v0 = vld [vmem:[#allocation10 + $0x98] sm:$0xff]  }
 0x24e   :  { %3003 = vmatpush1.bf16.msra.mxu1 %v8035_v1  ;;  %v8106_v1 = vld [vmem:[#allocation10 + $0xd0] sm:$0xff]  }
 0x24f   :  { %3004 = vmatprep.subr.bf16.mxu1 %v8040_v2  ;;  %v8107_v2 = vld [vmem:[#allocation10 + $0x90] sm:$0xff]  }
 0x252   :  { %3005 = vmatpush1.bf16.msra.mxu1 %v8038_v3 }
 0x253   :  { %3006 = vmatprep.subr.bf16.mxu1 %v8043_v4  ;;  %v8108_v4 = vld [vmem:[#allocation10 + $0xc8] sm:$0xff]  }
 0x256   :  { %3007 = vmatpush1.bf16.msra.mxu1 %v8041_v10  ;;  %v8110_v10 = vld [vmem:[#allocation10 + $0xc0] sm:$0xff]  }
 0x257   :  { %3008 = vmatprep.subr.bf16.mxu1 %v8046_v12 }
 0x25a   :  { %3009 = vmatpush1.bf16.msra.mxu1 %v8044_v14  ;;  %v2220_v14 = vrot.slane %v2215_v13, %v8789_v28 }
 0x25b   :  { %3010 = vmatprep.subr.bf16.mxu1 %v8049_v16 }
 0x25e   :  { %3011 = vmatpush1.bf16.msra.mxu1 %v8047_v18 }
 0x25f   :  { %3012 = vmatprep.subr.bf16.mxu1 %v8052_v23 }
 0x262   :  { %3013 = vmatpush1.bf16.msra.mxu1 %v8050_v25 }
 0x263   :  { %3014 = vmatprep.subr.bf16.mxu1 %v8055_v29 }
 0x266   :  { %3015 = vmatpush1.bf16.msra.mxu1 %v8053_v31 }
 0x267   :  { %3016 = vmatprep.subr.bf16.mxu1 %v8058_v39  ;;  %v2228_v39 = vrot.slane %v2215_v13, %v8807_v37 }
 0x26a   :  { %3017 = vmatpush2.bf16.msra.mxu1 %v8056_v8  ;;  %v2232_v8 = vrot.slane %v2215_v13, %v8810_v40  ;;  %v8154_v13 = vld [vmem:[#allocation13] ss:$16 sps:$4 sm:$0xff]  }
 0x26b   :  { %3018 = vmatprep.subr.bf16.mxu1 %v8061_v49 }
 0x26e   :  { %3019 = vmatpush2.bf16.msra.mxu1 %v8059_v9 }
 0x26f   :  { %3020 = vmatprep.subr.bf16.mxu1 %v8064_v52 }
 0x272   :  { %3021 = vmatpush2.bf16.msra.mxu1 %v8062_v41 }
 0x273   :  { %3022 = vmatprep.subr.bf16.mxu1 %v8067_v42 }
 0x276   :  { %3023 = vmatpush2.bf16.msra.mxu1 %v8065_v20 }
 0x277   :  { %3024 = vmatprep.subr.bf16.mxu1 %v8070_v21 }
 0x27a   :  { %3025 = vmatpush2.bf16.msra.mxu1 %v8068_v43 }
 0x27b   :  { %3026 = vmatprep.subr.bf16.mxu1 %v8073_v44 }
 0x27e   :  { %3027 = vmatpush2.bf16.msra.mxu1 %v8071_v45 }
 0x27f   :  { %3028 = vmatprep.subr.bf16.mxu1 %v8076_v46 }
 0x282   :  { %3029 = vmatpush2.bf16.msra.mxu1 %v8074_v47 }
 0x283   :  { %3030 = vmatprep.subr.bf16.mxu1 %v8079_v48  ;;  %v8112_v48 = vld [vmem:[#allocation13 + $0xe0] ss:$16 sps:$4 sm:$0xff]  }
 0x286   :  { %3031 = vmatpush2.bf16.msra.mxu1 %v8077_v50  ;;  %v8114_v50 = vld [vmem:[#allocation13 + $0xe4] ss:$16 sps:$4 sm:$0xff]  }
 0x287   :  { %7463 = vmatprep.subr.bf16.mxu1 %v8096_v57  ;;  %3607 = vmatprep.subr.bf16.mxu0 %v8114_v50  ;;  %v8124_v57 = vld [vmem:[#allocation13 + $0xa0] ss:$16 sps:$4 sm:$0xff]   ;;  %v8183_v50 = vld [vmem:[#allocation14 + $0x284] ss:$16 sps:$4 sm:$0xff]  }
 0x289   :  { %3033 = vmatmul.mubr.bf16.vlgmr.msra.gmra.mxu1 %v8816_v63  ;;  %v2911_v32 = vpop.f32.mrf.mxu0  ;;  %v8104_v63 = vld [vmem:[#allocation10 + $0xd8] sm:$0xff]  }
 0x28a   :  { %7464 = vmatpush3.bf16.msra.mxu1 %v8097_v58  ;;  %v2912_v16 = vadd.f32 %v2911_v32, %v2220_v14  ;;  %v8115_v32 = vld [vmem:[#allocation13 + $0xe8] ss:$16 sps:$4 sm:$0xff]  }
 0x28b   :  { %v2913_v53 = vpop.f32.mrf.mxu0  ;;  %7465 = vmatprep.subr.bf16.mxu1 %v8098_v35  ;;  %v8127_v58 = vld [vmem:[#allocation13 + $0xa8] ss:$16 sps:$4 sm:$0xff]   ;;  %v8132_v35 = vld [vmem:[#allocation13 + $0x84] ss:$16 sps:$4 sm:$0xff]  }
 0x28c   :  { %v2914_v18 = vadd.f32 %v2913_v53, %v2224_v15  ;;  %v8120_v53 = vld [vmem:[#allocation13 + $0xc4] ss:$16 sps:$4 sm:$0xff]   ;;  %v8157_v14 = vld [vmem:[#allocation13 + $0x8] ss:$16 sps:$4 sm:$0xff]   ;;  %v8624_v15 = vmov 0  }
 0x28d   :  { %v2915_v54 = vpop.f32.mrf.mxu0 }
 0x28e   :  { %7466 = vmatpush3.bf16.msra.mxu1 %v8099_v59  ;;  %v8118_v54 = vld [vmem:[#allocation13 + $0xc0] ss:$16 sps:$4 sm:$0xff]   ;;  %v8135_v59 = vld [vmem:[#allocation13 + $0x8c] ss:$16 sps:$4 sm:$0xff]  }
 0x28f   :  { %v2916_v33 = vpop.f32.mrf.mxu0  ;;  %7467 = vmatprep.subr.bf16.mxu1 %v8100_v60  ;;  %v8130_v60 = vld [vmem:[#allocation13 + $0x80] ss:$16 sps:$4 sm:$0xff]  }
 0x290   :  { %v8126_v33 = vld [vmem:[#allocation13 + $0xa4] ss:$16 sps:$4 sm:$0xff]  }
 0x292   :  { %7468 = vmatpush3.bf16.msra.mxu1 %v8101_v61  ;;  %v8133_v61 = vld [vmem:[#allocation13 + $0x88] ss:$16 sps:$4 sm:$0xff]  }
 0x293   :  { %7469 = vmatprep.subr.bf16.mxu1 %v8102_v62  ;;  %v8138_v62 = vld [vmem:[#allocation13 + $0x64] ss:$16 sps:$4 sm:$0xff]  }
 0x296   :  { %7470 = vmatpush3.bf16.msra.mxu1 %v8103_v26  ;;  %v8141_v26 = vld [vmem:[#allocation13 + $0x6c] ss:$16 sps:$4 sm:$0xff]  }
 0x297   :  { %7471 = vmatprep.subr.bf16.mxu1 %v8104_v63  ;;  %v8136_v63 = vld [vmem:[#allocation13 + $0x60] ss:$16 sps:$4 sm:$0xff]  }
 0x29a   :  { %7472 = vmatpush3.bf16.msra.mxu1 %v8105_v0  ;;  %v8139_v0 = vld [vmem:[#allocation13 + $0x68] ss:$16 sps:$4 sm:$0xff]  }
 0x29b   :  { %7473 = vmatprep.subr.bf16.mxu1 %v8106_v1  ;;  %v8144_v1 = vld [vmem:[#allocation13 + $0x44] ss:$16 sps:$4 sm:$0xff]  }
 0x29e   :  { %7474 = vmatpush3.bf16.msra.mxu1 %v8107_v2  ;;  %v8147_v2 = vld [vmem:[#allocation13 + $0x4c] ss:$16 sps:$4 sm:$0xff]  }
 0x29f   :  { %7475 = vmatprep.subr.bf16.mxu1 %v8108_v4  ;;  %v8145_v4 = vld [vmem:[#allocation13 + $0x48] ss:$16 sps:$4 sm:$0xff]  }
 0x2a2   :  { %7476 = vmatpush3.bf16.msra.mxu1 %v8109_v5  ;;  %v8150_v5 = vld [vmem:[#allocation13 + $0x24] ss:$16 sps:$4 sm:$0xff]  }
 0x2a3   :  { %7477 = vmatprep.subr.bf16.mxu1 %v8110_v10  ;;  %v8151_v10 = vld [vmem:[#allocation13 + $0x28] ss:$16 sps:$4 sm:$0xff]  }
 0x2a6   :  { %7478 = vmatpush3.bf16.msra.mxu1 %v8111_v11  ;;  %v8156_v11 = vld [vmem:[#allocation13 + $0x4] ss:$16 sps:$4 sm:$0xff]  }
 0x2a7   :  { %3648 = vmatprep.subr.bf16.mxu1 %v8117_v51  ;;  %v8181_v51 = vld [vmem:[#allocation14 + $0x280] ss:$16 sps:$4 sm:$0xff]  }
 0x2c9   :  { %v2993_v3 = vpop.f32.mrf.mxu0 }
 0x2ca   :  { %v2994_v49 = vadd.f32 %v2993_v3, %v2228_v39  ;;  %v8142_v3 = vld [vmem:[#allocation13 + $0x40] ss:$16 sps:$4 sm:$0xff]  }
 0x2cb   :  { %v2995_v6 = vpop.f32.mrf.mxu0 }
 0x2cc   :  { %v2996_v52 = vadd.f32 %v2995_v6, %v2232_v8  ;;  %v8153_v6 = vld [vmem:[#allocation13 + $0x2c] ss:$16 sps:$4 sm:$0xff]  }
 0x2cd   :  { %v2997_v7 = vpop.f32.mrf.mxu0 }
 0x2ce   :  { %v8148_v7 = vld [vmem:[#allocation13 + $0x20] ss:$16 sps:$4 sm:$0xff]  }
 0x2cf   :  { %v2998_v12 = vpop.f32.mrf.mxu0 }
 0x2d0   :  { %v8159_v12 = vld [vmem:[#allocation13 + $0xc] ss:$16 sps:$4 sm:$0xff]  }
 0x309   :  { %v2952_v17 = vpop.f32.mrf.mxu1 }
 0x30a   :  { %v2953_v19 = vadd.f32 %v2952_v17, %v2912_v16  ;;  %v8162_v16 = vld [vmem:[#allocation14 + $0xe4] ss:$16 sps:$4 sm:$0xff]  }
 0x30b   :  { %v2954_v23 = vpop.f32.mrf.mxu1  ;;  %v8165_v17 = vld [vmem:[#allocation14 + $0x2e4] ss:$16 sps:$4 sm:$0xff]  }
 0x30c   :  { %v2955_v24 = vadd.f32 %v2954_v23, %v2914_v18  ;;  %v3041_v25 = vmax.f32 %v2953_v19, 0.0 }
 0x30d   :  { %v2956_v27 = vpop.f32.mrf.mxu1 }
 0x30e   :  { %v3042_v29 = vmax.f32 %v2955_v24, 0.0  ;;  %v3045_v38 = vpack.c.bf16 %v3041_v25, %v3041_v25  ;;  %v6992_v27 = vld [vmem:[#allocation11] ss:$0 sm:$0xff] }
 0x30f   :  { %v2957_v30 = vpop.f32.mrf.mxu1 }
 0x310   :  { %v3046_v31 = vpack.c.bf16 %v3042_v29, %v3042_v29 }
 0x312   :  { %3344 = vmatprep.mubr.bf16.mxu0 %v3046_v31 }
 0x313   :  { %3345 = vmatmul.mubr.bf16.vlgmr.msra.gmra.mxu0 %v3045_v38 }
 0x314   :  { %3608 = vmatpush1.bf16.msra.mxu0 %v8112_v48  ;;  %3639 = vmatprep.mubr.bf16.mxu0 %v8624_v15  ;;  %v8180_v48 = vld [vmem:[#allocation14 + $0x84] ss:$16 sps:$4 sm:$0xff]  }
 0x315   :  { %3609 = vmatprep.subr.bf16.mxu0 %v8120_v53  ;;  %v8186_v53 = vld [vmem:[#allocation14 + $0x64] ss:$16 sps:$4 sm:$0xff]  }
 0x318   :  { %3610 = vmatpush1.bf16.msra.mxu0 %v8118_v54  ;;  %v8184_v54 = vld [vmem:[#allocation14 + $0x60] ss:$16 sps:$4 sm:$0xff]  }
 0x319   :  { %3611 = vmatprep.subr.bf16.mxu0 %v8126_v33  ;;  %v8192_v33 = vld [vmem:[#allocation14 + $0x44] ss:$16 sps:$4 sm:$0xff]  }
 0x31c   :  { %3612 = vmatpush1.bf16.msra.mxu0 %v8124_v57  ;;  %v8190_v57 = vld [vmem:[#allocation14 + $0x40] ss:$16 sps:$4 sm:$0xff]  }
 0x31d   :  { %3613 = vmatprep.subr.bf16.mxu0 %v8132_v35  ;;  %v8198_v35 = vld [vmem:[#allocation14 + $0x24] ss:$16 sps:$4 sm:$0xff]  }
 0x320   :  { %3614 = vmatpush1.bf16.msra.mxu0 %v8130_v60  ;;  %v8196_v60 = vld [vmem:[#allocation14 + $0x20] ss:$16 sps:$4 sm:$0xff]  }
 0x321   :  { %3615 = vmatprep.subr.bf16.mxu0 %v8138_v62  ;;  %v8204_v62 = vld [vmem:[#allocation14 + $0x4] ss:$16 sps:$4 sm:$0xff]  }
 0x324   :  { %3616 = vmatpush1.bf16.msra.mxu0 %v8136_v63  ;;  %v8202_v63 = vld [vmem:[#allocation14] ss:$16 sps:$4 sm:$0xff]  }
 0x325   :  { %3617 = vmatprep.subr.bf16.mxu0 %v8144_v1  ;;  %v8210_v1 = vld [vmem:[#allocation14 + $0x1e4] ss:$16 sps:$4 sm:$0xff]  }
 0x328   :  { %3618 = vmatpush1.bf16.msra.mxu0 %v8142_v3  ;;  %v8208_v3 = vld [vmem:[#allocation14 + $0x1e0] ss:$16 sps:$4 sm:$0xff]  }
 0x329   :  { %3619 = vmatprep.subr.bf16.mxu0 %v8150_v5  ;;  %v8216_v5 = vld [vmem:[#allocation14 + $0x1c4] ss:$16 sps:$4 sm:$0xff]  }
 0x32c   :  { %3620 = vmatpush1.bf16.msra.mxu0 %v8148_v7  ;;  %v8214_v7 = vld [vmem:[#allocation14 + $0x1c0] ss:$16 sps:$4 sm:$0xff]  }
 0x32d   :  { %3621 = vmatprep.subr.bf16.mxu0 %v8156_v11  ;;  %v8222_v11 = vld [vmem:[#allocation14 + $0x1a4] ss:$16 sps:$4 sm:$0xff]  }
 0x330   :  { %3622 = vmatpush1.bf16.msra.mxu0 %v8154_v13  ;;  %v8220_v13 = vld [vmem:[#allocation14 + $0x1a0] ss:$16 sps:$4 sm:$0xff]  }
 0x331   :  { %4487 = vmatprep.subr.bf16.mxu0 %v8162_v16  ;;  %v8231_v16 = vld [vmem:[#allocation14 + $0x384] ss:$16 sps:$4 sm:$0xff]  }
 0x349   :  { %v3034_v9 = vpop.f32.mrf.mxu1 }
 0x34a   :  { %v3035_v41 = vadd.f32 %v3034_v9, %v2994_v49  ;;  %v8160_v9 = vld [vmem:[#allocation14 + $0xe0] ss:$16 sps:$4 sm:$0xff]  }
 0x34b   :  { %v3036_v42 = vpop.f32.mrf.mxu1 }
 0x34c   :  { %v3037_v20 = vadd.f32 %v3036_v42, %v2996_v52  ;;  %v3043_v21 = vmax.f32 %v3035_v41, 0.0  ;;  %v8163_v52 = vld [vmem:[#allocation14 + $0x2e0] ss:$16 sps:$4 sm:$0xff]   ;;  %v8168_v42 = vld [vmem:[#allocation14 + $0xc4] ss:$16 sps:$4 sm:$0xff]  }
 0x34d   :  { %v3038_v43 = vpop.f32.mrf.mxu1 }
 0x34e   :  { %v3044_v44 = vmax.f32 %v3037_v20, 0.0  ;;  %v3047_v47 = vpack.c.bf16 %v3043_v21, %v3043_v21  ;;  %v8171_v20 = vld [vmem:[#allocation14 + $0x2c4] ss:$16 sps:$4 sm:$0xff]   ;;  %v8166_v21 = vld [vmem:[#allocation14 + $0xc0] ss:$16 sps:$4 sm:$0xff]  }
 0x34f   :  { %v3039_v45 = vpop.f32.mrf.mxu1  ;;  %v8169_v43 = vld [vmem:[#allocation14 + $0x2c0] ss:$16 sps:$4 sm:$0xff]  }
 0x350   :  { %v3048_v46 = vpack.c.bf16 %v3044_v44, %v3044_v44  ;;  %v8174_v44 = vld [vmem:[#allocation14 + $0xa4] ss:$16 sps:$4 sm:$0xff]  }
 0x351   :  { %v8177_v45 = vld [vmem:[#allocation14 + $0x2a4] ss:$16 sps:$4 sm:$0xff]  }
 0x352   :  { %3384 = vmatprep.mubr.bf16.mxu1 %v3048_v46  ;;  %v8172_v46 = vld [vmem:[#allocation14 + $0xa0] ss:$16 sps:$4 sm:$0xff]  }
 0x353   :  { %3385 = vmatmul.mubr.bf16.vlgmr.msra.gmra.mxu1 %v3047_v47  ;;  %v8175_v47 = vld [vmem:[#allocation14 + $0x2a0] ss:$16 sps:$4 sm:$0xff]  }
 0x354   :  { %3649 = vmatpush1.bf16.msra.mxu1 %v8115_v32  ;;  %3680 = vmatprep.mubr.bf16.mxu1 %v8624_v15  ;;  %v8178_v32 = vld [vmem:[#allocation14 + $0x80] ss:$16 sps:$4 sm:$0xff]   ;;  %v8228_v15 = vld [vmem:[#allocation14 + $0x184] ss:$16 sps:$4 sm:$0xff]  }
 0x355   :  { %3650 = vmatprep.subr.bf16.mxu1 %v8123_v34  ;;  %v8189_v34 = vld [vmem:[#allocation14 + $0x264] ss:$16 sps:$4 sm:$0xff]  }
 0x358   :  { %3651 = vmatpush1.bf16.msra.mxu1 %v8121_v55  ;;  %v8187_v55 = vld [vmem:[#allocation14 + $0x260] ss:$16 sps:$4 sm:$0xff]  }
 0x359   :  { %3652 = vmatprep.subr.bf16.mxu1 %v8129_v56  ;;  %v8195_v56 = vld [vmem:[#allocation14 + $0x244] ss:$16 sps:$4 sm:$0xff]  }
 0x35c   :  { %3653 = vmatpush1.bf16.msra.mxu1 %v8127_v58  ;;  %v8193_v58 = vld [vmem:[#allocation14 + $0x240] ss:$16 sps:$4 sm:$0xff]  }
 0x35d   :  { %3654 = vmatprep.subr.bf16.mxu1 %v8135_v59  ;;  %v8201_v59 = vld [vmem:[#allocation14 + $0x224] ss:$16 sps:$4 sm:$0xff]  }
 0x360   :  { %3655 = vmatpush1.bf16.msra.mxu1 %v8133_v61  ;;  %v8199_v61 = vld [vmem:[#allocation14 + $0x220] ss:$16 sps:$4 sm:$0xff]  }
 0x361   :  { %3656 = vmatprep.subr.bf16.mxu1 %v8141_v26  ;;  %v8207_v26 = vld [vmem:[#allocation14 + $0x204] ss:$16 sps:$4 sm:$0xff]  }
 0x364   :  { %3657 = vmatpush1.bf16.msra.mxu1 %v8139_v0  ;;  %v8205_v0 = vld [vmem:[#allocation14 + $0x200] ss:$16 sps:$4 sm:$0xff]  }
 0x365   :  { %3658 = vmatprep.subr.bf16.mxu1 %v8147_v2  ;;  %v8213_v2 = vld [vmem:[#allocation14 + $0x3e4] ss:$16 sps:$4 sm:$0xff]  }
 0x368   :  { %3659 = vmatpush1.bf16.msra.mxu1 %v8145_v4  ;;  %v8211_v4 = vld [vmem:[#allocation14 + $0x3e0] ss:$16 sps:$4 sm:$0xff]  }
 0x369   :  { %3660 = vmatprep.subr.bf16.mxu1 %v8153_v6  ;;  %v8219_v6 = vld [vmem:[#allocation14 + $0x3c4] ss:$16 sps:$4 sm:$0xff]  }
 0x36c   :  { %3661 = vmatpush1.bf16.msra.mxu1 %v8151_v10  ;;  %v8217_v10 = vld [vmem:[#allocation14 + $0x3c0] ss:$16 sps:$4 sm:$0xff]  }
 0x36d   :  { %3662 = vmatprep.subr.bf16.mxu1 %v8159_v12  ;;  %v8225_v12 = vld [vmem:[#allocation14 + $0x3a4] ss:$16 sps:$4 sm:$0xff]  }
 0x370   :  { %3663 = vmatpush1.bf16.msra.mxu1 %v8157_v14  ;;  %v8223_v14 = vld [vmem:[#allocation14 + $0x3a0] ss:$16 sps:$4 sm:$0xff]  }
 0x371   :  { %4528 = vmatprep.subr.bf16.mxu1 %v8165_v17  ;;  %v8226_v17 = vld [vmem:[#allocation14 + $0x180] ss:$16 sps:$4 sm:$0xff]  }
 0x3d3   :  { %v7457_v18 = vpop.f32.mrf.mxu0 }
 0x3d5   :  { %v7458_v19 = vpop.f32.mrf.mxu0 }
 0x3d6   :  { %v7459_v25 = vadd.f32 %v7458_v19, %v7457_v18  ;;  %v8229_v18 = vld [vmem:[#allocation14 + $0x380] ss:$16 sps:$4 sm:$0xff]   ;;  %v8234_v19 = vld [vmem:[#allocation14 + $0x164] ss:$16 sps:$4 sm:$0xff]  }
 0x3d7   :  { %v7460_v23 = vpop.f32.mrf.mxu0 }
 0x3d8   :  { %v3347_v31 = vadd.f32 %v7459_v25, %v6992_v27  ;;  %v8237_v23 = vld [vmem:[#allocation14 + $0x364] ss:$16 sps:$4 sm:$0xff]   ;;  %v8235_v25 = vld [vmem:[#allocation14 + $0x360] ss:$16 sps:$4 sm:$0xff]  }
 0x3d9   :  { %v7461_v24 = vpop.f32.mrf.mxu0  ;;  %v8240_v27 = vld [vmem:[#allocation14 + $0x144] ss:$16 sps:$4 sm:$0xff]  }
 0x3da   :  { %v8232_v24 = vld [vmem:[#allocation14 + $0x160] ss:$16 sps:$4 sm:$0xff]  }
 0x413   :  { %v7479_v29 = vpop.f32.mrf.mxu1 }
 0x415   :  { %v7480_v30 = vpop.f32.mrf.mxu1 }
 0x416   :  { %v7481_v38 = vadd.f32 %v7480_v30, %v7479_v29  ;;  %v8243_v29 = vld [vmem:[#allocation14 + $0x344] ss:$16 sps:$4 sm:$0xff]   ;;  %v8238_v30 = vld [vmem:[#allocation14 + $0x140] ss:$16 sps:$4 sm:$0xff]  }
 0x417   :  { %v7482_v39 = vpop.f32.mrf.mxu1 }
 0x418   :  { %v3387_v8 = vadd.f32 %v7481_v38, %v3347_v31  ;;  %v8241_v31 = vld [vmem:[#allocation14 + $0x340] ss:$16 sps:$4 sm:$0xff]   ;;  %v8246_v38 = vld [vmem:[#allocation14 + $0x124] ss:$16 sps:$4 sm:$0xff]  }
 0x419   :  { %v7483_v49 = vpop.f32.mrf.mxu1  ;;  %v8249_v39 = vld [vmem:[#allocation14 + $0x324] ss:$16 sps:$4 sm:$0xff]  }
 0x41a   :  { %v3392_v41 = vpack.c.bf16 %v3387_v8, %v3387_v8  ;;  %6573 = vst [vmem:[#allocation20] sm:$0xff] %v3387_v8  ;;  %v8244_v8 = vld [vmem:[#allocation14 + $0x120] ss:$16 sps:$4 sm:$0xff]  }
 0x41b   :  { %v8247_v49 = vld [vmem:[#allocation14 + $0x320] ss:$16 sps:$4 sm:$0xff]  }
 0x41c   :  { %3640 = vmatmul.mubr.bf16.vlgmr.msra.gmra.mxu0 %v3392_v41  ;;  %3681 = vmatmul.mubr.bf16.vlgmr.msra.gmra.mxu1 %v3392_v41  ;;  %v8250_v41 = vld [vmem:[#allocation14 + $0x100] ss:$16 sps:$4 sm:$0xff]  }
 0x41d   :  { %4488 = vmatpush1.bf16.msra.mxu0 %v8160_v9  ;;  %4529 = vmatpush1.bf16.msra.mxu1 %v8163_v52  ;;  %v8252_v9 = vld [vmem:[#allocation14 + $0x104] ss:$16 sps:$4 sm:$0xff]  }
 0x41e   :  { %4489 = vmatprep.subr.bf16.mxu0 %v8168_v42  ;;  %4530 = vmatprep.subr.bf16.mxu1 %v8171_v20  ;;  %v8255_v52 = vld [vmem:[#allocation14 + $0x304] ss:$16 sps:$4 sm:$0xff]   ;;  %v8253_v42 = vld [vmem:[#allocation14 + $0x300] ss:$16 sps:$4 sm:$0xff]   ;;  %v8258_v20 = vld [vmem:[#allocation14 + $0xec] ss:$16 sps:$4 sm:$0xff]  }
 0x421   :  { %4490 = vmatpush1.bf16.msra.mxu0 %v8166_v21  ;;  %4531 = vmatpush1.bf16.msra.mxu1 %v8169_v43  ;;  %v8261_v21 = vld [vmem:[#allocation14 + $0x2ec] ss:$16 sps:$4 sm:$0xff]  }
 0x422   :  { %4491 = vmatprep.subr.bf16.mxu0 %v8174_v44  ;;  %4532 = vmatprep.subr.bf16.mxu1 %v8177_v45  ;;  %v3425_v43 = vld [vmem:[%s8939_s8] sm:$0xf] }
 0x423   :  { %v3430_v44 = vrot.slane %v3425_v43, %v8789_v28  ;;  %v3438_v45 = vrot.slane %v3425_v43, %v8807_v37 }
 0x425   :  { %4492 = vmatpush1.bf16.msra.mxu0 %v8172_v46  ;;  %4533 = vmatpush1.bf16.msra.mxu1 %v8175_v47  ;;  %v3434_v46 = vrot.slane %v3425_v43, %v8792_v36  ;;  %v3442_v47 = vrot.slane %v3425_v43, %v8810_v40  ;;  %v8312_v43 = vld [vmem:[#allocation14 + $0x1cc] ss:$16 sps:$4 sm:$0xff]  }
 0x426   :  { %4493 = vmatprep.subr.bf16.mxu0 %v8180_v48  ;;  %4534 = vmatprep.subr.bf16.mxu1 %v8183_v50 }
 0x429   :  { %4494 = vmatpush1.bf16.msra.mxu0 %v8178_v32  ;;  %4535 = vmatpush1.bf16.msra.mxu1 %v8181_v51 }
 0x42a   :  { %4495 = vmatprep.subr.bf16.mxu0 %v8186_v53  ;;  %4536 = vmatprep.subr.bf16.mxu1 %v8189_v34 }
 0x42d   :  { %4496 = vmatpush1.bf16.msra.mxu0 %v8184_v54  ;;  %4537 = vmatpush1.bf16.msra.mxu1 %v8187_v55 }
 0x42e   :  { %4497 = vmatprep.subr.bf16.mxu0 %v8192_v33  ;;  %4538 = vmatprep.subr.bf16.mxu1 %v8195_v56 }
 0x431   :  { %4498 = vmatpush1.bf16.msra.mxu0 %v8190_v57  ;;  %4539 = vmatpush1.bf16.msra.mxu1 %v8193_v58 }
 0x432   :  { %4499 = vmatprep.subr.bf16.mxu0 %v8198_v35  ;;  %4540 = vmatprep.subr.bf16.mxu1 %v8201_v59 }
 0x435   :  { %4500 = vmatpush1.bf16.msra.mxu0 %v8196_v60  ;;  %4541 = vmatpush1.bf16.msra.mxu1 %v8199_v61 }
 0x436   :  { %4501 = vmatprep.subr.bf16.mxu0 %v8204_v62  ;;  %4542 = vmatprep.subr.bf16.mxu1 %v8207_v26 }
 0x439   :  { %4502 = vmatpush1.bf16.msra.mxu0 %v8202_v63  ;;  %4543 = vmatpush1.bf16.msra.mxu1 %v8205_v0  ;;  %v8256_v63 = vld [vmem:[#allocation14 + $0xe8] ss:$16 sps:$4 sm:$0xff]  }
 0x43a   :  { %4503 = vmatprep.subr.bf16.mxu0 %v8210_v1  ;;  %4544 = vmatprep.subr.bf16.mxu1 %v8213_v2  ;;  %v8259_v0 = vld [vmem:[#allocation14 + $0x2e8] ss:$16 sps:$4 sm:$0xff]  }
 0x43d   :  { %4504 = vmatpush2.bf16.msra.mxu0 %v8208_v3  ;;  %4545 = vmatpush2.bf16.msra.mxu1 %v8211_v4  ;;  %v8264_v3 = vld [vmem:[#allocation14 + $0xcc] ss:$16 sps:$4 sm:$0xff]  }
 0x43e   :  { %4505 = vmatprep.subr.bf16.mxu0 %v8216_v5  ;;  %4546 = vmatprep.subr.bf16.mxu1 %v8219_v6  ;;  %v8267_v4 = vld [vmem:[#allocation14 + $0x2cc] ss:$16 sps:$4 sm:$0xff]   ;;  %v8262_v5 = vld [vmem:[#allocation14 + $0xc8] ss:$16 sps:$4 sm:$0xff]  }
 0x43f   :  { %v8265_v6 = vld [vmem:[#allocation14 + $0x2c8] ss:$16 sps:$4 sm:$0xff]  }
 0x441   :  { %4506 = vmatpush2.bf16.msra.mxu0 %v8214_v7  ;;  %4547 = vmatpush2.bf16.msra.mxu1 %v8217_v10  ;;  %v8270_v7 = vld [vmem:[#allocation14 + $0xac] ss:$16 sps:$4 sm:$0xff]  }
 0x442   :  { %4507 = vmatprep.subr.bf16.mxu0 %v8222_v11  ;;  %4548 = vmatprep.subr.bf16.mxu1 %v8225_v12  ;;  %v8273_v10 = vld [vmem:[#allocation14 + $0x2ac] ss:$16 sps:$4 sm:$0xff]   ;;  %v8268_v11 = vld [vmem:[#allocation14 + $0xa8] ss:$16 sps:$4 sm:$0xff]  }
 0x443   :  { %v8271_v12 = vld [vmem:[#allocation14 + $0x2a8] ss:$16 sps:$4 sm:$0xff]  }
 0x445   :  { %4508 = vmatpush2.bf16.msra.mxu0 %v8220_v13  ;;  %4549 = vmatpush2.bf16.msra.mxu1 %v8223_v14  ;;  %v8276_v13 = vld [vmem:[#allocation14 + $0x8c] ss:$16 sps:$4 sm:$0xff]  }
 0x446   :  { %4509 = vmatprep.subr.bf16.mxu0 %v8228_v15  ;;  %4550 = vmatprep.subr.bf16.mxu1 %v8231_v16  ;;  %v8279_v14 = vld [vmem:[#allocation14 + $0x28c] ss:$16 sps:$4 sm:$0xff]   ;;  %v8274_v15 = vld [vmem:[#allocation14 + $0x88] ss:$16 sps:$4 sm:$0xff]  }
 0x447   :  { %v8277_v16 = vld [vmem:[#allocation14 + $0x288] ss:$16 sps:$4 sm:$0xff]  }
 0x449   :  { %4510 = vmatpush2.bf16.msra.mxu0 %v8226_v17  ;;  %4551 = vmatpush2.bf16.msra.mxu1 %v8229_v18  ;;  %v8282_v17 = vld [vmem:[#allocation14 + $0x6c] ss:$16 sps:$4 sm:$0xff]  }
 0x44a   :  { %4511 = vmatprep.subr.bf16.mxu0 %v8234_v19  ;;  %4552 = vmatprep.subr.bf16.mxu1 %v8237_v23  ;;  %v8285_v18 = vld [vmem:[#allocation14 + $0x26c] ss:$16 sps:$4 sm:$0xff]   ;;  %v8280_v19 = vld [vmem:[#allocation14 + $0x68] ss:$16 sps:$4 sm:$0xff]  }
 0x44b   :  { %v8283_v23 = vld [vmem:[#allocation14 + $0x268] ss:$16 sps:$4 sm:$0xff]  }
 0x44d   :  { %4512 = vmatpush2.bf16.msra.mxu0 %v8232_v24  ;;  %4553 = vmatpush2.bf16.msra.mxu1 %v8235_v25  ;;  %v8288_v24 = vld [vmem:[#allocation14 + $0x4c] ss:$16 sps:$4 sm:$0xff]  }
 0x44e   :  { %4513 = vmatprep.subr.bf16.mxu0 %v8240_v27  ;;  %4554 = vmatprep.subr.bf16.mxu1 %v8243_v29  ;;  %v8291_v25 = vld [vmem:[#allocation14 + $0x24c] ss:$16 sps:$4 sm:$0xff]   ;;  %v8286_v27 = vld [vmem:[#allocation14 + $0x48] ss:$16 sps:$4 sm:$0xff]  }
 0x44f   :  { %v8289_v29 = vld [vmem:[#allocation14 + $0x248] ss:$16 sps:$4 sm:$0xff]  }
 0x451   :  { %4514 = vmatpush2.bf16.msra.mxu0 %v8238_v30  ;;  %4555 = vmatpush2.bf16.msra.mxu1 %v8241_v31  ;;  %v8294_v30 = vld [vmem:[#allocation14 + $0x2c] ss:$16 sps:$4 sm:$0xff]  }
 0x452   :  { %4515 = vmatprep.subr.bf16.mxu0 %v8246_v38  ;;  %4556 = vmatprep.subr.bf16.mxu1 %v8249_v39  ;;  %v8297_v31 = vld [vmem:[#allocation14 + $0x22c] ss:$16 sps:$4 sm:$0xff]   ;;  %v8292_v38 = vld [vmem:[#allocation14 + $0x28] ss:$16 sps:$4 sm:$0xff]  }
 0x453   :  { %v8295_v39 = vld [vmem:[#allocation14 + $0x228] ss:$16 sps:$4 sm:$0xff]  }
 0x455   :  { %4516 = vmatpush2.bf16.msra.mxu0 %v8244_v8  ;;  %4557 = vmatpush2.bf16.msra.mxu1 %v8247_v49  ;;  %v8300_v8 = vld [vmem:[#allocation14 + $0xc] ss:$16 sps:$4 sm:$0xff]  }
 0x456   :  { %4517 = vmatprep.subr.bf16.mxu0 %v8252_v9  ;;  %4558 = vmatprep.subr.bf16.mxu1 %v8255_v52  ;;  %v8303_v49 = vld [vmem:[#allocation14 + $0x20c] ss:$16 sps:$4 sm:$0xff]   ;;  %v8298_v9 = vld [vmem:[#allocation14 + $0x8] ss:$16 sps:$4 sm:$0xff]  }
 0x457   :  { %v8301_v52 = vld [vmem:[#allocation14 + $0x208] ss:$16 sps:$4 sm:$0xff]  }
 0x459   :  { %4518 = vmatpush2.bf16.msra.mxu0 %v8250_v41  ;;  %4559 = vmatpush2.bf16.msra.mxu1 %v8253_v42  ;;  %v8306_v41 = vld [vmem:[#allocation14 + $0x1ec] ss:$16 sps:$4 sm:$0xff]  }
 0x45a   :  { %4569 = vmatprep.subr.bf16.mxu0 %v8258_v20  ;;  %4610 = vmatprep.subr.bf16.mxu1 %v8261_v21  ;;  %v8309_v42 = vld [vmem:[#allocation14 + $0x3ec] ss:$16 sps:$4 sm:$0xff]   ;;  %v8304_v20 = vld [vmem:[#allocation14 + $0x1e8] ss:$16 sps:$4 sm:$0xff]  }
 0x45b   :  { %v8307_v21 = vld [vmem:[#allocation14 + $0x3e8] ss:$16 sps:$4 sm:$0xff]  }
 0x4dc   :  { %v3641_v48 = vpop.f32.mrf.mxu0  ;;  %v3682_v50 = vpop.f32.mrf.mxu1 }
 0x4dd   :  { %v3642_v32 = vadd.f32 %v3641_v48, %v3430_v44  ;;  %v3683_v51 = vadd.f32 %v3682_v50, %v3438_v45  ;;  %v8315_v44 = vld [vmem:[#allocation14 + $0x3cc] ss:$16 sps:$4 sm:$0xff]   ;;  %v8310_v45 = vld [vmem:[#allocation14 + $0x1c8] ss:$16 sps:$4 sm:$0xff]  }
 0x4de   :  { %v3643_v53 = vpop.f32.mrf.mxu0  ;;  %v3684_v34 = vpop.f32.mrf.mxu1  ;;  %v8321_v48 = vld [vmem:[#allocation14 + $0x3ac] ss:$16 sps:$4 sm:$0xff]   ;;  %v8316_v50 = vld [vmem:[#allocation14 + $0x1a8] ss:$16 sps:$4 sm:$0xff]  }
 0x4df   :  { %v3644_v54 = vadd.f32 %v3643_v53, %v3434_v46  ;;  %v3685_v55 = vadd.f32 %v3684_v34, %v3442_v47  ;;  %v3689_v33 = vmax.f32 %v3642_v32, 0.0  ;;  %v3691_v56 = vmax.f32 %v3683_v51, 0.0  ;;  %v8313_v46 = vld [vmem:[#allocation14 + $0x3c8] ss:$16 sps:$4 sm:$0xff]   ;;  %v8318_v47 = vld [vmem:[#allocation14 + $0x1ac] ss:$16 sps:$4 sm:$0xff]  }
 0x4e0   :  { %v3645_v57 = vpop.f32.mrf.mxu0  ;;  %v3686_v58 = vpop.f32.mrf.mxu1  ;;  %v8319_v32 = vld [vmem:[#allocation14 + $0x3a8] ss:$16 sps:$4 sm:$0xff]   ;;  %v8324_v51 = vld [vmem:[#allocation14 + $0x18c] ss:$16 sps:$4 sm:$0xff]  }
 0x4e1   :  { %v3690_v35 = vmax.f32 %v3644_v54, 0.0  ;;  %v3692_v59 = vmax.f32 %v3685_v55, 0.0  ;;  %v8834_v1 = vpack.c.bf16 %v3689_v33, %v3689_v33  ;;  %v8836_v2 = vpack.c.bf16 %v3691_v56, %v3691_v56  ;;  %v8327_v53 = vld [vmem:[#allocation14 + $0x38c] ss:$16 sps:$4 sm:$0xff]   ;;  %v8322_v34 = vld [vmem:[#allocation14 + $0x188] ss:$16 sps:$4 sm:$0xff]  }
 0x4e2   :  { %v3646_v60 = vpop.f32.mrf.mxu0  ;;  %v3687_v61 = vpop.f32.mrf.mxu1  ;;  %v8325_v54 = vld [vmem:[#allocation14 + $0x388] ss:$16 sps:$4 sm:$0xff]   ;;  %v8330_v55 = vld [vmem:[#allocation14 + $0x16c] ss:$16 sps:$4 sm:$0xff]  }
 0x4e3   :  { %v3694_v62 = vpack.c.bf16 %v3690_v35, %v3690_v35  ;;  %v3696_v26 = vpack.c.bf16 %v3692_v59, %v3692_v59  ;;  %v8333_v33 = vld [vmem:[#allocation14 + $0x36c] ss:$16 sps:$4 sm:$0xff]   ;;  %v8328_v56 = vld [vmem:[#allocation14 + $0x168] ss:$16 sps:$4 sm:$0xff]  }
 0x4e4   :  { %v8331_v57 = vld [vmem:[#allocation14 + $0x368] ss:$16 sps:$4 sm:$0xff]   ;;  %v8336_v58 = vld [vmem:[#allocation14 + $0x14c] ss:$16 sps:$4 sm:$0xff]  }
 0x4e5   :  { %4519 = vmatprep.mubr.bf16.mxu0 %v3694_v62  ;;  %4560 = vmatprep.mubr.bf16.mxu1 %v3696_v26  ;;  %v8339_v35 = vld [vmem:[#allocation14 + $0x34c] ss:$16 sps:$4 sm:$0xff]   ;;  %v8334_v59 = vld [vmem:[#allocation14 + $0x148] ss:$16 sps:$4 sm:$0xff]  }
 0x4e6   :  { %4520 = vmatmul.mubr.bf16.vlgmr.msra.gmra.mxu0 %v8834_v1  ;;  %4561 = vmatmul.mubr.bf16.vlgmr.msra.gmra.mxu1 %v8836_v2  ;;  %v8337_v60 = vld [vmem:[#allocation14 + $0x348] ss:$16 sps:$4 sm:$0xff]   ;;  %v8342_v61 = vld [vmem:[#allocation14 + $0x12c] ss:$16 sps:$4 sm:$0xff]  }
 0x4e7   :  { %4570 = vmatpush1.bf16.msra.mxu0 %v8256_v63  ;;  %4611 = vmatpush1.bf16.msra.mxu1 %v8259_v0  ;;  %v8343_v63 = vld [vmem:[#allocation14 + $0x328] ss:$16 sps:$4 sm:$0xff]   ;;  %v8348_v0 = vld [vmem:[#allocation14 + $0x10c] ss:$16 sps:$4 sm:$0xff]  }
 0x4e8   :  { %4601 = vmatprep.mubr.bf16.mxu0 %v3694_v62  ;;  %4642 = vmatprep.mubr.bf16.mxu1 %v3696_v26  ;;  %v8345_v62 = vld [vmem:[#allocation14 + $0x32c] ss:$16 sps:$4 sm:$0xff]   ;;  %v8340_v26 = vld [vmem:[#allocation14 + $0x128] ss:$16 sps:$4 sm:$0xff]  }
 0x4e9   :  { %4571 = vmatprep.subr.bf16.mxu0 %v8264_v3  ;;  %4612 = vmatprep.subr.bf16.mxu1 %v8267_v4  ;;  %v8351_v3 = vld [vmem:[#allocation14 + $0x30c] ss:$16 sps:$4 sm:$0xff]   ;;  %v4715_v4 = vld [vmem:[#allocation17 + $0x1c0] sm:$0xff] }
 0x4eb   :  { %4572 = vmatpush1.bf16.msra.mxu0 %v8262_v5  ;;  %4613 = vmatpush1.bf16.msra.mxu1 %v8265_v6  ;;  %v4719_v5 = vld [vmem:[#allocation17 + $0x1e0] sm:$0xff] }
 0x4ec   :  { %4573 = vmatprep.subr.bf16.mxu0 %v8270_v7  ;;  %4614 = vmatprep.subr.bf16.mxu1 %v8273_v10  ;;  %v8346_v6 = vld [vmem:[#allocation14 + $0x108] ss:$16 sps:$4 sm:$0xff]   ;;  %v7242_v10 = vcombine.high %v4715_v4, %v4719_v5 }
 0x4ed   :  { %v8349_v7 = vld [vmem:[#allocation14 + $0x308] ss:$16 sps:$4 sm:$0xff]  }
 0x4ef   :  { %4574 = vmatpush1.bf16.msra.mxu0 %v8268_v11  ;;  %4615 = vmatpush1.bf16.msra.mxu1 %v8271_v12  ;;  %v4707_v11 = vld [vmem:[#allocation17 + $0x180] sm:$0xff] }
 0x4f0   :  { %4575 = vmatprep.subr.bf16.mxu0 %v8276_v13  ;;  %4616 = vmatprep.subr.bf16.mxu1 %v8279_v14  ;;  %v4711_v12 = vld [vmem:[#allocation17 + $0x1a0] sm:$0xff]  ;;  %v7241_v13 = vcombine.low %v4715_v4, %v4719_v5 }
 0x4f1   :  { %v7234_v14 = vcombine.high %v4707_v11, %v4711_v12  ;;  %v4771_v5 = vld [vmem:[#allocation17 + $0x380] sm:$0xff] }
 0x4f3   :  { %4576 = vmatpush1.bf16.msra.mxu0 %v8274_v15  ;;  %4617 = vmatpush1.bf16.msra.mxu1 %v8277_v16  ;;  %v4699_v15 = vld [vmem:[#allocation17 + $0x140] sm:$0xff] }
 0x4f4   :  { %4577 = vmatprep.subr.bf16.mxu0 %v8282_v17  ;;  %4618 = vmatprep.subr.bf16.mxu1 %v8285_v18  ;;  %v4703_v16 = vld [vmem:[#allocation17 + $0x160] sm:$0xff]  ;;  %v7233_v17 = vcombine.low %v4707_v11, %v4711_v12 }
 0x4f5   :  { %v7226_v18 = vcombine.high %v4699_v15, %v4703_v16 }
 0x4f7   :  { %4578 = vmatpush1.bf16.msra.mxu0 %v8280_v19  ;;  %4619 = vmatpush1.bf16.msra.mxu1 %v8283_v23  ;;  %v4691_v19 = vld [vmem:[#allocation17 + $0x100] sm:$0xff] }
 0x4f8   :  { %4579 = vmatprep.subr.bf16.mxu0 %v8288_v24  ;;  %4620 = vmatprep.subr.bf16.mxu1 %v8291_v25  ;;  %v4695_v23 = vld [vmem:[#allocation17 + $0x120] sm:$0xff]  ;;  %v7225_v24 = vcombine.low %v4699_v15, %v4703_v16 }
 0x4f9   :  { %v7218_v25 = vcombine.high %v4691_v19, %v4695_v23  ;;  %v4763_v15 = vld [vmem:[#allocation17 + $0x340] sm:$0xff] }
 0x4fa   :  { %v4767_v16 = vld [vmem:[#allocation17 + $0x360] sm:$0xff] }
 0x4fb   :  { %4580 = vmatpush1.bf16.msra.mxu0 %v8286_v27  ;;  %4621 = vmatpush1.bf16.msra.mxu1 %v8289_v29  ;;  %v4683_v27 = vld [vmem:[#allocation17 + $0xc0] sm:$0xff] }
 0x4fc   :  { %4581 = vmatprep.subr.bf16.mxu0 %v8294_v30  ;;  %4622 = vmatprep.subr.bf16.mxu1 %v8297_v31  ;;  %v4687_v29 = vld [vmem:[#allocation17 + $0xe0] sm:$0xff] }
 0x4fd   :  { %v4843_v30 = vld [vmem:[#allocation17 + $0x5c0] sm:$0xff] }
 0x4fe   :  { %v4847_v31 = vld [vmem:[#allocation17 + $0x5e0] sm:$0xff] }
 0x4ff   :  { %4582 = vmatpush1.bf16.msra.mxu0 %v8292_v38  ;;  %4623 = vmatpush1.bf16.msra.mxu1 %v8295_v39  ;;  %v7217_v38 = vcombine.low %v4691_v19, %v4695_v23  ;;  %v7369_v39 = vcombine.low %v4843_v30, %v4847_v31 }
 0x500   :  { %4583 = vmatprep.subr.bf16.mxu0 %v8300_v8  ;;  %4624 = vmatprep.subr.bf16.mxu1 %v8303_v49  ;;  %v8842_v8 = vld [vmem:[#allocation17 + $0x1c8] sm:$0xff]  ;;  %v7210_v49 = vcombine.high %v4683_v27, %v4687_v29 }
 0x503   :  { %4584 = vmatpush1.bf16.msra.mxu0 %v8298_v9  ;;  %4625 = vmatpush1.bf16.msra.mxu1 %v8301_v52  ;;  %v4675_v9 = vld [vmem:[#allocation17 + $0x80] sm:$0xff] }
 0x504   :  { %4585 = vmatprep.subr.bf16.mxu0 %v8306_v41  ;;  %4626 = vmatprep.subr.bf16.mxu1 %v8309_v42  ;;  %v4679_v52 = vld [vmem:[#allocation17 + $0xa0] sm:$0xff] }
 0x505   :  { %v4835_v42 = vld [vmem:[#allocation17 + $0x580] sm:$0xff] }
 0x507   :  { %4586 = vmatpush2.bf16.msra.mxu0 %v8304_v20  ;;  %4627 = vmatpush2.bf16.msra.mxu1 %v8307_v21  ;;  %v4839_v20 = vld [vmem:[#allocation17 + $0x5a0] sm:$0xff]  ;;  %v7209_v21 = vcombine.low %v4683_v27, %v4687_v29 }
 0x508   :  { %4587 = vmatprep.subr.bf16.mxu0 %v8312_v43  ;;  %4628 = vmatprep.subr.bf16.mxu1 %v8315_v44  ;;  %v7361_v43 = vcombine.low %v4835_v42, %v4839_v20  ;;  %v7362_v44 = vcombine.high %v4835_v42, %v4839_v20  ;;  %v4755_v27 = vld [vmem:[#allocation17 + $0x300] sm:$0xff] }
 0x509   :  { %v4759_v29 = vld [vmem:[#allocation17 + $0x320] sm:$0xff] }
 0x50a   :  { %v4907_v42 = vld [vmem:[#allocation17 + $0x7c0] sm:$0xff] }
 0x50b   :  { %4588 = vmatpush2.bf16.msra.mxu0 %v8310_v45  ;;  %4629 = vmatpush2.bf16.msra.mxu1 %v8313_v46  ;;  %v7202_v45 = vcombine.high %v4675_v9, %v4679_v52  ;;  %v4667_v46 = vld [vmem:[#allocation17 + $0x40] sm:$0xff] }
 0x50c   :  { %4589 = vmatprep.subr.bf16.mxu0 %v8318_v47  ;;  %4630 = vmatprep.subr.bf16.mxu1 %v8321_v48  ;;  %v4671_v47 = vld [vmem:[#allocation17 + $0x60] sm:$0xff] }
 0x50d   :  { %v4827_v48 = vld [vmem:[#allocation17 + $0x540] sm:$0xff] }
 0x50e   :  { %v4911_v20 = vld [vmem:[#allocation17 + $0x7e0] sm:$0xff] }
 0x50f   :  { %4590 = vmatpush2.bf16.msra.mxu0 %v8316_v50  ;;  %4631 = vmatpush2.bf16.msra.mxu1 %v8319_v32  ;;  %v4831_v50 = vld [vmem:[#allocation17 + $0x560] sm:$0xff]  ;;  %v7201_v32 = vcombine.low %v4675_v9, %v4679_v52 }
 0x510   :  { %4591 = vmatprep.subr.bf16.mxu0 %v8324_v51  ;;  %4632 = vmatprep.subr.bf16.mxu1 %v8327_v53  ;;  %v7353_v51 = vcombine.low %v4827_v48, %v4831_v50  ;;  %v7354_v53 = vcombine.high %v4827_v48, %v4831_v50  ;;  %v4747_v9 = vld [vmem:[#allocation17 + $0x2c0] sm:$0xff] }
 0x511   :  { %v4751_v52 = vld [vmem:[#allocation17 + $0x2e0] sm:$0xff] }
 0x512   :  { %v4899_v48 = vld [vmem:[#allocation17 + $0x780] sm:$0xff] }
 0x513   :  { %4592 = vmatpush2.bf16.msra.mxu0 %v8322_v34  ;;  %4633 = vmatpush2.bf16.msra.mxu1 %v8325_v54  ;;  %v7194_v34 = vcombine.high %v4667_v46, %v4671_v47  ;;  %v4659_v54 = vld [vmem:[#allocation17] sm:$0xff] }
 0x514   :  { %4593 = vmatprep.subr.bf16.mxu0 %v8330_v55  ;;  %4634 = vmatprep.subr.bf16.mxu1 %v8333_v33  ;;  %v4663_v55 = vld [vmem:[#allocation17 + $0x20] sm:$0xff] }
 0x515   :  { %v4819_v33 = vld [vmem:[#allocation17 + $0x500] sm:$0xff] }
 0x516   :  { %v4903_v50 = vld [vmem:[#allocation17 + $0x7a0] sm:$0xff] }
 0x517   :  { %4594 = vmatpush2.bf16.msra.mxu0 %v8328_v56  ;;  %4635 = vmatpush2.bf16.msra.mxu1 %v8331_v57  ;;  %v4823_v56 = vld [vmem:[#allocation17 + $0x520] sm:$0xff]  ;;  %v7193_v57 = vcombine.low %v4667_v46, %v4671_v47 }
 0x518   :  { %4595 = vmatprep.subr.bf16.mxu0 %v8336_v58  ;;  %4636 = vmatprep.subr.bf16.mxu1 %v8339_v35  ;;  %v7345_v58 = vcombine.low %v4819_v33, %v4823_v56  ;;  %v7346_v35 = vcombine.high %v4819_v33, %v4823_v56  ;;  %v4739_v46 = vld [vmem:[#allocation17 + $0x280] sm:$0xff] }
 0x519   :  { %v4743_v47 = vld [vmem:[#allocation17 + $0x2a0] sm:$0xff] }
 0x51a   :  { %v4891_v33 = vld [vmem:[#allocation17 + $0x740] sm:$0xff] }
 0x51b   :  { %4596 = vmatpush2.bf16.msra.mxu0 %v8334_v59  ;;  %4637 = vmatpush2.bf16.msra.mxu1 %v8337_v60  ;;  %v7186_v59 = vcombine.high %v4659_v54, %v4663_v55  ;;  %v4779_v60 = vld [vmem:[#allocation17 + $0x3c0] sm:$0xff] }
 0x51c   :  { %4597 = vmatprep.subr.bf16.mxu0 %v8342_v61  ;;  %4638 = vmatprep.subr.bf16.mxu1 %v8345_v62  ;;  %v4783_v61 = vld [vmem:[#allocation17 + $0x3e0] sm:$0xff] }
 0x51d   :  { %v4811_v62 = vld [vmem:[#allocation17 + $0x4c0] sm:$0xff]  ;;  %v7306_v4 = vcombine.high %v4779_v60, %v4783_v61  ;;  %v7305_v11 = vcombine.low %v4779_v60, %v4783_v61 }
 0x51e   :  { %v4895_v56 = vld [vmem:[#allocation17 + $0x760] sm:$0xff] }
 0x51f   :  { %4598 = vmatpush2.bf16.msra.mxu0 %v8340_v26  ;;  %4639 = vmatpush2.bf16.msra.mxu1 %v8343_v63  ;;  %v4815_v26 = vld [vmem:[#allocation17 + $0x4e0] sm:$0xff]  ;;  %v7185_v63 = vcombine.low %v4659_v54, %v4663_v55 }
 0x520   :  { %4599 = vmatprep.subr.bf16.mxu0 %v8348_v0  ;;  %4640 = vmatprep.subr.bf16.mxu1 %v8351_v3  ;;  %v7337_v0 = vcombine.low %v4811_v62, %v4815_v26  ;;  %v7338_v3 = vcombine.high %v4811_v62, %v4815_v26  ;;  %v4731_v54 = vld [vmem:[#allocation17 + $0x240] sm:$0xff] }
 0x521   :  { %v4735_v55 = vld [vmem:[#allocation17 + $0x260] sm:$0xff] }
 0x522   :  { %v4723_v60 = vld [vmem:[#allocation17 + $0x200] sm:$0xff] }
 0x523   :  { %4600 = vmatpush2.bf16.msra.mxu0 %v8346_v6  ;;  %4641 = vmatpush2.bf16.msra.mxu1 %v8349_v7  ;;  %v4775_v6 = vld [vmem:[#allocation17 + $0x3a0] sm:$0xff] }
 0x524   :  { %6237 = vmatprep.subr.bf16.mxu0 %v7242_v10  ;;  %v4803_v7 = vld [vmem:[#allocation17 + $0x480] sm:$0xff]  ;;  %v7297_v19 = vcombine.low %v4771_v5, %v4775_v6 }
 0x525   :  { %v4807_v10 = vld [vmem:[#allocation17 + $0x4a0] sm:$0xff] }
 0x526   :  { %4602 = vmatmul.mubr.bf16.vlgmr.msra.gmra.mxu0 %v8834_v1  ;;  %4643 = vmatmul.mubr.bf16.vlgmr.msra.gmra.mxu1 %v8836_v2  ;;  %v7370_v1 = vcombine.high %v4843_v30, %v4847_v31  ;;  %v8844_v2 = vld [vmem:[#allocation17 + $0x1e8] sm:$0xff]  ;;  %v7329_v12 = vcombine.low %v4803_v7, %v4807_v10  ;;  %v4787_v30 = vld [vmem:[#allocation17 + $0x400] sm:$0xff] }
 0x527   :  { %6238 = vmatpush1.bf16.msra.mxu0 %v7241_v13  ;;  %v7243_v41 = vcombine.low %v8842_v8, %v8844_v2  ;;  %v7330_v13 = vcombine.high %v4803_v7, %v4807_v10  ;;  %v4791_v31 = vld [vmem:[#allocation17 + $0x420] sm:$0xff] }
 0x528   :  { %6239 = vmatprep.subr.bf16.mxu0 %v7234_v14  ;;  %6278 = vmatprep.subr.bf16.mxu1 %v7370_v1  ;;  %v7298_v14 = vcombine.high %v4771_v5, %v4775_v6  ;;  %v7314_v1 = vcombine.high %v4787_v30, %v4791_v31  ;;  %v4727_v61 = vld [vmem:[#allocation17 + $0x220] sm:$0xff] }
 0x529   :  { %6279 = vmatpush1.bf16.msra.mxu1 %v7369_v39  ;;  %v7313_v39 = vcombine.low %v4787_v30, %v4791_v31  ;;  %v4883_v62 = vld [vmem:[#allocation17 + $0x700] sm:$0xff]  ;;  %v7249_v7 = vcombine.low %v4723_v60, %v4727_v61  ;;  %v8850_v30 = vld [vmem:[#allocation17 + $0x5c8] sm:$0xff] }
 0x52a   :  { %6280 = vmatprep.subr.bf16.mxu1 %v7362_v44  ;;  %v7434_v44 = vcombine.high %v4907_v42, %v4911_v20  ;;  %v4887_v26 = vld [vmem:[#allocation17 + $0x720] sm:$0xff]  ;;  %v8852_v31 = vld [vmem:[#allocation17 + $0x5e8] sm:$0xff] }
 0x52b   :  { %6240 = vmatpush1.bf16.msra.mxu0 %v7233_v17  ;;  %v4795_v17 = vld [vmem:[#allocation17 + $0x440] sm:$0xff] }
 0x52c   :  { %6241 = vmatprep.subr.bf16.mxu0 %v7226_v18  ;;  %v4799_v18 = vld [vmem:[#allocation17 + $0x460] sm:$0xff] }
 0x52d   :  { %6281 = vmatpush1.bf16.msra.mxu1 %v7361_v43  ;;  %v7321_v23 = vcombine.low %v4795_v17, %v4799_v18  ;;  %v7433_v43 = vcombine.low %v4907_v42, %v4911_v20  ;;  %v4875_v5 = vld [vmem:[#allocation17 + $0x6c0] sm:$0xff] }
 0x52e   :  { %6282 = vmatprep.subr.bf16.mxu1 %v7354_v53  ;;  %v7426_v53 = vcombine.high %v4899_v48, %v4903_v50  ;;  %v4879_v6 = vld [vmem:[#allocation17 + $0x6e0] sm:$0xff] }
 0x52f   :  { %6242 = vmatpush1.bf16.msra.mxu0 %v7225_v24  ;;  %v7322_v24 = vcombine.high %v4795_v17, %v4799_v18  ;;  %v7401_v10 = vcombine.low %v4875_v5, %v4879_v6  ;;  %v4859_v17 = vld [vmem:[#allocation17 + $0x640] sm:$0xff] }
 0x530   :  { %6243 = vmatprep.subr.bf16.mxu0 %v7218_v25  ;;  %v7290_v25 = vcombine.high %v4763_v15, %v4767_v16  ;;  %v4863_v18 = vld [vmem:[#allocation17 + $0x660] sm:$0xff] }
 0x531   :  { %6283 = vmatpush1.bf16.msra.mxu1 %v7353_v51  ;;  %v7425_v51 = vcombine.low %v4899_v48, %v4903_v50 }
 0x532   :  { %6284 = vmatprep.subr.bf16.mxu1 %v7346_v35  ;;  %v7418_v35 = vcombine.high %v4891_v33, %v4895_v56 }
 0x533   :  { %6244 = vmatpush1.bf16.msra.mxu0 %v7217_v38  ;;  %v7289_v38 = vcombine.low %v4763_v15, %v4767_v16 }
 0x534   :  { %6245 = vmatprep.subr.bf16.mxu0 %v7210_v49  ;;  %v7282_v49 = vcombine.high %v4755_v27, %v4759_v29 }
 0x535   :  { %6285 = vmatpush1.bf16.msra.mxu1 %v7345_v58  ;;  %v7417_v58 = vcombine.low %v4891_v33, %v4895_v56 }
 0x536   :  { %6286 = vmatprep.subr.bf16.mxu1 %v7338_v3  ;;  %v7410_v3 = vcombine.high %v4883_v62, %v4887_v26 }
 0x537   :  { %6246 = vmatpush1.bf16.msra.mxu0 %v7209_v21  ;;  %v7281_v21 = vcombine.low %v4755_v27, %v4759_v29 }
 0x538   :  { %6247 = vmatprep.subr.bf16.mxu0 %v7202_v45  ;;  %v7274_v45 = vcombine.high %v4747_v9, %v4751_v52 }
 0x539   :  { %6287 = vmatpush1.bf16.msra.mxu1 %v7337_v0  ;;  %v7409_v0 = vcombine.low %v4883_v62, %v4887_v26 }
 0x53a   :  { %6288 = vmatprep.subr.bf16.mxu1 %v7330_v13  ;;  %v4867_v13 = vld [vmem:[#allocation17 + $0x680] sm:$0xff] }
 0x53b   :  { %6248 = vmatpush1.bf16.msra.mxu0 %v7201_v32  ;;  %v7273_v32 = vcombine.low %v4747_v9, %v4751_v52 }
 0x53c   :  { %6249 = vmatprep.subr.bf16.mxu0 %v7194_v34  ;;  %v7266_v34 = vcombine.high %v4739_v46, %v4743_v47 }
 0x53d   :  { %6289 = vmatpush1.bf16.msra.mxu1 %v7329_v12  ;;  %v7244_v12 = vcombine.high %v8842_v8, %v8844_v2  ;;  %v4680_v8 = vld [vmem:[#allocation17 + $0xa8] sm:$0xff] }
 0x53e   :  { %6290 = vmatprep.subr.bf16.mxu1 %v7322_v24  ;;  %v4851_v24 = vld [vmem:[#allocation17 + $0x600] sm:$0xff] }
 0x53f   :  { %6250 = vmatpush1.bf16.msra.mxu0 %v7193_v57  ;;  %v7265_v57 = vcombine.low %v4739_v46, %v4743_v47 }
 0x540   :  { %6251 = vmatprep.subr.bf16.mxu0 %v7186_v59  ;;  %v7258_v59 = vcombine.high %v4731_v54, %v4735_v55 }
 0x541   :  { %6291 = vmatpush1.bf16.msra.mxu1 %v7321_v23  ;;  %v7385_v23 = vcombine.low %v4859_v17, %v4863_v18 }
 0x542   :  { %6292 = vmatprep.subr.bf16.mxu1 %v7314_v1  ;;  %v8858_v1 = vld [vmem:[#allocation16] sm:$0xf] }
 0x543   :  { %6252 = vmatpush1.bf16.msra.mxu0 %v7185_v63  ;;  %v7257_v63 = vcombine.low %v4731_v54, %v4735_v55  ;;  %v3834_v9 = vrot.slane %v8858_v1, %v8792_v36  ;;  %v4712_v54 = vld [vmem:[#allocation17 + $0x1a8] sm:$0xff] }
 0x544   :  { %6253 = vmatprep.subr.bf16.mxu0 %v7306_v4  ;;  %v7250_v4 = vcombine.high %v4723_v60, %v4727_v61  ;;  %v4692_v60 = vld [vmem:[#allocation17 + $0x108] sm:$0xff] }
 0x545   :  { %6293 = vmatpush1.bf16.msra.mxu1 %v7313_v39  ;;  %v7371_v39 = vcombine.low %v8850_v30, %v8852_v31  ;;  %v4696_v61 = vld [vmem:[#allocation17 + $0x128] sm:$0xff] }
 0x546   :  { %6294 = vmatprep.subr.bf16.mxu1 %v7434_v44  ;;  %v7220_v26 = vcombine.high %v4692_v60, %v4696_v61 }
 0x547   :  { %6254 = vmatpush2.bf16.msra.mxu0 %v7305_v11  ;;  %v7402_v11 = vcombine.high %v4875_v5, %v4879_v6  ;;  %v4676_v5 = vld [vmem:[#allocation17 + $0x88] sm:$0xff] }
 0x548   :  { %6255 = vmatprep.subr.bf16.mxu0 %v7298_v14  ;;  %v4871_v14 = vld [vmem:[#allocation17 + $0x6a0] sm:$0xff]  ;;  %v4668_v6 = vld [vmem:[#allocation17 + $0x48] sm:$0xff] }
 0x549   :  { %6295 = vmatpush2.bf16.msra.mxu1 %v7433_v43  ;;  %v7393_v15 = vcombine.low %v4867_v13, %v4871_v14  ;;  %v7394_v16 = vcombine.high %v4867_v13, %v4871_v14  ;;  %v4664_v13 = vld [vmem:[#allocation17 + $0x28] sm:$0xff] }
 0x54a   :  { %6296 = vmatprep.subr.bf16.mxu1 %v7426_v53 }
 0x54b   :  { %6256 = vmatpush2.bf16.msra.mxu0 %v7297_v19  ;;  %v7386_v19 = vcombine.high %v4859_v17, %v4863_v18  ;;  %v4784_v17 = vld [vmem:[#allocation17 + $0x3e8] sm:$0xff] }
 0x54c   :  { %6257 = vmatprep.subr.bf16.mxu0 %v7290_v25  ;;  %v4855_v25 = vld [vmem:[#allocation17 + $0x620] sm:$0xff] }
 0x54d   :  { %6297 = vmatpush2.bf16.msra.mxu1 %v7425_v51  ;;  %v7378_v27 = vcombine.high %v4851_v24, %v4855_v25  ;;  %v7377_v29 = vcombine.low %v4851_v24, %v4855_v25  ;;  %v4776_v24 = vld [vmem:[#allocation17 + $0x3a8] sm:$0xff] }
 0x54e   :  { %6298 = vmatprep.subr.bf16.mxu1 %v7418_v35 }
 0x54f   :  { %6258 = vmatpush2.bf16.msra.mxu0 %v7289_v38  ;;  %v7372_v38 = vcombine.high %v8850_v30, %v8852_v31 }
 0x550   :  { %6259 = vmatprep.subr.bf16.mxu0 %v7282_v49  ;;  %v3830_v49 = vrot.slane %v8858_v1, %v8789_v28 }
 0x551   :  { %6299 = vmatpush2.bf16.msra.mxu1 %v7417_v58  ;;  %v4704_v58 = vld [vmem:[#allocation17 + $0x168] sm:$0xff] }
 0x552   :  { %6300 = vmatprep.subr.bf16.mxu1 %v7410_v3  ;;  %v7219_v3 = vcombine.low %v4692_v60, %v4696_v61 }
 0x553   :  { %6260 = vmatpush2.bf16.msra.mxu0 %v7281_v21 }
 0x554   :  { %6261 = vmatprep.subr.bf16.mxu0 %v7274_v45 }
 0x555   :  { %6301 = vmatpush2.bf16.msra.mxu1 %v7409_v0  ;;  %v4688_v0 = vld [vmem:[#allocation17 + $0xe8] sm:$0xff] }
 0x556   :  { %6302 = vmatprep.subr.bf16.mxu1 %v7402_v11 }
 0x557   :  { %6262 = vmatpush2.bf16.msra.mxu0 %v7273_v32 }
 0x558   :  { %6263 = vmatprep.subr.bf16.mxu0 %v7266_v34  ;;  %v4708_v34 = vld [vmem:[#allocation17 + $0x188] sm:$0xff] }
 0x559   :  { %6303 = vmatpush2.bf16.msra.mxu1 %v7401_v10  ;;  %v7236_v56 = vcombine.high %v4708_v34, %v4712_v54  ;;  %v7235_v35 = vcombine.low %v4708_v34, %v4712_v54  ;;  %v7203_v10 = vcombine.low %v4676_v5, %v4680_v8  ;;  %v3838_v34 = vrot.slane %v8858_v1, %v8807_v37 }
 0x55a   :  { %6304 = vmatprep.subr.bf16.mxu1 %v7394_v16  ;;  %v4780_v16 = vld [vmem:[#allocation17 + $0x3c8] sm:$0xff] }
 0x55b   :  { %6264 = vmatpush2.bf16.msra.mxu0 %v7265_v57  ;;  %v4700_v57 = vld [vmem:[#allocation17 + $0x148] sm:$0xff]  ;;  %v7307_v25 = vcombine.low %v4780_v16, %v4784_v17 }
 0x55c   :  { %6265 = vmatprep.subr.bf16.mxu0 %v7258_v59  ;;  %v7228_v59 = vcombine.high %v4700_v57, %v4704_v58  ;;  %v7227_v62 = vcombine.low %v4700_v57, %v4704_v58  ;;  %v3842_v57 = vrot.slane %v8858_v1, %v8810_v40  ;;  %v4724_v58 = vld [vmem:[#allocation17 + $0x208] sm:$0xff] }
 0x55d   :  { %6305 = vmatpush2.bf16.msra.mxu1 %v7393_v15 }
 0x55e   :  { %6306 = vmatprep.subr.bf16.mxu1 %v7386_v19  ;;  %v7308_v19 = vcombine.high %v4780_v16, %v4784_v17  ;;  %v4709_v16 = vld [vmem:[#allocation17 + $0x190] sm:$0xff] }
 0x55f   :  { %6266 = vmatpush2.bf16.msra.mxu0 %v7257_v63  ;;  %v4684_v63 = vld [vmem:[#allocation17 + $0xc8] sm:$0xff]  ;;  %v4713_v17 = vld [vmem:[#allocation17 + $0x1b0] sm:$0xff] }
 0x560   :  { %6267 = vmatprep.subr.bf16.mxu0 %v7250_v4  ;;  %v7212_v4 = vcombine.high %v4684_v63, %v4688_v0  ;;  %v7211_v2 = vcombine.low %v4684_v63, %v4688_v0 }
 0x561   :  { %6307 = vmatpush2.bf16.msra.mxu1 %v7385_v23  ;;  %v4772_v23 = vld [vmem:[#allocation17 + $0x388] sm:$0xff] }
 0x562   :  { %6308 = vmatprep.subr.bf16.mxu1 %v7378_v27  ;;  %v7300_v27 = vcombine.high %v4772_v23, %v4776_v24 }
 0x563   :  { %6268 = vmatpush2.bf16.msra.mxu0 %v7249_v7  ;;  %v4672_v7 = vld [vmem:[#allocation17 + $0x68] sm:$0xff] }
 0x564   :  { %6319 = vmatprep.subr.bf16.mxu0 %v7244_v12  ;;  %v7196_v11 = vcombine.high %v4668_v6, %v4672_v7  ;;  %v4660_v12 = vld [vmem:[#allocation17 + $0x8] sm:$0xff]  ;;  %v7195_v14 = vcombine.low %v4668_v6, %v4672_v7 }
 0x565   :  { %6309 = vmatpush2.bf16.msra.mxu1 %v7377_v29  ;;  %v7188_v15 = vcombine.high %v4660_v12, %v4664_v13  ;;  %v7187_v18 = vcombine.low %v4660_v12, %v4664_v13  ;;  %v4764_v29 = vld [vmem:[#allocation17 + $0x348] sm:$0xff] }
 0x566   :  { %6360 = vmatprep.subr.bf16.mxu1 %v7372_v38  ;;  %v4768_v38 = vld [vmem:[#allocation17 + $0x368] sm:$0xff] }
 0x5a6   :  { %v4521_v52 = vpop.f32.mrf.mxu0  ;;  %v4562_v42 = vpop.f32.mrf.mxu1 }
 0x5a7   :  { %v4522_v20 = vadd.f32 %v4521_v52, %v3830_v49  ;;  %v7299_v49 = vcombine.low %v4772_v23, %v4776_v24  ;;  %v4756_v52 = vld [vmem:[#allocation17 + $0x308] sm:$0xff] }
 0x5a8   :  { %v4523_v21 = vpop.f32.mrf.mxu0  ;;  %v4564_v43 = vpop.f32.mrf.mxu1 }
 0x5a9   :  { %v4563_v44 = vadd.f32 %v4562_v42, %v4522_v20  ;;  %v4524_v45 = vadd.f32 %v4523_v21, %v3834_v9  ;;  %v7292_v9 = vcombine.high %v4764_v29, %v4768_v38  ;;  %v4760_v42 = vld [vmem:[#allocation17 + $0x328] sm:$0xff]  ;;  %v7291_v20 = vcombine.low %v4764_v29, %v4768_v38  ;;  %v4701_v38 = vld [vmem:[#allocation17 + $0x150] sm:$0xff] }
 0x5aa   :  { %v4525_v46 = vpop.f32.mrf.mxu0  ;;  %v4566_v47 = vpop.f32.mrf.mxu1  ;;  %v7284_v21 = vcombine.high %v4756_v52, %v4760_v42  ;;  %v4832_v29 = vld [vmem:[#allocation17 + $0x568] sm:$0xff] }
 0x5ab   :  { %v4565_v48 = vadd.f32 %v4564_v43, %v4524_v45  ;;  %v4651_v50 = vmax.f32 %v4563_v44, 0.0  ;;  %v4748_v43 = vld [vmem:[#allocation17 + $0x2c8] sm:$0xff]  ;;  %v7283_v45 = vcombine.low %v4756_v52, %v4760_v42  ;;  %v7237_v52 = vcombine.low %v4709_v16, %v4713_v17 }
 0x5ac   :  { %v4526_v32 = vpop.f32.mrf.mxu0  ;;  %v4567_v51 = vpop.f32.mrf.mxu1  ;;  %v4752_v44 = vld [vmem:[#allocation17 + $0x2e8] sm:$0xff] }
 0x5ad   :  { %v4652_v53 = vmax.f32 %v4565_v48, 0.0  ;;  %v8866_v33 = vpack.c.bf16 %v4651_v50, %v4651_v50  ;;  %v7276_v46 = vcombine.high %v4748_v43, %v4752_v44  ;;  %v4740_v47 = vld [vmem:[#allocation17 + $0x288] sm:$0xff]  ;;  %v7275_v50 = vcombine.low %v4748_v43, %v4752_v44  ;;  %v4693_v44 = vld [vmem:[#allocation17 + $0x110] sm:$0xff] }
 0x5ae   :  { %v4744_v48 = vld [vmem:[#allocation17 + $0x2a8] sm:$0xff] }
 0x5af   :  { %v8864_v55 = vpack.c.bf16 %v4652_v53, %v4652_v53  ;;  %v7268_v32 = vcombine.high %v4740_v47, %v4744_v48  ;;  %v4732_v51 = vld [vmem:[#allocation17 + $0x248] sm:$0xff]  ;;  %v7267_v54 = vcombine.low %v4740_v47, %v4744_v48 }
 0x5b0   :  { %v4736_v53 = vld [vmem:[#allocation17 + $0x268] sm:$0xff] }
 0x5b1   :  { %6269 = vmatprep.mubr.bf16.mxu0 %v8864_v55  ;;  %v4824_v43 = vld [vmem:[#allocation17 + $0x528] sm:$0xff] }
 0x5b2   :  { %6270 = vmatmul.mubr.bf16.vlgmr.msra.gmra.mxu0 %v8866_v33  ;;  %v4812_v47 = vld [vmem:[#allocation17 + $0x4c8] sm:$0xff] }
 0x5b3   :  { %6320 = vmatpush1.bf16.msra.mxu0 %v7243_v41  ;;  %6351 = vmatprep.mubr.bf16.mxu0 %v8864_v55  ;;  %v7204_v41 = vcombine.high %v4676_v5, %v4680_v8  ;;  %v4717_v5 = vld [vmem:[#allocation17 + $0x1d0] sm:$0xff]  ;;  %v4816_v48 = vld [vmem:[#allocation17 + $0x4e8] sm:$0xff] }
 0x5b4   :  { %6321 = vmatprep.subr.bf16.mxu0 %v7236_v56  ;;  %v7260_v56 = vcombine.high %v4732_v51, %v4736_v53  ;;  %v4721_v8 = vld [vmem:[#allocation17 + $0x1f0] sm:$0xff] }
 0x5b5   :  { %v7246_v12 = vcombine.high %v4717_v5, %v4721_v8  ;;  %v7245_v23 = vcombine.low %v4717_v5, %v4721_v8 }
 0x5b7   :  { %6322 = vmatpush1.bf16.msra.mxu0 %v7235_v35  ;;  %v4728_v35 = vld [vmem:[#allocation17 + $0x228] sm:$0xff] }
 0x5b8   :  { %6323 = vmatprep.subr.bf16.mxu0 %v7228_v59  ;;  %v7252_v0 = vcombine.high %v4724_v58, %v4728_v35  ;;  %v7251_v1 = vcombine.low %v4724_v58, %v4728_v35  ;;  %v4677_v58 = vld [vmem:[#allocation17 + $0x90] sm:$0xff] }
 0x5b9   :  { %v4681_v35 = vld [vmem:[#allocation17 + $0xb0] sm:$0xff] }
 0x5ba   :  { %v7205_v5 = vcombine.low %v4677_v58, %v4681_v35 }
 0x5bb   :  { %6324 = vmatpush1.bf16.msra.mxu0 %v7227_v62  ;;  %v7259_v62 = vcombine.low %v4732_v51, %v4736_v53 }
 0x5bc   :  { %6325 = vmatprep.subr.bf16.mxu0 %v7220_v26 }
 0x5bf   :  { %6326 = vmatpush1.bf16.msra.mxu0 %v7219_v3 }
 0x5c0   :  { %6327 = vmatprep.subr.bf16.mxu0 %v7212_v4 }
 0x5c3   :  { %6328 = vmatpush1.bf16.msra.mxu0 %v7211_v2 }
 0x5c4   :  { %6329 = vmatprep.subr.bf16.mxu0 %v7204_v41 }
 0x5c7   :  { %6330 = vmatpush1.bf16.msra.mxu0 %v7203_v10 }
 0x5c8   :  { %6331 = vmatprep.subr.bf16.mxu0 %v7196_v11 }
 0x5cb   :  { %6332 = vmatpush1.bf16.msra.mxu0 %v7195_v14  ;;  %v4836_v14 = vld [vmem:[#allocation17 + $0x588] sm:$0xff] }
 0x5cc   :  { %6333 = vmatprep.subr.bf16.mxu0 %v7188_v15  ;;  %v4840_v15 = vld [vmem:[#allocation17 + $0x5a8] sm:$0xff] }
 0x5cd   :  { %v7364_v24 = vcombine.high %v4836_v14, %v4840_v15 }
 0x5cf   :  { %6334 = vmatpush1.bf16.msra.mxu0 %v7187_v18 }
 0x5d0   :  { %6335 = vmatprep.subr.bf16.mxu0 %v7308_v19 }
 0x5d3   :  { %6336 = vmatpush2.bf16.msra.mxu0 %v7307_v25  ;;  %v7238_v25 = vcombine.high %v4709_v16, %v4713_v17  ;;  %v4781_v16 = vld [vmem:[#allocation17 + $0x3d0] sm:$0xff] }
 0x5d4   :  { %6337 = vmatprep.subr.bf16.mxu0 %v7300_v27  ;;  %v4828_v27 = vld [vmem:[#allocation17 + $0x548] sm:$0xff]  ;;  %v4785_v17 = vld [vmem:[#allocation17 + $0x3f0] sm:$0xff] }
 0x5d5   :  { %v7356_v42 = vcombine.high %v4828_v27, %v4832_v29 }
 0x5d7   :  { %6338 = vmatpush2.bf16.msra.mxu0 %v7299_v49  ;;  %v4705_v49 = vld [vmem:[#allocation17 + $0x170] sm:$0xff] }
 0x5d8   :  { %6339 = vmatprep.subr.bf16.mxu0 %v7292_v9  ;;  %v7363_v9 = vcombine.low %v4836_v14, %v4840_v15  ;;  %v7229_v30 = vcombine.low %v4701_v38, %v4705_v49  ;;  %v4908_v14 = vld [vmem:[#allocation17 + $0x7c8] sm:$0xff] }
 0x5d9   :  { %v4912_v15 = vld [vmem:[#allocation17 + $0x7e8] sm:$0xff] }
 0x5db   :  { %6340 = vmatpush2.bf16.msra.mxu0 %v7291_v20  ;;  %v7230_v20 = vcombine.high %v4701_v38, %v4705_v49  ;;  %v4904_v38 = vld [vmem:[#allocation17 + $0x7a8] sm:$0xff]  ;;  %v4773_v49 = vld [vmem:[#allocation17 + $0x390] sm:$0xff] }
 0x5dc   :  { %6341 = vmatprep.subr.bf16.mxu0 %v7284_v21  ;;  %v4820_v21 = vld [vmem:[#allocation17 + $0x508] sm:$0xff] }
 0x5dd   :  { %v7348_v31 = vcombine.high %v4820_v21, %v4824_v43  ;;  %v7347_v51 = vcombine.low %v4820_v21, %v4824_v43  ;;  %v4892_v43 = vld [vmem:[#allocation17 + $0x748] sm:$0xff] }
 0x5df   :  { %6342 = vmatpush2.bf16.msra.mxu0 %v7283_v45  ;;  %v4697_v45 = vld [vmem:[#allocation17 + $0x130] sm:$0xff] }
 0x5e0   :  { %6343 = vmatprep.subr.bf16.mxu0 %v7276_v46  ;;  %v7355_v46 = vcombine.low %v4828_v27, %v4832_v29  ;;  %v7221_v53 = vcombine.low %v4693_v44, %v4697_v45  ;;  %v7310_v27 = vcombine.high %v4781_v16, %v4785_v17  ;;  %v4900_v29 = vld [vmem:[#allocation17 + $0x788] sm:$0xff] }
 0x5e3   :  { %6344 = vmatpush2.bf16.msra.mxu0 %v7275_v50  ;;  %v4685_v50 = vld [vmem:[#allocation17 + $0xd0] sm:$0xff] }
 0x5e4   :  { %6345 = vmatprep.subr.bf16.mxu0 %v7268_v32  ;;  %v4689_v32 = vld [vmem:[#allocation17 + $0xf0] sm:$0xff] }
 0x5e6   :  { %v4603_v59 = vpop.f32.mrf.mxu0  ;;  %v4644_v60 = vpop.f32.mrf.mxu1 }
 0x5e7   :  { %v4604_v61 = vadd.f32 %v4603_v59, %v3838_v34  ;;  %6346 = vmatpush2.bf16.msra.mxu0 %v7267_v54  ;;  %v7340_v34 = vcombine.high %v4812_v47, %v4816_v48  ;;  %v7214_v54 = vcombine.high %v4685_v50, %v4689_v32  ;;  %v7339_v59 = vcombine.low %v4812_v47, %v4816_v48  ;;  %v4884_v48 = vld [vmem:[#allocation17 + $0x708] sm:$0xff] }
 0x5e8   :  { %v4605_v26 = vpop.f32.mrf.mxu0  ;;  %v4646_v63 = vpop.f32.mrf.mxu1  ;;  %6347 = vmatprep.subr.bf16.mxu0 %v7260_v56  ;;  %v4804_v56 = vld [vmem:[#allocation17 + $0x488] sm:$0xff] }
 0x5e9   :  { %v4645_v3 = vadd.f32 %v4644_v60, %v4604_v61  ;;  %v4606_v4 = vadd.f32 %v4605_v26, %v3842_v57  ;;  %v4808_v57 = vld [vmem:[#allocation17 + $0x4a8] sm:$0xff]  ;;  %v7213_v60 = vcombine.low %v4685_v50, %v4689_v32  ;;  %v4757_v32 = vld [vmem:[#allocation17 + $0x310] sm:$0xff] }
 0x5ea   :  { %v4607_v2 = vpop.f32.mrf.mxu0  ;;  %v4648_v41 = vpop.f32.mrf.mxu1  ;;  %v7332_v61 = vcombine.high %v4804_v56, %v4808_v57  ;;  %v4796_v26 = vld [vmem:[#allocation17 + $0x448] sm:$0xff] }
 0x5eb   :  { %v4647_v6 = vadd.f32 %v4646_v63, %v4606_v4  ;;  %6348 = vmatpush2.bf16.msra.mxu0 %v7259_v62  ;;  %v4653_v7 = vmax.f32 %v4645_v3, 0.0  ;;  %v7206_v62 = vcombine.high %v4677_v58, %v4681_v35  ;;  %v4800_v63 = vld [vmem:[#allocation17 + $0x468] sm:$0xff]  ;;  %v4673_v3 = vld [vmem:[#allocation17 + $0x70] sm:$0xff]  ;;  %v7331_v4 = vcombine.low %v4804_v56, %v4808_v57 }
 0x5ec   :  { %v4608_v10 = vpop.f32.mrf.mxu0  ;;  %v4649_v11 = vpop.f32.mrf.mxu1  ;;  %6349 = vmatprep.subr.bf16.mxu0 %v7252_v0  ;;  %v4669_v0 = vld [vmem:[#allocation17 + $0x50] sm:$0xff]  ;;  %v7324_v8 = vcombine.high %v4796_v26, %v4800_v63  ;;  %v4788_v41 = vld [vmem:[#allocation17 + $0x408] sm:$0xff] }
 0x5ed   :  { %v4654_v13 = vmax.f32 %v4647_v6, 0.0  ;;  %v8880_v19 = vpack.c.bf16 %v4653_v7, %v4653_v7  ;;  %v7198_v2 = vcombine.high %v4669_v0, %v4673_v3  ;;  %v4792_v6 = vld [vmem:[#allocation17 + $0x428] sm:$0xff]  ;;  %v4665_v7 = vld [vmem:[#allocation17 + $0x30] sm:$0xff]  ;;  %v7323_v10 = vcombine.low %v4796_v26, %v4800_v63 }
 0x5ee   :  { %v7197_v11 = vcombine.low %v4669_v0, %v4673_v3  ;;  %v4888_v50 = vld [vmem:[#allocation17 + $0x728] sm:$0xff]  ;;  %v4749_v35 = vld [vmem:[#allocation17 + $0x2d0] sm:$0xff] }
 0x5ef   :  { %v8878_v18 = vpack.c.bf16 %v4654_v13, %v4654_v13  ;;  %6350 = vmatpush2.bf16.msra.mxu0 %v7251_v1  ;;  %v4661_v1 = vld [vmem:[#allocation17 + $0x10] sm:$0xff]  ;;  %v4876_v57 = vld [vmem:[#allocation17 + $0x6c8] sm:$0xff] }
 0x5f0   :  { %6401 = vmatprep.subr.bf16.mxu0 %v7246_v12  ;;  %v7316_v12 = vcombine.high %v4788_v41, %v4792_v6  ;;  %v7190_v13 = vcombine.high %v4661_v1, %v4665_v7  ;;  %v4880_v58 = vld [vmem:[#allocation17 + $0x6e8] sm:$0xff]  ;;  %v4741_v3 = vld [vmem:[#allocation17 + $0x290] sm:$0xff] }
 0x5f1   :  { %6310 = vmatprep.mubr.bf16.mxu1 %v8878_v18  ;;  %v4868_v63 = vld [vmem:[#allocation17 + $0x688] sm:$0xff] }
 0x5f2   :  { %6311 = vmatmul.mubr.bf16.vlgmr.msra.gmra.mxu1 %v8880_v19  ;;  %6352 = vmatmul.mubr.bf16.vlgmr.msra.gmra.mxu0 %v8866_v33  ;;  %v4872_v0 = vld [vmem:[#allocation17 + $0x6a8] sm:$0xff] }
 0x5f3   :  { %6361 = vmatpush1.bf16.msra.mxu1 %v7371_v39  ;;  %6392 = vmatprep.mubr.bf16.mxu1 %v8878_v18  ;;  %v7222_v39 = vcombine.high %v4693_v44, %v4697_v45  ;;  %v4896_v44 = vld [vmem:[#allocation17 + $0x768] sm:$0xff]  ;;  %v4765_v45 = vld [vmem:[#allocation17 + $0x350] sm:$0xff] }
 0x5f4   :  { %6402 = vmatpush1.bf16.msra.mxu0 %v7245_v23  ;;  %6433 = vmatprep.mubr.bf16.mxu0 %v8864_v55  ;;  %v7315_v23 = vcombine.low %v4788_v41, %v4792_v6  ;;  %v4860_v6 = vld [vmem:[#allocation17 + $0x648] sm:$0xff] }
 0x5f5   :  { %6362 = vmatprep.subr.bf16.mxu1 %v7364_v24  ;;  %6403 = vmatprep.subr.bf16.mxu0 %v7238_v25  ;;  %v7189_v24 = vcombine.low %v4661_v1, %v4665_v7  ;;  %v7436_v25 = vcombine.high %v4908_v14, %v4912_v15  ;;  %v4864_v1 = vld [vmem:[#allocation17 + $0x668] sm:$0xff]  ;;  %v4733_v7 = vld [vmem:[#allocation17 + $0x250] sm:$0xff] }
 0x5f7   :  { %6363 = vmatpush1.bf16.msra.mxu1 %v7363_v9  ;;  %v4777_v9 = vld [vmem:[#allocation17 + $0x3b0] sm:$0xff] }
 0x5f8   :  { %6404 = vmatpush1.bf16.msra.mxu0 %v7237_v52  ;;  %6364 = vmatprep.subr.bf16.mxu1 %v7356_v42  ;;  %v7435_v52 = vcombine.low %v4908_v14, %v4912_v15  ;;  %v7309_v42 = vcombine.low %v4781_v16, %v4785_v17  ;;  %v7302_v21 = vcombine.high %v4773_v49, %v4777_v9  ;;  %v4852_v15 = vld [vmem:[#allocation17 + $0x608] sm:$0xff]  ;;  %v4725_v17 = vld [vmem:[#allocation17 + $0x210] sm:$0xff] }
 0x5f9   :  { %6405 = vmatprep.subr.bf16.mxu0 %v7230_v20  ;;  %v7428_v20 = vcombine.high %v4900_v29, %v4904_v38  ;;  %v4856_v16 = vld [vmem:[#allocation17 + $0x628] sm:$0xff] }
 0x5fb   :  { %6365 = vmatpush1.bf16.msra.mxu1 %v7355_v46  ;;  %v4769_v46 = vld [vmem:[#allocation17 + $0x370] sm:$0xff] }
 0x5fc   :  { %6406 = vmatpush1.bf16.msra.mxu0 %v7229_v30  ;;  %6366 = vmatprep.subr.bf16.mxu1 %v7348_v31  ;;  %v7427_v30 = vcombine.low %v4900_v29, %v4904_v38  ;;  %v7301_v31 = vcombine.low %v4773_v49, %v4777_v9  ;;  %v7294_v47 = vcombine.high %v4765_v45, %v4769_v46  ;;  %v4845_v38 = vld [vmem:[#allocation17 + $0x5d0] sm:$0xff]  ;;  %v4718_v9 = vld [vmem:[#allocation17 + $0x1d8] sm:$0xff] }
 0x5fd   :  { %6407 = vmatprep.subr.bf16.mxu0 %v7222_v39  ;;  %v7420_v39 = vcombine.high %v4892_v43, %v4896_v44  ;;  %v4849_v49 = vld [vmem:[#allocation17 + $0x5f0] sm:$0xff] }
 0x5ff   :  { %6367 = vmatpush1.bf16.msra.mxu1 %v7347_v51  ;;  %v4761_v51 = vld [vmem:[#allocation17 + $0x330] sm:$0xff] }
 0x600   :  { %6408 = vmatpush1.bf16.msra.mxu0 %v7221_v53  ;;  %6368 = vmatprep.subr.bf16.mxu1 %v7340_v34  ;;  %v7419_v53 = vcombine.low %v4892_v43, %v4896_v44  ;;  %v7293_v34 = vcombine.low %v4765_v45, %v4769_v46  ;;  %v7286_v56 = vcombine.high %v4757_v32, %v4761_v51  ;;  %v4837_v44 = vld [vmem:[#allocation17 + $0x590] sm:$0xff] }
 0x601   :  { %6409 = vmatprep.subr.bf16.mxu0 %v7214_v54  ;;  %v7412_v54 = vcombine.high %v4884_v48, %v4888_v50  ;;  %v4841_v45 = vld [vmem:[#allocation17 + $0x5b0] sm:$0xff]  ;;  %v7373_v46 = vcombine.low %v4845_v38, %v4849_v49 }
 0x603   :  { %6369 = vmatpush1.bf16.msra.mxu1 %v7339_v59  ;;  %v4753_v59 = vld [vmem:[#allocation17 + $0x2f0] sm:$0xff] }
 0x604   :  { %6410 = vmatpush1.bf16.msra.mxu0 %v7213_v60  ;;  %6370 = vmatprep.subr.bf16.mxu1 %v7332_v61  ;;  %v7411_v60 = vcombine.low %v4884_v48, %v4888_v50  ;;  %v7285_v61 = vcombine.low %v4757_v32, %v4761_v51  ;;  %v7278_v26 = vcombine.high %v4749_v35, %v4753_v59  ;;  %v4829_v48 = vld [vmem:[#allocation17 + $0x550] sm:$0xff]  ;;  %v4702_v51 = vld [vmem:[#allocation17 + $0x158] sm:$0xff] }
 0x605   :  { %6411 = vmatprep.subr.bf16.mxu0 %v7206_v62  ;;  %v7404_v62 = vcombine.high %v4876_v57, %v4880_v58  ;;  %v4833_v50 = vld [vmem:[#allocation17 + $0x570] sm:$0xff] }
 0x607   :  { %6371 = vmatpush1.bf16.msra.mxu1 %v7331_v4  ;;  %v4745_v4 = vld [vmem:[#allocation17 + $0x2b0] sm:$0xff] }
 0x608   :  { %6412 = vmatpush1.bf16.msra.mxu0 %v7205_v5  ;;  %6372 = vmatprep.subr.bf16.mxu1 %v7324_v8  ;;  %v7403_v5 = vcombine.low %v4876_v57, %v4880_v58  ;;  %v7277_v8 = vcombine.low %v4749_v35, %v4753_v59  ;;  %v7270_v41 = vcombine.high %v4741_v3, %v4745_v4  ;;  %v4821_v58 = vld [vmem:[#allocation17 + $0x510] sm:$0xff]  ;;  %v4694_v59 = vld [vmem:[#allocation17 + $0x118] sm:$0xff] }
 0x609   :  { %6413 = vmatprep.subr.bf16.mxu0 %v7198_v2  ;;  %v7396_v2 = vcombine.high %v4868_v63, %v4872_v0  ;;  %v4825_v35 = vld [vmem:[#allocation17 + $0x530] sm:$0xff] }
 0x60b   :  { %6373 = vmatpush1.bf16.msra.mxu1 %v7323_v10  ;;  %v4737_v10 = vld [vmem:[#allocation17 + $0x270] sm:$0xff] }
 0x60c   :  { %6414 = vmatpush1.bf16.msra.mxu0 %v7197_v11  ;;  %6374 = vmatprep.subr.bf16.mxu1 %v7316_v12  ;;  %v7395_v11 = vcombine.low %v4868_v63, %v4872_v0  ;;  %v7269_v12 = vcombine.low %v4741_v3, %v4745_v4  ;;  %v7262_v14 = vcombine.high %v4733_v7, %v4737_v10  ;;  %v4813_v0 = vld [vmem:[#allocation17 + $0x4d0] sm:$0xff]  ;;  %v4686_v4 = vld [vmem:[#allocation17 + $0xd8] sm:$0xff] }
 0x60d   :  { %6415 = vmatprep.subr.bf16.mxu0 %v7190_v13  ;;  %v7388_v13 = vcombine.high %v4860_v6, %v4864_v1  ;;  %v4817_v3 = vld [vmem:[#allocation17 + $0x4f0] sm:$0xff] }
 0x60f   :  { %6375 = vmatpush1.bf16.msra.mxu1 %v7315_v23  ;;  %v4729_v23 = vld [vmem:[#allocation17 + $0x230] sm:$0xff] }
 0x610   :  { %6416 = vmatpush1.bf16.msra.mxu0 %v7189_v24  ;;  %6376 = vmatprep.subr.bf16.mxu1 %v7436_v25  ;;  %v7387_v24 = vcombine.low %v4860_v6, %v4864_v1  ;;  %v7261_v25 = vcombine.low %v4733_v7, %v4737_v10  ;;  %v7254_v29 = vcombine.high %v4725_v17, %v4729_v23  ;;  %v4805_v6 = vld [vmem:[#allocation17 + $0x490] sm:$0xff]  ;;  %v4678_v7 = vld [vmem:[#allocation17 + $0x98] sm:$0xff] }
 0x611   :  { %6417 = vmatprep.subr.bf16.mxu0 %v7310_v27  ;;  %v7380_v27 = vcombine.high %v4852_v15, %v4856_v16  ;;  %v4809_v1 = vld [vmem:[#allocation17 + $0x4b0] sm:$0xff]  ;;  %v4682_v10 = vld [vmem:[#allocation17 + $0xb8] sm:$0xff] }
 0x613   :  { %6377 = vmatpush2.bf16.msra.mxu1 %v7435_v52  ;;  %v4722_v52 = vld [vmem:[#allocation17 + $0x1f8] sm:$0xff] }
 0x614   :  { %6418 = vmatpush2.bf16.msra.mxu0 %v7309_v42  ;;  %6378 = vmatprep.subr.bf16.mxu1 %v7428_v20  ;;  %v7379_v42 = vcombine.low %v4852_v15, %v4856_v16  ;;  %v7253_v20 = vcombine.low %v4725_v17, %v4729_v23  ;;  %v7248_v43 = vcombine.high %v4718_v9, %v4722_v52  ;;  %v4797_v15 = vld [vmem:[#allocation17 + $0x450] sm:$0xff]  ;;  %v4670_v17 = vld [vmem:[#allocation17 + $0x58] sm:$0xff] }
 0x615   :  { %6419 = vmatprep.subr.bf16.mxu0 %v7302_v21  ;;  %v7374_v21 = vcombine.high %v4845_v38, %v4849_v49  ;;  %v4801_v16 = vld [vmem:[#allocation17 + $0x470] sm:$0xff]  ;;  %v4674_v23 = vld [vmem:[#allocation17 + $0x78] sm:$0xff] }
 0x616   :  { %v4789_v38 = vld [vmem:[#allocation17 + $0x410] sm:$0xff] }
 0x617   :  { %6379 = vmatpush2.bf16.msra.mxu1 %v7427_v30  ;;  %v4710_v30 = vld [vmem:[#allocation17 + $0x198] sm:$0xff]  ;;  %v4793_v49 = vld [vmem:[#allocation17 + $0x430] sm:$0xff] }
 0x618   :  { %6420 = vmatpush2.bf16.msra.mxu0 %v7301_v31  ;;  %6380 = vmatprep.subr.bf16.mxu1 %v7420_v39  ;;  %v4714_v31 = vld [vmem:[#allocation17 + $0x1b8] sm:$0xff]  ;;  %v7247_v39 = vcombine.low %v4718_v9, %v4722_v52 }
 0x619   :  { %6421 = vmatprep.subr.bf16.mxu0 %v7294_v47  ;;  %v7366_v47 = vcombine.high %v4837_v44, %v4841_v45  ;;  %v7240_v32 = vcombine.high %v4710_v30, %v4714_v31  ;;  %v4662_v9 = vld [vmem:[#allocation17 + $0x18] sm:$0xff] }
 0x61a   :  { %v4666_v52 = vld [vmem:[#allocation17 + $0x38] sm:$0xff] }
 0x61b   :  { %6381 = vmatpush2.bf16.msra.mxu1 %v7419_v53  ;;  %v4706_v53 = vld [vmem:[#allocation17 + $0x178] sm:$0xff] }
 0x61c   :  { %6422 = vmatpush2.bf16.msra.mxu0 %v7293_v34  ;;  %6382 = vmatprep.subr.bf16.mxu1 %v7412_v54  ;;  %v7365_v34 = vcombine.low %v4837_v44, %v4841_v45  ;;  %v7239_v54 = vcombine.low %v4710_v30, %v4714_v31  ;;  %v7232_v57 = vcombine.high %v4702_v51, %v4706_v53  ;;  %v4909_v44 = vld [vmem:[#allocation17 + $0x7d0] sm:$0xff]  ;;  %v4786_v30 = vld [vmem:[#allocation17 + $0x3f8] sm:$0xff] }
 0x61d   :  { %6423 = vmatprep.subr.bf16.mxu0 %v7286_v56  ;;  %v7358_v56 = vcombine.high %v4829_v48, %v4833_v50  ;;  %v4913_v45 = vld [vmem:[#allocation17 + $0x7f0] sm:$0xff]  ;;  %v7317_v31 = vcombine.low %v4789_v38, %v4793_v49 }
 0x61f   :  { %6383 = vmatpush2.bf16.msra.mxu1 %v7411_v60  ;;  %v4698_v60 = vld [vmem:[#allocation17 + $0x138] sm:$0xff] }
 0x620   :  { %6424 = vmatpush2.bf16.msra.mxu0 %v7285_v61  ;;  %6384 = vmatprep.subr.bf16.mxu1 %v7404_v62  ;;  %v7357_v61 = vcombine.low %v4829_v48, %v4833_v50  ;;  %v7231_v62 = vcombine.low %v4702_v51, %v4706_v53  ;;  %v7224_v63 = vcombine.high %v4694_v59, %v4698_v60  ;;  %v4901_v50 = vld [vmem:[#allocation17 + $0x790] sm:$0xff]  ;;  %v4774_v51 = vld [vmem:[#allocation17 + $0x398] sm:$0xff] }
 0x621   :  { %6425 = vmatprep.subr.bf16.mxu0 %v7278_v26  ;;  %v7350_v26 = vcombine.high %v4821_v58, %v4825_v35  ;;  %v4778_v53 = vld [vmem:[#allocation17 + $0x3b8] sm:$0xff] }
 0x623   :  { %6385 = vmatpush2.bf16.msra.mxu1 %v7403_v5  ;;  %v4690_v5 = vld [vmem:[#allocation17 + $0xf8] sm:$0xff] }
 0x624   :  { %6426 = vmatpush2.bf16.msra.mxu0 %v7277_v8  ;;  %6386 = vmatprep.subr.bf16.mxu1 %v7396_v2  ;;  %v7223_v8 = vcombine.low %v4694_v59, %v4698_v60  ;;  %v7342_v2 = vcombine.high %v4813_v0, %v4817_v3  ;;  %v4766_v59 = vld [vmem:[#allocation17 + $0x358] sm:$0xff] }
 0x625   :  { %6427 = vmatprep.subr.bf16.mxu0 %v7270_v41  ;;  %v7216_v41 = vcombine.high %v4686_v4, %v4690_v5  ;;  %v4770_v60 = vld [vmem:[#allocation17 + $0x378] sm:$0xff] }
 0x627   :  { %6387 = vmatpush2.bf16.msra.mxu1 %v7395_v11  ;;  %v7341_v11 = vcombine.low %v4813_v0, %v4817_v3  ;;  %v4885_v0 = vld [vmem:[#allocation17 + $0x710] sm:$0xff] }
 0x628   :  { %6428 = vmatpush2.bf16.msra.mxu0 %v7269_v12  ;;  %6388 = vmatprep.subr.bf16.mxu1 %v7388_v13  ;;  %v7215_v12 = vcombine.low %v4686_v4, %v4690_v5  ;;  %v7334_v13 = vcombine.high %v4805_v6, %v4809_v1  ;;  %v4889_v3 = vld [vmem:[#allocation17 + $0x730] sm:$0xff]  ;;  %v4758_v4 = vld [vmem:[#allocation17 + $0x318] sm:$0xff] }
 0x629   :  { %6429 = vmatprep.subr.bf16.mxu0 %v7262_v14  ;;  %v7208_v14 = vcombine.high %v4678_v7, %v4682_v10  ;;  %v4762_v5 = vld [vmem:[#allocation17 + $0x338] sm:$0xff] }
 0x62b   :  { %6389 = vmatpush2.bf16.msra.mxu1 %v7387_v24  ;;  %v7333_v24 = vcombine.low %v4805_v6, %v4809_v1  ;;  %v4877_v6 = vld [vmem:[#allocation17 + $0x6d0] sm:$0xff] }
 0x62c   :  { %6430 = vmatpush2.bf16.msra.mxu0 %v7261_v25  ;;  %6390 = vmatprep.subr.bf16.mxu1 %v7380_v27  ;;  %v7207_v25 = vcombine.low %v4678_v7, %v4682_v10  ;;  %v7326_v27 = vcombine.high %v4797_v15, %v4801_v16  ;;  %v4881_v1 = vld [vmem:[#allocation17 + $0x6f0] sm:$0xff]  ;;  %v4750_v7 = vld [vmem:[#allocation17 + $0x2d8] sm:$0xff] }
 0x62d   :  { %6431 = vmatprep.subr.bf16.mxu0 %v7254_v29  ;;  %v7200_v29 = vcombine.high %v4670_v17, %v4674_v23  ;;  %v4754_v10 = vld [vmem:[#allocation17 + $0x2f8] sm:$0xff] }
 0x62f   :  { %6391 = vmatpush2.bf16.msra.mxu1 %v7379_v42  ;;  %v7325_v42 = vcombine.low %v4797_v15, %v4801_v16  ;;  %v4869_v15 = vld [vmem:[#allocation17 + $0x690] sm:$0xff] }
 0x630   :  { %6432 = vmatpush2.bf16.msra.mxu0 %v7253_v20  ;;  %6442 = vmatprep.subr.bf16.mxu1 %v7374_v21  ;;  %v7199_v20 = vcombine.low %v4670_v17, %v4674_v23  ;;  %v7318_v21 = vcombine.high %v4789_v38, %v4793_v49  ;;  %v4873_v16 = vld [vmem:[#allocation17 + $0x6b0] sm:$0xff]  ;;  %v4742_v17 = vld [vmem:[#allocation17 + $0x298] sm:$0xff] }
 0x631   :  { %6483 = vmatprep.subr.bf16.mxu0 %v7248_v43  ;;  %v7192_v43 = vcombine.high %v4662_v9, %v4666_v52  ;;  %v4746_v23 = vld [vmem:[#allocation17 + $0x2b8] sm:$0xff]  ;;  %v4861_v38 = vld [vmem:[#allocation17 + $0x650] sm:$0xff] }
 0x632   :  { %6393 = vmatmul.mubr.bf16.vlgmr.msra.gmra.mxu1 %v8880_v19  ;;  %v4865_v49 = vld [vmem:[#allocation17 + $0x670] sm:$0xff] }
 0x633   :  { %6434 = vmatmul.mubr.bf16.vlgmr.msra.gmra.mxu0 %v8866_v33  ;;  %6443 = vmatpush1.bf16.msra.mxu1 %v7373_v46  ;;  %v4782_v46 = vld [vmem:[#allocation17 + $0x3d8] sm:$0xff] }
 0x634   :  { %6474 = vmatprep.mubr.bf16.mxu1 %v8878_v18  ;;  %6484 = vmatpush1.bf16.msra.mxu0 %v7247_v39  ;;  %v7191_v39 = vcombine.low %v4662_v9, %v4666_v52  ;;  %v7312_v48 = vcombine.high %v4782_v46, %v4786_v30  ;;  %v4734_v9 = vld [vmem:[#allocation17 + $0x258] sm:$0xff] }
 0x635   :  { %6515 = vmatprep.mubr.bf16.mxu0 %v8864_v55  ;;  %6444 = vmatprep.subr.bf16.mxu1 %v7366_v47  ;;  %v7349_v55 = vcombine.low %v4821_v58, %v4825_v35  ;;  %v7438_v47 = vcombine.high %v4909_v44, %v4913_v45  ;;  %v4893_v58 = vld [vmem:[#allocation17 + $0x750] sm:$0xff]  ;;  %v4738_v52 = vld [vmem:[#allocation17 + $0x278] sm:$0xff] }
 0x636   :  { %6485 = vmatprep.subr.bf16.mxu0 %v7240_v32  ;;  %v4905_v32 = vld [vmem:[#allocation17 + $0x7b0] sm:$0xff] }
 0x637   :  { %6445 = vmatpush1.bf16.msra.mxu1 %v7365_v34  ;;  %v7437_v34 = vcombine.low %v4909_v44, %v4913_v45  ;;  %v4897_v35 = vld [vmem:[#allocation17 + $0x770] sm:$0xff] }
 0x638   :  { %6486 = vmatpush1.bf16.msra.mxu0 %v7239_v54  ;;  %6446 = vmatprep.subr.bf16.mxu1 %v7358_v56  ;;  %v7311_v54 = vcombine.low %v4782_v46, %v4786_v30  ;;  %v7430_v56 = vcombine.high %v4901_v50, %v4905_v32  ;;  %v4853_v44 = vld [vmem:[#allocation17 + $0x610] sm:$0xff]  ;;  %v4726_v46 = vld [vmem:[#allocation17 + $0x218] sm:$0xff] }
 0x639   :  { %6487 = vmatprep.subr.bf16.mxu0 %v7232_v57  ;;  %v7304_v57 = vcombine.high %v4774_v51, %v4778_v53  ;;  %v4857_v45 = vld [vmem:[#allocation17 + $0x630] sm:$0xff]  ;;  %v4730_v30 = vld [vmem:[#allocation17 + $0x238] sm:$0xff] }
 0x63b   :  { %6447 = vmatpush1.bf16.msra.mxu1 %v7357_v61  ;;  %v7429_v61 = vcombine.low %v4901_v50, %v4905_v32  ;;  %v4846_v50 = vld [vmem:[#allocation17 + $0x5d8] sm:$0xff] }
 0x63c   :  { %6488 = vmatpush1.bf16.msra.mxu0 %v7231_v62  ;;  %6448 = vmatprep.subr.bf16.mxu1 %v7350_v26  ;;  %v7303_v62 = vcombine.low %v4774_v51, %v4778_v53  ;;  %v7422_v26 = vcombine.high %v4893_v58, %v4897_v35  ;;  %v4850_v32 = vld [vmem:[#allocation17 + $0x5f8] sm:$0xff]  ;;  %v7381_v51 = vcombine.low %v4853_v44, %v4857_v45 }
 0x63d   :  { %6489 = vmatprep.subr.bf16.mxu0 %v7224_v63  ;;  %v7296_v63 = vcombine.high %v4766_v59, %v4770_v60  ;;  %v7255_v53 = vcombine.low %v4726_v46, %v4730_v30 }
 0x63f   :  { %6449 = vmatpush1.bf16.msra.mxu1 %v7349_v55  ;;  %v7421_v55 = vcombine.low %v4893_v58, %v4897_v35  ;;  %v4830_v35 = vld [vmem:[#allocation17 + $0x558] sm:$0xff] }
 0x640   :  { %6490 = vmatpush1.bf16.msra.mxu0 %v7223_v8  ;;  %6450 = vmatprep.subr.bf16.mxu1 %v7342_v2  ;;  %v7295_v8 = vcombine.low %v4766_v59, %v4770_v60  ;;  %v7414_v2 = vcombine.high %v4885_v0, %v4889_v3  ;;  %v4834_v59 = vld [vmem:[#allocation17 + $0x578] sm:$0xff] }
 0x641   :  { %6491 = vmatprep.subr.bf16.mxu0 %v7216_v41  ;;  %v7288_v41 = vcombine.high %v4758_v4, %v4762_v5 }
 0x643   :  { %6451 = vmatpush1.bf16.msra.mxu1 %v7341_v11  ;;  %v7413_v11 = vcombine.low %v4885_v0, %v4889_v3  ;;  %v4826_v0 = vld [vmem:[#allocation17 + $0x538] sm:$0xff] }
 0x644   :  { %6492 = vmatpush1.bf16.msra.mxu0 %v7215_v12  ;;  %6452 = vmatprep.subr.bf16.mxu1 %v7334_v13  ;;  %v7287_v12 = vcombine.low %v4758_v4, %v4762_v5  ;;  %v7406_v13 = vcombine.high %v4877_v6, %v4881_v1  ;;  %v7359_v4 = vcombine.low %v4830_v35, %v4834_v59 }
 0x645   :  { %6493 = vmatprep.subr.bf16.mxu0 %v7208_v14  ;;  %v7280_v14 = vcombine.high %v4750_v7, %v4754_v10 }
 0x647   :  { %6453 = vmatpush1.bf16.msra.mxu1 %v7333_v24  ;;  %v7405_v24 = vcombine.low %v4877_v6, %v4881_v1  ;;  %v4806_v6 = vld [vmem:[#allocation17 + $0x498] sm:$0xff] }
 0x648   :  { %6494 = vmatpush1.bf16.msra.mxu0 %v7207_v25  ;;  %6454 = vmatprep.subr.bf16.mxu1 %v7326_v27  ;;  %v7279_v25 = vcombine.low %v4750_v7, %v4754_v10  ;;  %v7398_v27 = vcombine.high %v4869_v15, %v4873_v16  ;;  %v4798_v10 = vld [vmem:[#allocation17 + $0x458] sm:$0xff] }
 0x649   :  { %6495 = vmatprep.subr.bf16.mxu0 %v7200_v29  ;;  %v7272_v29 = vcombine.high %v4742_v17, %v4746_v23 }
 0x64b   :  { %6455 = vmatpush1.bf16.msra.mxu1 %v7325_v42  ;;  %v7397_v42 = vcombine.low %v4869_v15, %v4873_v16  ;;  %v4794_v15 = vld [vmem:[#allocation17 + $0x438] sm:$0xff] }
 0x64c   :  { %6496 = vmatpush1.bf16.msra.mxu0 %v7199_v20  ;;  %6456 = vmatprep.subr.bf16.mxu1 %v7318_v21  ;;  %v7271_v20 = vcombine.low %v4742_v17, %v4746_v23  ;;  %v7390_v21 = vcombine.high %v4861_v38, %v4865_v49  ;;  %v4910_v23 = vld [vmem:[#allocation17 + $0x7d8] sm:$0xff] }
 0x64d   :  { %6497 = vmatprep.subr.bf16.mxu0 %v7192_v43  ;;  %v7264_v43 = vcombine.high %v4734_v9, %v4738_v52 }
 0x64f   :  { %6457 = vmatpush1.bf16.msra.mxu1 %v7317_v31  ;;  %v7389_v31 = vcombine.low %v4861_v38, %v4865_v49  ;;  %v4906_v38 = vld [vmem:[#allocation17 + $0x7b8] sm:$0xff] }
 0x650   :  { %6498 = vmatpush1.bf16.msra.mxu0 %v7191_v39  ;;  %6458 = vmatprep.subr.bf16.mxu1 %v7438_v47  ;;  %v7263_v39 = vcombine.low %v4734_v9, %v4738_v52  ;;  %v7382_v47 = vcombine.high %v4853_v44, %v4857_v45  ;;  %v4894_v52 = vld [vmem:[#allocation17 + $0x758] sm:$0xff] }
 0x651   :  { %6499 = vmatprep.subr.bf16.mxu0 %v7312_v48  ;;  %v7256_v48 = vcombine.high %v4726_v46, %v4730_v30  ;;  %v4890_v44 = vld [vmem:[#allocation17 + $0x738] sm:$0xff] }
 0x652   :  { %v4878_v30 = vld [vmem:[#allocation17 + $0x6d8] sm:$0xff] }
 0x653   :  { %6459 = vmatpush2.bf16.msra.mxu1 %v7437_v34  ;;  %v7376_v34 = vcombine.high %v4846_v50, %v4850_v32 }
 0x654   :  { %6500 = vmatpush2.bf16.msra.mxu0 %v7311_v54  ;;  %6460 = vmatprep.subr.bf16.mxu1 %v7430_v56  ;;  %v4838_v54 = vld [vmem:[#allocation17 + $0x598] sm:$0xff] }
 0x655   :  { %6501 = vmatprep.subr.bf16.mxu0 %v7304_v57  ;;  %v4842_v56 = vld [vmem:[#allocation17 + $0x5b8] sm:$0xff]  ;;  %v7375_v57 = vcombine.low %v4846_v50, %v4850_v32 }
 0x656   :  { %v7368_v58 = vcombine.high %v4838_v54, %v4842_v56  ;;  %v4874_v50 = vld [vmem:[#allocation17 + $0x6b8] sm:$0xff] }
 0x657   :  { %6461 = vmatpush2.bf16.msra.mxu1 %v7429_v61  ;;  %v7367_v61 = vcombine.low %v4838_v54, %v4842_v56 }
 0x658   :  { %6502 = vmatpush2.bf16.msra.mxu0 %v7303_v62  ;;  %6462 = vmatprep.subr.bf16.mxu1 %v7422_v26  ;;  %v7360_v26 = vcombine.high %v4830_v35, %v4834_v59 }
 0x659   :  { %6503 = vmatprep.subr.bf16.mxu0 %v7296_v63  ;;  %v4822_v63 = vld [vmem:[#allocation17 + $0x518] sm:$0xff] }
 0x65b   :  { %6463 = vmatpush2.bf16.msra.mxu1 %v7421_v55  ;;  %v7352_v55 = vcombine.high %v4822_v63, %v4826_v0 }
 0x65c   :  { %6504 = vmatpush2.bf16.msra.mxu0 %v7295_v8  ;;  %6464 = vmatprep.subr.bf16.mxu1 %v7414_v2  ;;  %v4814_v8 = vld [vmem:[#allocation17 + $0x4d8] sm:$0xff] }
 0x65d   :  { %6505 = vmatprep.subr.bf16.mxu0 %v7288_v41  ;;  %v4818_v2 = vld [vmem:[#allocation17 + $0x4f8] sm:$0xff] }
 0x65e   :  { %v7344_v41 = vcombine.high %v4814_v8, %v4818_v2  ;;  %v7343_v1 = vcombine.low %v4814_v8, %v4818_v2 }
 0x65f   :  { %6465 = vmatpush2.bf16.msra.mxu1 %v7413_v11  ;;  %v4802_v11 = vld [vmem:[#allocation17 + $0x478] sm:$0xff] }
 0x660   :  { %6506 = vmatpush2.bf16.msra.mxu0 %v7287_v12  ;;  %6466 = vmatprep.subr.bf16.mxu1 %v7406_v13  ;;  %v7328_v13 = vcombine.high %v4798_v10, %v4802_v11  ;;  %v7327_v16 = vcombine.low %v4798_v10, %v4802_v11 }
 0x661   :  { %6507 = vmatprep.subr.bf16.mxu0 %v7280_v14  ;;  %v4790_v14 = vld [vmem:[#allocation17 + $0x418] sm:$0xff] }
 0x662   :  { %v7320_v17 = vcombine.high %v4790_v14, %v4794_v15 }
 0x663   :  { %6467 = vmatpush2.bf16.msra.mxu1 %v7405_v24  ;;  %v4914_v24 = vld [vmem:[#allocation17 + $0x7f8] sm:$0xff] }
 0x664   :  { %6508 = vmatpush2.bf16.msra.mxu0 %v7279_v25  ;;  %6468 = vmatprep.subr.bf16.mxu1 %v7398_v27  ;;  %v7319_v25 = vcombine.low %v4790_v14, %v4794_v15  ;;  %v7440_v27 = vcombine.high %v4910_v23, %v4914_v24  ;;  %v7439_v49 = vcombine.low %v4910_v23, %v4914_v24 }
 0x665   :  { %6509 = vmatprep.subr.bf16.mxu0 %v7272_v29  ;;  %v4902_v29 = vld [vmem:[#allocation17 + $0x798] sm:$0xff] }
 0x666   :  { %v7432_v9 = vcombine.high %v4902_v29, %v4906_v38 }
 0x667   :  { %6469 = vmatpush2.bf16.msra.mxu1 %v7397_v42  ;;  %v4898_v42 = vld [vmem:[#allocation17 + $0x778] sm:$0xff] }
 0x668   :  { %6510 = vmatpush2.bf16.msra.mxu0 %v7271_v20  ;;  %6470 = vmatprep.subr.bf16.mxu1 %v7390_v21  ;;  %v7431_v20 = vcombine.low %v4902_v29, %v4906_v38  ;;  %v7424_v21 = vcombine.high %v4894_v52, %v4898_v42  ;;  %v7423_v45 = vcombine.low %v4894_v52, %v4898_v42 }
 0x669   :  { %6511 = vmatprep.subr.bf16.mxu0 %v7264_v43  ;;  %v4886_v43 = vld [vmem:[#allocation17 + $0x718] sm:$0xff] }
 0x66a   :  { %v7416_v46 = vcombine.high %v4886_v43, %v4890_v44 }
 0x66b   :  { %6471 = vmatpush2.bf16.msra.mxu1 %v7389_v31  ;;  %v4882_v31 = vld [vmem:[#allocation17 + $0x6f8] sm:$0xff] }
 0x66c   :  { %6512 = vmatpush2.bf16.msra.mxu0 %v7263_v39  ;;  %6472 = vmatprep.subr.bf16.mxu1 %v7382_v47  ;;  %v7415_v39 = vcombine.low %v4886_v43, %v4890_v44  ;;  %v7408_v47 = vcombine.high %v4878_v30, %v4882_v31  ;;  %v7407_v32 = vcombine.low %v4878_v30, %v4882_v31 }
 0x66d   :  { %6513 = vmatprep.subr.bf16.mxu0 %v7256_v48  ;;  %v4870_v48 = vld [vmem:[#allocation17 + $0x698] sm:$0xff] }
 0x66e   :  { %v7399_v54 = vcombine.low %v4870_v48, %v4874_v50 }
 0x66f   :  { %6473 = vmatpush2.bf16.msra.mxu1 %v7381_v51  ;;  %v7400_v51 = vcombine.high %v4870_v48, %v4874_v50 }
 0x670   :  { %6514 = vmatpush2.bf16.msra.mxu0 %v7255_v53  ;;  %6524 = vmatprep.subr.bf16.mxu1 %v7376_v34  ;;  %v4862_v53 = vld [vmem:[#allocation17 + $0x658] sm:$0xff] }
 0x671   :  { %v4866_v34 = vld [vmem:[#allocation17 + $0x678] sm:$0xff] }
 0x672   :  { %6475 = vmatmul.mubr.bf16.vlgmr.msra.gmra.mxu1 %v8880_v19  ;;  %v8895_v60 = vpop.f32.mrf.mxu0  ;;  %v7392_v56 = vcombine.high %v4862_v53, %v4866_v34  ;;  %v7391_v35 = vcombine.low %v4862_v53, %v4866_v34 }
 0x673   :  { %6516 = vmatmul.mubr.bf16.vlgmr.msra.gmra.mxu0 %v8866_v33  ;;  %6525 = vmatpush1.bf16.msra.mxu1 %v7375_v57  ;;  %v7351_v33 = vcombine.low %v4822_v63, %v4826_v0  ;;  %v4854_v57 = vld [vmem:[#allocation17 + $0x618] sm:$0xff] }
 0x674   :  { %6556 = vmatprep.mubr.bf16.mxu1 %v8878_v18  ;;  %v8899_v62 = vpop.f32.mrf.mxu0  ;;  %6526 = vmatprep.subr.bf16.mxu1 %v7368_v58  ;;  %v4810_v18 = vld [vmem:[#allocation17 + $0x4b8] sm:$0xff] }
 0x675   :  { %v7336_v7 = vcombine.high %v4806_v6, %v4810_v18  ;;  %v7335_v12 = vcombine.low %v4806_v6, %v4810_v18  ;;  %v4858_v58 = vld [vmem:[#allocation17 + $0x638] sm:$0xff] }
 0x676   :  { %v6275_v3 = vpop.f32.mrf.mxu0  ;;  %v7384_v59 = vcombine.high %v4854_v57, %v4858_v58 }
 0x677   :  { %6527 = vmatpush1.bf16.msra.mxu1 %v7367_v61  ;;  %v8904_v61 = vld [vmem:[%s8943_s12] sm:$0xff]  ;;  %s8625_s12 = smov [#allocation20]  }
 0x678   :  { %v6276_v5 = vpop.f32.mrf.mxu0  ;;  %6528 = vmatprep.subr.bf16.mxu1 %v7360_v26  ;;  %v7383_v26 = vcombine.low %v4854_v57, %v4858_v58  ;;  %v4920_v63 = vrot.slane %v8904_v61, %v8789_v28  ;;  %v4924_v0 = vrot.slane %v8904_v61, %v8792_v36  ;;  %v4928_v36 = vrot.slane %v8904_v61, %v8807_v37  ;;  %s6590_s29 = sshll.u32 %s8625_s12, 4  ;;  %s6591_s29 = int_to_ptr.vmem [resolvable:$true] %s6590_s29 }
 0x679   :  { %s8552_s0 = scalar_lea.vmem %s6591_s29, 128  ;;  %p8557_p9 = scmp.lt.s32.totalorder %s6591_s29, %s6591_s29 }
 0x67a   :  { %v6272_v3 = vadd.f32 %v8895_v60, %v4920_v63  ;;  %p8553_p8 = scmp.ne.s32.totalorder %s6591_s29, %s8552_s0  ;;  %p8558_p10 = scmp.lt.s32.totalorder %s8552_s0, %s8552_s0 }
 0x67b   :  { %6529 = vmatpush1.bf16.msra.mxu1 %v7359_v4 }
 0x67c   :  { %6530 = vmatprep.subr.bf16.mxu1 %v7352_v55  ;;  %v6274_v55 = vadd.f32 %v8899_v62, %v4924_v0  ;;  %p8559_p11 = por %p8558_p10, %p8557_p9 }
 0x67e   :  { %p8560_p12 = pnand %p8559_p11, %p8553_p8 }
 0x67f   :  { %6531 = vmatpush1.bf16.msra.mxu1 %v7351_v33 }
 0x680   :  { %6532 = vmatprep.subr.bf16.mxu1 %v7344_v41 }
 0x683   :  { %6533 = vmatpush1.bf16.msra.mxu1 %v7343_v1 }
 0x684   :  { %6534 = vmatprep.subr.bf16.mxu1 %v7336_v7 }
 0x687   :  { %6535 = vmatpush1.bf16.msra.mxu1 %v7335_v12 }
 0x688   :  { %6536 = vmatprep.subr.bf16.mxu1 %v7328_v13 }
 0x68b   :  { %6537 = vmatpush1.bf16.msra.mxu1 %v7327_v16 }
 0x68c   :  { %6538 = vmatprep.subr.bf16.mxu1 %v7320_v17 }
 0x68f   :  { %6539 = vmatpush1.bf16.msra.mxu1 %v7319_v25 }
 0x690   :  { %6540 = vmatprep.subr.bf16.mxu1 %v7440_v27 }
 0x693   :  { %6541 = vmatpush2.bf16.msra.mxu1 %v7439_v49 }
 0x694   :  { %6542 = vmatprep.subr.bf16.mxu1 %v7432_v9 }
 0x697   :  { %6543 = vmatpush2.bf16.msra.mxu1 %v7431_v20 }
 0x698   :  { %6544 = vmatprep.subr.bf16.mxu1 %v7424_v21 }
 0x69b   :  { %6545 = vmatpush2.bf16.msra.mxu1 %v7423_v45 }
 0x69c   :  { %6546 = vmatprep.subr.bf16.mxu1 %v7416_v46 }
 0x69f   :  { %6547 = vmatpush2.bf16.msra.mxu1 %v7415_v39 }
 0x6a0   :  { %6548 = vmatprep.subr.bf16.mxu1 %v7408_v47 }
 0x6a3   :  { %6549 = vmatpush2.bf16.msra.mxu1 %v7407_v32 }
 0x6a4   :  { %6550 = vmatprep.subr.bf16.mxu1 %v7400_v51 }
 0x6a7   :  { %6551 = vmatpush2.bf16.msra.mxu1 %v7399_v54 }
 0x6a8   :  { %6552 = vmatprep.subr.bf16.mxu1 %v7392_v56 }
 0x6ab   :  { %6553 = vmatpush2.bf16.msra.mxu1 %v7391_v35 }
 0x6ac   :  { %6554 = vmatprep.subr.bf16.mxu1 %v7384_v59 }
 0x6af   :  { %6555 = vmatpush2.bf16.msra.mxu1 %v7383_v26 }
 0x6b2   :  { %6557 = vmatmul.mubr.bf16.vlgmr.msra.gmra.mxu1 %v8880_v19  ;;  %v6312_v4 = vpop.f32.mrf.mxu1  ;;  %v6353_v5 = vpop.f32.mrf.mxu0  ;;  %v4932_v19 = vrot.slane %v8904_v61, %v8810_v40 }
 0x6b3   :  { %v6313_v8 = vadd.f32 %v6312_v4, %v6272_v3  ;;  %v6354_v60 = vadd.f32 %v6353_v5, %v4928_v36 }
 0x6b4   :  { %v6314_v2 = vpop.f32.mrf.mxu1  ;;  %v6355_v33 = vpop.f32.mrf.mxu0 }
 0x6b5   :  { %6565 = vst [vmem:[#allocation19] sm:$0xff] %v6313_v8  ;;  %v6315_v41 = vadd.f32 %v6314_v2, %v6274_v55  ;;  %v6356_v10 = vadd.f32 %v6355_v33, %v4932_v19 }
 0x6b6   :  { %v6316_v6 = vpop.f32.mrf.mxu1  ;;  %v6357_v18 = vpop.f32.mrf.mxu0 }
 0x6b7   :  { %6566 = vst [vmem:[#allocation19 + $0x8] sm:$0xff] %v6315_v41 }
 0x6b8   :  { %v6317_v28 = vpop.f32.mrf.mxu1  ;;  %v6358_v1 = vpop.f32.mrf.mxu0 }
 0x6f2   :  { %v6394_v7 = vpop.f32.mrf.mxu1 }
 0x6f3   :  { %v6395_v62 = vadd.f32 %v6394_v7, %v6354_v60  ;;  %v6435_v11 = vpop.f32.mrf.mxu0 }
 0x6f4   :  { %v6396_v12 = vpop.f32.mrf.mxu1 }
 0x6f5   :  { %6567 = vst [vmem:[#allocation19 + $0x10] sm:$0xff] %v6395_v62  ;;  %v6397_v13 = vadd.f32 %v6396_v12, %v6356_v10  ;;  %v6437_v14 = vpop.f32.mrf.mxu0 }
 0x6f6   :  { %v6398_v15 = vpop.f32.mrf.mxu1 }
 0x6f7   :  { %6568 = vst [vmem:[#allocation19 + $0x18] sm:$0xff] %v6397_v13  ;;  %v6439_v16 = vpop.f32.mrf.mxu0 }
 0x6f8   :  { %v6399_v17 = vpop.f32.mrf.mxu1 }
 0x6f9   :  { %v6440_v37 = vpop.f32.mrf.mxu0 }
 0x6fa   :  { %8563 = shalt.err (!%p8560_p12)
}
 0x6fb   :  { %6593 = dma.vmem_to_hbm [thread:$0]  %s6591_s29, 128, %s8945_s14, [#allocation21]   ;;  %v4935_v40 = vsub.s32 4, %v8784_v22  ;;  %v4939_v23 = vsub.s32 5, %v8784_v22  ;;  %v4943_v46 = vsub.s32 6, %v8784_v22  ;;  %v4947_v30 = vsub.s32 7, %v8784_v22 }
 0x6fc   :  { %s8626_s14 = smov [#allocation19]  }
 0x6fd   :  { %v4936_v24 = vrot.slane %v8904_v61, %v4935_v40  ;;  %v4940_v25 = vrot.slane %v8904_v61, %v4939_v23  ;;  %v4944_v31 = vrot.slane %v8904_v61, %v4943_v46  ;;  %v4948_v39 = vrot.slane %v8904_v61, %v4947_v30  ;;  %s6580_s18 = sshll.u32 %s8626_s14, 4  ;;  %s6581_s18 = int_to_ptr.vmem [resolvable:$true] %s6580_s18 }
 0x6fe   :  { %s8572_s19 = scalar_lea.vmem %s6581_s18, 1024  ;;  %p8577_p0 = scmp.lt.s32.totalorder %s6581_s18, %s6581_s18 }
 0x6ff   :  { %v6436_v27 = vadd.f32 %v6435_v11, %v4936_v24  ;;  %v6438_v38 = vadd.f32 %v6437_v14, %v4940_v25  ;;  %p8573_p13 = scmp.ne.s32.totalorder %s6581_s18, %s8572_s19  ;;  %p8578_p1 = scmp.lt.s32.totalorder %s8572_s19, %s8572_s19 }
 0x701   :  { %p8579_p2 = por %p8578_p1, %p8577_p0 }
 0x703   :  { %p8580_p3 = pnand %p8579_p2, %p8573_p13 }
 0x732   :  { %v6476_v29 = vpop.f32.mrf.mxu1 }
 0x733   :  { %v6477_v49 = vadd.f32 %v6476_v29, %v6436_v27  ;;  %v6517_v9 = vpop.f32.mrf.mxu0 }
 0x734   :  { %v6478_v52 = vpop.f32.mrf.mxu1  ;;  %v6518_v47 = vadd.f32 %v6517_v9, %v4944_v31 }
 0x735   :  { %6569 = vst [vmem:[#allocation19 + $0x20] sm:$0xff] %v6477_v49  ;;  %v6479_v42 = vadd.f32 %v6478_v52, %v6438_v38  ;;  %v6519_v20 = vpop.f32.mrf.mxu0 }
 0x736   :  { %v6480_v21 = vpop.f32.mrf.mxu1  ;;  %v6520_v50 = vadd.f32 %v6519_v20, %v4948_v39 }
 0x737   :  { %6570 = vst [vmem:[#allocation19 + $0x28] sm:$0xff] %v6479_v42  ;;  %v6521_v43 = vpop.f32.mrf.mxu0 }
 0x738   :  { %v6481_v44 = vpop.f32.mrf.mxu1 }
 0x739   :  { %v6522_v45 = vpop.f32.mrf.mxu0 }
 0x772   :  { %v6558_v48 = vpop.f32.mrf.mxu1 }
 0x773   :  { %v6559_v32 = vadd.f32 %v6558_v48, %v6518_v47 }
 0x774   :  { %v6560_v51 = vpop.f32.mrf.mxu1 }
 0x775   :  { %6571 = vst [vmem:[#allocation19 + $0x30] sm:$0xff] %v6559_v32  ;;  %v6561_v53 = vadd.f32 %v6560_v51, %v6520_v50 }
 0x776   :  { %v6562_v34 = vpop.f32.mrf.mxu1 }
 0x777   :  { %6572 = vst [vmem:[#allocation19 + $0x38] sm:$0xff] %v6561_v53 }
 0x778   :  { %v6563_v54 = vpop.f32.mrf.mxu1 }
 0x779   :  { %8583 = shalt.err (!%p8580_p3)
}
 0x77a   :  { %6583 = dma.vmem_to_hbm [thread:$0]  %s6581_s18, 1024, %s8944_s13, [#allocation4]  }
 0x77b   :  { %8604 = dma.done.wait [#allocation4], 1024  }
 0x77c   :  { %8605 = vsyncadd [#allocation4], 4294966272 }
 0x77d   :  { %8606 = dma.done.wait [#allocation21], 128  }
 0x77e   :  { %8607 = vsyncadd [#allocation21], 4294967168 }
 0x77f   :  { %6600 = vsyncpa [#allocation3], 1 }
 0x780   :  { %6601 = vsyncpa [#allocation6], 1 }
 0x781   :  { %6602 = vsyncpa [#allocation9], 1 }
 0x782   :  { %6603 = vsyncpa [#allocation12], 1 }
 0x783   :  { %6604 = vsyncpa [#allocation15], 1 }
 0x784   :  { %6605 = vsyncpa [#allocation18], 1 }
 0x785   :  { %6606 = vsyncpa [#allocation4], 1 }
 0x786   :  { %6607 = vsyncpa [#allocation21], 1 }

</bundles_post_ra>
